<compile_context>
chip_gen: v7x
topology: tpu7x:2x2x1
jax: 0.10.0
libtpu: 0.0.40
codegen_flags: <defaults>
</compile_context>

<pallas_src>
import functools
import math

import jax
import jax.numpy as jnp
import numpy as np
from jax.experimental import pallas as pl
from jax.experimental.pallas import tpu as pltpu

LANE = 128

_SOBEL_X = np.array([-1, 0, 1, -2, 0, 2, -1, 0, 1], np.float32)
_SOBEL_Y = np.array([-1, -2, -1, 0, 0, 0, 1, 2, 1], np.float32)


def _round_up(x, m):
    return (x + m - 1) // m * m


# ---------------------------------------------------------------------------
# numerically-stable activations (exp on EUP, approx reciprocal on EUP)
# ---------------------------------------------------------------------------
def _sigmoid(v):
    z = jnp.exp(-jnp.abs(v))
    inv = pl.reciprocal(1.0 + z, approx=True)
    return jnp.where(v >= 0, inv, z * inv)


def _silu(v):
    return v * _sigmoid(v)


# ---------------------------------------------------------------------------
# static "tap selection" matrices: depthwise conv / max-pool as matmul gathers
# ---------------------------------------------------------------------------
def _tap_matrices(H, W, K, stride, pad, dil):
    """Per-tap gather matrices for a KxK depthwise conv on a flat (H*W, C) map.

    Returns (Ho, Wo, taps, mats): taps[i] is the original ky*K+kx index of
    mats[i]; each mats[i] is (Ho*Wo, H*W) 0/1 float32.  Zero padding is encoded
    as all-zero rows; taps that only ever see padding are dropped.
    """
    Ho = (H + 2 * pad - dil * (K - 1) - 1) // stride + 1
    Wo = (W + 2 * pad - dil * (K - 1) - 1) // stride + 1
    taps, mats = [], []
    for ky in range(K):
        for kx in range(K):
            S = np.zeros((Ho * Wo, H * W), np.float32)
            valid = False
            for i in range(Ho):
                yy = stride * i + dil * ky - pad
                if not (0 <= yy < H):
                    continue
                for j in range(Wo):
                    xx = stride * j + dil * kx - pad
                    if 0 <= xx < W:
                        S[i * Wo + j, yy * W + xx] = 1.0
                        valid = True
            if valid:
                taps.append(ky * K + kx)
                mats.append(S)
    return Ho, Wo, taps, mats


def _num_tensorcores():
    """Best-effort TensorCore-per-device count; any failure falls back to 1."""
    try:
        kind = jax.devices()[0].device_kind.lower()
    except Exception:
        return 1
    if "v7" in kind or "tpu7" in kind:
        return 2
    return 1


# ---------------------------------------------------------------------------
# the single fused kernel
# ---------------------------------------------------------------------------
def _make_kernel(meta):
    vec_idx = meta["vec"]
    mat_idx = meta["mat"]

    def kernel(x_ref, vec_ref, mat_ref, s_d1_ref, s_g_ref, s_d2_ref, s_m_ref,
               s_d3_ref, out_ref, d2_ref):

        def vec(name):
            r0, nr, w = vec_idx[name]
            return vec_ref[r0:r0 + nr, :w]

        def wmat(name):
            i, kk, cc = mat_idx[name]
            return mat_ref[i, :kk, :cc]

        def mdot(a, b):
            return jnp.dot(a.astype(jnp.bfloat16), b.astype(jnp.bfloat16),
                           preferred_element_type=jnp.float32)

        def dw_accumulate(gat, taps, how, w):
            acc = None
            for slot, k in enumerate(taps):
                g = gat[slot * how:(slot + 1) * how, :]
                t = g * w[k:k + 1, :]
                acc = t if acc is None else acc + t
            return acc

        def downsample(x, name, s_ref):
            m = meta[name]
            how = m["HoWo"]
            gat = mdot(s_ref[...], x)            # all 9 taps: ONE stacked MXU matmul
            acc = dw_accumulate(gat, m["taps"], how, vec(name + "_dw_w"))
            h = _silu(acc * vec(name + "_dw_sc") + vec(name + "_dw_sh"))
            y = mdot(h, wmat(name + "_pw")) + vec(name + "_pw_b")
            if m["use_pool"]:
                p = None
                for slot in m["pool_slots"]:     # reuse the same gathers for max-pool
                    g = gat[slot * how:(slot + 1) * how, :]
                    p = g if p is None else jnp.maximum(p, g)
                y = y + mdot(p, wmat(name + "_poolE"))
            return _silu(y * vec(name + "_bn_sc") + vec(name + "_bn_sh"))

        x = x_ref[0]                             # (H0*W0, spg*Cin)

        # ---- down1 ---------------------------------------------------------
        d1 = downsample(x, "d1", s_d1_ref)

        # ---- gradient feature module (Sobel folded into the gather matrix) --
        hw1 = meta["HW1"]
        gxy = mdot(s_g_ref[...], d1)             # rows [0:hw1]=gx, [hw1:2*hw1]=gy
        hx = _silu(gxy[:hw1, :] * vec("g_sc_x") + vec("g_sh_x"))
        hy = _silu(gxy[hw1:, :] * vec("g_sc_y") + vec("g_sh_y"))
        r = mdot(hx, wmat("g_pw_x")) + mdot(hy, wmat("g_pw_y"))
        d1 = d1 + _silu(r * vec("g_bn_sc") + vec("g_bn_sh"))

        # ---- down2 + residual/SE blocks -------------------------------------
        d2 = downsample(d1, "d2", s_d2_ref)
        mm = meta["mid"]
        for blk in ("m0", "m1"):
            gat = mdot(s_m_ref[...], d2)
            acc = dw_accumulate(gat, mm["taps"], mm["HoWo"], vec(blk + "_dw_w"))
            h = _silu(acc * vec(blk + "_dw_sc") + vec(blk + "_dw_sh"))
            y = mdot(h, wmat(blk + "_pw"))
            y = y * vec(blk + "_bn_sc") + vec(blk + "_bn_sh")
            pooled = jnp.mean(y, axis=0, keepdims=True)               # SE
            a = _silu(mdot(pooled, wmat(blk + "_se1")))
            a = _sigmoid(mdot(a, wmat(blk + "_se2")))
            d2 = _silu(d2 + y * a)
        d2_ref[0] = d2

        # ---- down3 + ASPP ----------------------------------------------------
        d3 = downsample(d2, "d3", s_d3_ref)
        b0 = _silu(mdot(d3, wmat("c1_w")) * vec("c1_bn_sc") + vec("c1_bn_sh"))
        acc = mdot(b0, wmat("proj_w0"))          # project(concat) == sum of matmuls
        for i in range(meta["num_rates"]):
            # dilated dw degenerates to centre tap at 2x2; dw weight folded into sc
            h = _silu(d3 * vec("a%d_sc" % i) + vec("a%d_sh" % i))
            acc = acc + mdot(h, wmat("a%d_pwproj" % i))
        pm = jnp.mean(d3, axis=0, keepdims=True)                      # global pool
        pb = _silu(mdot(pm, wmat("pool_w")))
        pb = pb * vec("pool_bn_sc") + vec("pool_bn_sh")
        acc = acc + mdot(pb, wmat("proj_w4"))    # bilinear-from-1x1 == broadcast
        out_ref[0] = _silu(acc * vec("proj_bn_sc") + vec("proj_bn_sh"))

    return kernel


# ---------------------------------------------------------------------------
# forward wrapper: weight folding / widening / packing / tap-matrix building
# ---------------------------------------------------------------------------
def micronet_forward(params, x_nchw, ch=(10, 20, 26), rates=(6, 12, 18)):
    N, Cin, H0, W0 = x_nchw.shape
    c1, c2, c3 = ch

    # ---- batch layout: samples-per-grid-step stacked into lanes --------------
    ncores = _num_tensorcores()
    g0 = math.gcd(N, ncores)
    spg = N // g0                                  # samples stacked into lanes
    if spg * max(Cin, c1, c2, c3) > LANE:
        spg = 1                                    # keep every map <= 128 lanes wide
    num_prog = N // spg

    def widen_vec(v):                              # (1,C) -> (1, spg*C)
        return jnp.tile(jnp.asarray(v, jnp.float32).reshape(1, -1), (1, spg))

    def widen_rows(v):                             # (R,C) -> (R, spg*C)
        return jnp.tile(jnp.asarray(v, jnp.float32), (1, spg))

    def widen_mat(m):                              # (K,C) -> block-diag (spg*K, spg*C)
        m = jnp.asarray(m, jnp.float32)
        if spg == 1:
            return m
        return jnp.kron(jnp.eye(spg, dtype=jnp.float32), m)

    vec_entries, mat_entries = [], []

    def add_vec(name, arr):
        arr = jnp.asarray(arr, jnp.float32)
        if arr.ndim == 1:
            arr = arr.reshape(1, -1)
        vec_entries.append((name, arr))

    def add_mat(name, arr):
        mat_entries.append((name, jnp.asarray(arr, jnp.float32)))

    def stack_S(mats):
        return jnp.asarray(np.concatenate(mats, axis=0), jnp.bfloat16)

    meta = {"num_rates": len(rates)}

    # ---- downsample modules ---------------------------------------------------
    def prep_down(name, p, H, W, cin, cout):
        assert H % 2 == 0 and W % 2 == 0, "MicroDownsample needs even H/W"
        use_pool = cin < cout
        conv_out = cout - cin if use_pool else cout
        Ho, Wo, taps, mats = _tap_matrices(H, W, 3, 2, 1, 1)
        # max-pool 2x2 phases == stride-2 conv taps (1,1),(1,2),(2,1),(2,2)
        pool_slots = [s for s, k in enumerate(taps) if k in (4, 5, 7, 8)]
        meta[name] = {"taps": taps, "HoWo": Ho * Wo, "use_pool": use_pool,
                      "pool_slots": pool_slots}
        S = stack_S(mats)
        add_vec(name + "_dw_w", widen_rows(p["conv"]["dw_w"]))
        add_vec(name + "_dw_sc", widen_vec(p["conv"]["dw_scale"]))
        add_vec(name + "_dw_sh", widen_vec(p["conv"]["dw_shift"]))
        pw_w, pw_b = p["conv"]["pw_w"], p["conv"]["pw_b"]
        if use_pool:
            pw_w = jnp.pad(pw_w, ((0, 0), (0, cin)))      # widen to concat width
            pw_b = jnp.pad(pw_b, ((0, 0), (0, cin)))
            poolE = np.concatenate([np.zeros((cin, conv_out), np.float32),
                                    np.eye(cin, dtype=np.float32)], axis=1)
            add_mat(name + "_poolE", widen_mat(poolE))
        add_mat(name + "_pw", widen_mat(pw_w))
        add_vec(name + "_pw_b", widen_vec(pw_b))
        add_vec(name + "_bn_sc", widen_vec(p["bn_scale"]))
        add_vec(name + "_bn_sh", widen_vec(p["bn_shift"]))
        return Ho, Wo, S

    # ---- gradient feature module (Sobel folded into the gather matrices) ------
    def prep_grad(p, H, W, C):
        _, _, taps, mats = _tap_matrices(H, W, 3, 1, 1, 1)
        HW = H * W
        Sx = np.zeros((HW, HW), np.float32)
        Sy = np.zeros((HW, HW), np.float32)
        for s, k in zip(mats, taps):
            Sx += _SOBEL_X[k] * s
            Sy += _SOBEL_Y[k] * s
        S = jnp.asarray(np.concatenate([Sx, Sy], axis=0), jnp.bfloat16)
        meta["HW1"] = HW
        # refine.dw (1x1 per-channel) folded with refine.bn scale; split gx/gy halves
        eff_sc = p["refine"]["dw_w"] * p["refine"]["dw_scale"]        # (1, 2C)
        sh = p["refine"]["dw_shift"]
        add_vec("g_sc_x", widen_vec(eff_sc[:, :C]))
        add_vec("g_sc_y", widen_vec(eff_sc[:, C:]))
        add_vec("g_sh_x", widen_vec(sh[:, :C]))
        add_vec("g_sh_y", widen_vec(sh[:, C:]))
        pw = p["refine"]["pw_w"]                                      # (2C, C)
        add_mat("g_pw_x", widen_mat(pw[:C, :]))
        add_mat("g_pw_y", widen_mat(pw[C:, :]))
        add_vec("g_bn_sc", widen_vec(p["bn_scale"]))
        add_vec("g_bn_sh", widen_vec(p["bn_shift"]))
        return S

    # ---- residual + SE blocks --------------------------------------------------
    def prep_mid_taps(H, W):
        Ho, Wo, taps, mats = _tap_matrices(H, W, 3, 1, 1, 1)
        meta["mid"] = {"taps": taps, "HoWo": Ho * Wo}
        return stack_S(mats)

    def prep_mid(blk, p):
        add_vec(blk + "_dw_w", widen_rows(p["conv"]["dw_w"]))
        add_vec(blk + "_dw_sc", widen_vec(p["conv"]["dw_scale"]))
        add_vec(blk + "_dw_sh", widen_vec(p["conv"]["dw_shift"]))
        add_mat(blk + "_pw", widen_mat(p["conv"]["pw_w"]))
        add_vec(blk + "_bn_sc", widen_vec(p["bn_scale"]))
        add_vec(blk + "_bn_sh", widen_vec(p["bn_shift"]))
        add_mat(blk + "_se1", widen_mat(p["se_w1"]))
        add_mat(blk + "_se2", widen_mat(p["se_w2"]))

    # ---- ASPP context module ----------------------------------------------------
    def prep_ctx(p, H, W, C):
        add_mat("c1_w", widen_mat(p["c1_w"]))
        add_vec("c1_bn_sc", widen_vec(p["c1_bn_scale"]))
        add_vec("c1_bn_sh", widen_vec(p["c1_bn_shift"]))
        proj = p["proj_w"]                           # (C*(len(rates)+2), C)
        add_mat("proj_w0", widen_mat(proj[:C, :]))
        for i, rate in enumerate(rates):
            _, _, taps, mats = _tap_matrices(H, W, 3, 1, rate, rate)
            degenerate = (taps == [4]
                          and np.array_equal(mats[0], np.eye(H * W, dtype=np.float32)))
            if not degenerate:
                # TODO(synk): general (non-degenerate) dilated ASPP taps at larger
                # resolutions need their own gather stack; not exercised at 2x2.
                raise NotImplementedError("ASPP branch is not centre-tap degenerate")
            ap = p["aspp"][i]
            eff_sc = ap["dw_scale"] * ap["dw_w"][4:5, :]   # fold centre dw into BN scale
            add_vec("a%d_sc" % i, widen_vec(eff_sc))
            add_vec("a%d_sh" % i, widen_vec(ap["dw_shift"]))
            add_mat("a%d_pwproj" % i,
                    widen_mat(jnp.dot(ap["pw_w"], proj[C * (i + 1):C * (i + 2), :])))
        add_mat("pool_w", widen_mat(p["pool_w"]))
        add_vec("pool_bn_sc", widen_vec(p["pool_bn_scale"]))
        add_vec("pool_bn_sh", widen_vec(p["pool_bn_shift"]))
        add_mat("proj_w4", widen_mat(proj[C * (len(rates) + 1):, :]))
        add_vec("proj_bn_sc", widen_vec(p["proj_bn_scale"]))
        add_vec("proj_bn_sh", widen_vec(p["proj_bn_shift"]))

    H1, W1, S_d1 = prep_down("d1", params["down1"], H0, W0, Cin, c1)
    S_g = prep_grad(params["grad"], H1, W1, c1)
    H2, W2, S_d2 = prep_down("d2", params["down2"], H1, W1, c1, c2)
    S_m = prep_mid_taps(H2, W2)
    prep_mid("m0", params["mid0"])
    prep_mid("m1", params["mid1"])
    H3, W3, S_d3 = prep_down("d3", params["down3"], H2, W2, c2, c3)
    prep_ctx(params["ctx"], H3, W3, c3)

    # ---- pack all tiny per-channel rows into ONE (R,128) f32 operand -----------
    vec_index, vec_rows, nrows = {}, [], 0
    for name, arr in vec_entries:
        nr, w = arr.shape
        if w > LANE:
            raise ValueError("packed vector wider than one lane tile: %s" % name)
        align = (-nrows) % 8
        if align:
            vec_rows.append(jnp.zeros((align, LANE), jnp.float32))
            nrows += align
        vec_index[name] = (nrows, nr, w)
        vec_rows.append(jnp.pad(arr, ((0, 0), (0, LANE - w))))
        nrows += nr
    tail = (-nrows) % 8
    if tail:
        vec_rows.append(jnp.zeros((tail, LANE), jnp.float32))
        nrows += tail
    VEC = jnp.concatenate(vec_rows, axis=0)

    # ---- pack all small weight matrices into ONE padded bf16 operand -----------
    maxK = max(a.shape[0] for _, a in mat_entries)
    maxC = max(a.shape[1] for _, a in mat_entries)
    PK = _round_up(maxK, 16)
    PC = _round_up(maxC, LANE)
    mat_index, padded = {}, []
    for i, (name, a) in enumerate(mat_entries):
        kk, cc = a.shape
        mat_index[name] = (i, kk, cc)
        padded.append(jnp.pad(a, ((0, PK - kk), (0, PC - cc))))
    MAT = jnp.stack(padded, axis=0).astype(jnp.bfloat16)

    meta["vec"] = vec_index
    meta["mat"] = mat_index

    # ---- input layout: (num_prog, H*W, spg*Cin), samples interleaved on lanes --
    x = jnp.transpose(x_nchw.astype(jnp.float32), (0, 2, 3, 1))   # (N,H,W,Cin)
    x = x.reshape(num_prog, spg, H0, W0, Cin)
    x = jnp.transpose(x, (0, 2, 3, 1, 4)).reshape(num_prog, H0 * W0, spg * Cin)

    # ---- VMEM footprint guard (tap-matrix scheme scales ~O((H*W)^2)) -----------
    operand_bytes = sum(int(np.prod(a.shape)) * a.dtype.itemsize
                        for a in (VEC, MAT, S_d1, S_g, S_d2, S_m, S_d3))
    operand_bytes += (H0 * W0 * spg * Cin + H3 * W3 * spg * c3
                      + H2 * W2 * spg * c2) * 4
    vmem_need = 2 * operand_bytes + (4 << 20)      # double buffering + headroom
    if vmem_need > (60 << 20):
        raise ValueError("tap-matrix VMEM footprint too large at this resolution; "
                         "use a row-strip BlockSpec pipeline instead")
    vmem_limit = int(min(60 << 20, max(32 << 20, vmem_need)))

    in_specs = [
        pl.BlockSpec((1, H0 * W0, spg * Cin), lambda g: (g, 0, 0)),
        pl.BlockSpec(VEC.shape, lambda g: (0, 0)),
        pl.BlockSpec(MAT.shape, lambda g: (0, 0, 0)),
        pl.BlockSpec(S_d1.shape, lambda g: (0, 0)),
        pl.BlockSpec(S_g.shape, lambda g: (0, 0)),
        pl.BlockSpec(S_d2.shape, lambda g: (0, 0)),
        pl.BlockSpec(S_m.shape, lambda g: (0, 0)),
        pl.BlockSpec(S_d3.shape, lambda g: (0, 0)),
    ]
    out_shape = (jax.ShapeDtypeStruct((num_prog, H3 * W3, spg * c3), jnp.float32),
                 jax.ShapeDtypeStruct((num_prog, H2 * W2, spg * c2), jnp.float32))
    out_specs = (pl.BlockSpec((1, H3 * W3, spg * c3), lambda g: (g, 0, 0)),
                 pl.BlockSpec((1, H2 * W2, spg * c2), lambda g: (g, 0, 0)))

    kernel = _make_kernel(meta)
    out_flat, d2_flat = pl.pallas_call(
        kernel,
        out_shape=out_shape,
        grid=(num_prog,),
        in_specs=in_specs,
        out_specs=out_specs,
        compiler_params=pltpu.CompilerParams(
            dimension_semantics=("parallel",),
            vmem_limit_bytes=vmem_limit),
    )(x, VEC, MAT, S_d1, S_g, S_d2, S_m, S_d3)

    # ---- un-interleave batch lanes back to NCHW ---------------------------------
    out = out_flat.reshape(num_prog, H3, W3, spg, c3)
    out = jnp.transpose(out, (0, 3, 4, 1, 2)).reshape(N, c3, H3, W3)
    d2 = d2_flat.reshape(num_prog, H2, W2, spg, c2)
    d2 = jnp.transpose(d2, (0, 3, 4, 1, 2)).reshape(N, c2, H2, W2)
    return out, d2


# ---------------------------------------------------------------------------
# deterministic synthetic parameter initialization (eval-mode BN folded)
# ---------------------------------------------------------------------------
def _normal(key, shape, scl=0.3):
    return scl * jax.random.normal(key, shape, dtype=jnp.float32)


def init_bn(key, c, eps):
    k1, k2, k3, k4 = jax.random.split(key, 4)
    gamma = 1.0 + 0.1 * jax.random.normal(k1, (c,), jnp.float32)
    beta = 0.1 * jax.random.normal(k2, (c,), jnp.float32)
    mean = 0.1 * jax.random.normal(k3, (c,), jnp.float32)
    var = 1.0 + 0.2 * jax.random.uniform(k4, (c,), dtype=jnp.float32)
    scale = gamma / jnp.sqrt(var + eps)
    shift = beta - mean * scale
    return scale.reshape(1, c), shift.reshape(1, c)


def init_separable(key, cin, cout, K, bias):
    k = jax.random.split(key, 4)
    dw_s, dw_h = init_bn(k[1], cin, 1e-3)
    p = {"dw_w": _normal(k[0], (K * K, cin)),
         "dw_scale": dw_s, "dw_shift": dw_h,
         "pw_w": _normal(k[2], (cin, cout))}
    if bias:
        p["pw_b"] = _normal(k[3], (1, cout), 0.1)
    return p


def init_down(key, cin, cout):
    use_pool = cin < cout
    conv_out = cout - cin if use_pool else cout
    k = jax.random.split(key, 2)
    bs, bh = init_bn(k[1], cout, 1e-3)
    return {"conv": init_separable(k[0], cin, conv_out, 3, True),
            "bn_scale": bs, "bn_shift": bh}


def init_residual(key, c, r=4):
    k = jax.random.split(key, 4)
    bs, bh = init_bn(k[1], c, 1e-3)
    return {"conv": init_separable(k[0], c, c, 3, False),
            "bn_scale": bs, "bn_shift": bh,
            "se_w1": _normal(k[2], (c, c // r)),
            "se_w2": _normal(k[3], (c // r, c))}


def init_params(key, in_ch, ch, rates):
    c1, c2, c3 = ch
    ki = iter(jax.random.split(key, 16))
    prm = {"down1": init_down(next(ki), in_ch, c1)}

    kg = jax.random.split(next(ki), 2)
    gbs, gbh = init_bn(kg[1], c1, 1e-3)
    prm["grad"] = {"refine": init_separable(kg[0], 2 * c1, c1, 1, False),
                   "bn_scale": gbs, "bn_shift": gbh}

    prm["down2"] = init_down(next(ki), c1, c2)
    prm["mid0"] = init_residual(next(ki), c2)
    prm["mid1"] = init_residual(next(ki), c2)
    prm["down3"] = init_down(next(ki), c2, c3)

    kc = jax.random.split(next(ki), 8)
    c1s, c1h = init_bn(kc[1], c3, 1e-5)
    pbs, pbh = init_bn(kc[4], c3, 1e-5)
    prs, prh = init_bn(kc[6], c3, 1e-5)
    prm["ctx"] = {
        "c1_w": _normal(kc[0], (c3, c3)),
        "c1_bn_scale": c1s, "c1_bn_shift": c1h,
        "aspp": [init_separable(k, c3, c3, 3, False)
                 for k in jax.random.split(kc[2], len(rates))],
        "pool_w": _normal(kc[3], (c3, c3)),
        "pool_bn_scale": pbs, "pool_bn_shift": pbh,
        "proj_w": _normal(kc[5], (c3 * (len(rates) + 2), c3)),
        "proj_bn_scale": prs, "proj_bn_shift": prh,
    }
    return prm


# ---------------------------------------------------------------------------
if __name__ == "__main__":
    IN_CH, CH, RATES = 3, (10, 20, 26), (6, 12, 18)
    key = jax.random.PRNGKey(0)
    kp, kx = jax.random.split(key)
    params = init_params(kp, IN_CH, CH, RATES)
    x = jax.random.normal(kx, (2, IN_CH, 16, 16), dtype=jnp.float32)  # NCHW like PyTorch

    fwd = jax.jit(functools.partial(micronet_forward, ch=CH, rates=RATES))
    out, d2 = fwd(params, x)
    jax.block_until_ready((out, d2))

    assert out.shape == (2, CH[2], 2, 2), out.shape
    assert d2.shape == (2, CH[1], 4, 4), d2.shape
    assert bool(jnp.all(jnp.isfinite(out))) and bool(jnp.all(jnp.isfinite(d2)))
    print("KERNEL_OK")
</pallas_src>

<mosaic_0001>
module attributes {stable_mosaic.version = 11 : i64} {
  func.func @kernel(%arg0: i32, %arg1: memref<1x256x6xf32, #tpu.memory_space<vmem>>, %arg2: memref<408x128xf32, #tpu.memory_space<vmem>>, %arg3: memref<21x64x128xbf16, #tpu.memory_space<vmem>>, %arg4: memref<576x256xbf16, #tpu.memory_space<vmem>>, %arg5: memref<128x64xbf16, #tpu.memory_space<vmem>>, %arg6: memref<144x64xbf16, #tpu.memory_space<vmem>>, %arg7: memref<144x16xbf16, #tpu.memory_space<vmem>>, %arg8: memref<36x16xbf16, #tpu.memory_space<vmem>>, %arg9: memref<1x4x52xf32, #tpu.memory_space<vmem>>, %arg10: memref<1x16x40xf32, #tpu.memory_space<vmem>>) attributes {dimension_semantics = [#tpu.dimension_semantics<parallel>], iteration_bounds = array<i64: 1>, scalar_prefetch = 0 : i64, scratch_operands = 0 : i64, tpu.core_type = #tpu.core_type<tc>, window_params = [{transform_indices = @transform_0, window_bounds = array<i64: 1, 256, 6>}, {pipeline_mode = #tpu.pipeline_mode<synchronous>, transform_indices = @transform_1, window_bounds = array<i64: 408, 128>}, {pipeline_mode = #tpu.pipeline_mode<synchronous>, transform_indices = @transform_2, window_bounds = array<i64: 21, 64, 128>}, {pipeline_mode = #tpu.pipeline_mode<synchronous>, transform_indices = @transform_3, window_bounds = array<i64: 576, 256>}, {pipeline_mode = #tpu.pipeline_mode<synchronous>, transform_indices = @transform_4, window_bounds = array<i64: 128, 64>}, {pipeline_mode = #tpu.pipeline_mode<synchronous>, transform_indices = @transform_5, window_bounds = array<i64: 144, 64>}, {pipeline_mode = #tpu.pipeline_mode<synchronous>, transform_indices = @transform_6, window_bounds = array<i64: 144, 16>}, {pipeline_mode = #tpu.pipeline_mode<synchronous>, transform_indices = @transform_7, window_bounds = array<i64: 36, 16>}, {transform_indices = @transform_8, window_bounds = array<i64: 1, 4, 52>}, {transform_indices = @transform_9, window_bounds = array<i64: 1, 16, 40>}]} {
    %c0 = arith.constant 0 : index
    %c0_0 = arith.constant 0 : index
    %c0_1 = arith.constant 0 : index
    %0 = vector.load %arg1[%c0, %c0_0, %c0_1] : memref<1x256x6xf32, #tpu.memory_space<vmem>>, vector<1x256x6xf32>
    %1 = vector.shape_cast %0 : vector<1x256x6xf32> to vector<256x6xf32>
    %c0_2 = arith.constant 0 : index
    %c0_3 = arith.constant 0 : index
    %2 = vector.load %arg4[%c0_2, %c0_3] : memref<576x256xbf16, #tpu.memory_space<vmem>>, vector<576x256xbf16>
    %3 = arith.truncf %1 : vector<256x6xf32> to vector<256x6xbf16>
    %cst = arith.constant dense<0.000000e+00> : vector<576x6xf32>
    %4 = tpu.matmul %2, %3, %cst {dimension_numbers = #tpu.dot_dimension_numbers<[1], [0], [0], [1], [0, 0, 1, 1], [], []>} : vector<576x256xbf16>, vector<256x6xbf16>, vector<576x6xf32> -> vector<576x6xf32>
    %c0_4 = arith.constant 0 : index
    %c0_5 = arith.constant 0 : index
    %5 = vector.load %arg2[%c0_4, %c0_5] : memref<408x128xf32, #tpu.memory_space<vmem>>, vector<9x6xf32>
    %6 = vector.extract_strided_slice %4 {offsets = [0, 0], sizes = [64, 6], strides = [1, 1]} : vector<576x6xf32> to vector<64x6xf32>
    %7 = vector.extract_strided_slice %5 {offsets = [0, 0], sizes = [1, 6], strides = [1, 1]} : vector<9x6xf32> to vector<1x6xf32>
    %8 = vector.broadcast %7 : vector<1x6xf32> to vector<64x6xf32>
    %9 = arith.mulf %6, %8 : vector<64x6xf32>
    %10 = vector.extract_strided_slice %4 {offsets = [64, 0], sizes = [64, 6], strides = [1, 1]} : vector<576x6xf32> to vector<64x6xf32>
    %11 = vector.extract_strided_slice %5 {offsets = [1, 0], sizes = [1, 6], strides = [1, 1]} : vector<9x6xf32> to vector<1x6xf32>
    %12 = vector.broadcast %11 : vector<1x6xf32> to vector<64x6xf32>
    %13 = arith.mulf %10, %12 : vector<64x6xf32>
    %14 = arith.addf %9, %13 : vector<64x6xf32>
    %15 = vector.extract_strided_slice %4 {offsets = [128, 0], sizes = [64, 6], strides = [1, 1]} : vector<576x6xf32> to vector<64x6xf32>
    %16 = vector.extract_strided_slice %5 {offsets = [2, 0], sizes = [1, 6], strides = [1, 1]} : vector<9x6xf32> to vector<1x6xf32>
    %17 = vector.broadcast %16 : vector<1x6xf32> to vector<64x6xf32>
    %18 = arith.mulf %15, %17 : vector<64x6xf32>
    %19 = arith.addf %14, %18 : vector<64x6xf32>
    %20 = vector.extract_strided_slice %4 {offsets = [192, 0], sizes = [64, 6], strides = [1, 1]} : vector<576x6xf32> to vector<64x6xf32>
    %21 = vector.extract_strided_slice %5 {offsets = [3, 0], sizes = [1, 6], strides = [1, 1]} : vector<9x6xf32> to vector<1x6xf32>
    %22 = vector.broadcast %21 : vector<1x6xf32> to vector<64x6xf32>
    %23 = arith.mulf %20, %22 : vector<64x6xf32>
    %24 = arith.addf %19, %23 : vector<64x6xf32>
    %25 = vector.extract_strided_slice %4 {offsets = [256, 0], sizes = [64, 6], strides = [1, 1]} : vector<576x6xf32> to vector<64x6xf32>
    %26 = vector.extract_strided_slice %5 {offsets = [4, 0], sizes = [1, 6], strides = [1, 1]} : vector<9x6xf32> to vector<1x6xf32>
    %27 = vector.broadcast %26 : vector<1x6xf32> to vector<64x6xf32>
    %28 = arith.mulf %25, %27 : vector<64x6xf32>
    %29 = arith.addf %24, %28 : vector<64x6xf32>
    %30 = vector.extract_strided_slice %4 {offsets = [320, 0], sizes = [64, 6], strides = [1, 1]} : vector<576x6xf32> to vector<64x6xf32>
    %31 = vector.extract_strided_slice %5 {offsets = [5, 0], sizes = [1, 6], strides = [1, 1]} : vector<9x6xf32> to vector<1x6xf32>
    %32 = vector.broadcast %31 : vector<1x6xf32> to vector<64x6xf32>
    %33 = arith.mulf %30, %32 : vector<64x6xf32>
    %34 = arith.addf %29, %33 : vector<64x6xf32>
    %35 = vector.extract_strided_slice %4 {offsets = [384, 0], sizes = [64, 6], strides = [1, 1]} : vector<576x6xf32> to vector<64x6xf32>
    %36 = vector.extract_strided_slice %5 {offsets = [6, 0], sizes = [1, 6], strides = [1, 1]} : vector<9x6xf32> to vector<1x6xf32>
    %37 = vector.broadcast %36 : vector<1x6xf32> to vector<64x6xf32>
    %38 = arith.mulf %35, %37 : vector<64x6xf32>
    %39 = arith.addf %34, %38 : vector<64x6xf32>
    %40 = vector.extract_strided_slice %4 {offsets = [448, 0], sizes = [64, 6], strides = [1, 1]} : vector<576x6xf32> to vector<64x6xf32>
    %41 = vector.extract_strided_slice %5 {offsets = [7, 0], sizes = [1, 6], strides = [1, 1]} : vector<9x6xf32> to vector<1x6xf32>
    %42 = vector.broadcast %41 : vector<1x6xf32> to vector<64x6xf32>
    %43 = arith.mulf %40, %42 : vector<64x6xf32>
    %44 = arith.addf %39, %43 : vector<64x6xf32>
    %45 = vector.extract_strided_slice %4 {offsets = [512, 0], sizes = [64, 6], strides = [1, 1]} : vector<576x6xf32> to vector<64x6xf32>
    %46 = vector.extract_strided_slice %5 {offsets = [8, 0], sizes = [1, 6], strides = [1, 1]} : vector<9x6xf32> to vector<1x6xf32>
    %47 = vector.broadcast %46 : vector<1x6xf32> to vector<64x6xf32>
    %48 = arith.mulf %45, %47 : vector<64x6xf32>
    %49 = arith.addf %44, %48 : vector<64x6xf32>
    %c16 = arith.constant 16 : index
    %c0_6 = arith.constant 0 : index
    %50 = vector.load %arg2[%c16, %c0_6] : memref<408x128xf32, #tpu.memory_space<vmem>>, vector<1x6xf32>
    %51 = vector.broadcast %50 : vector<1x6xf32> to vector<64x6xf32>
    %52 = arith.mulf %49, %51 : vector<64x6xf32>
    %c24 = arith.constant 24 : index
    %c0_7 = arith.constant 0 : index
    %53 = vector.load %arg2[%c24, %c0_7] : memref<408x128xf32, #tpu.memory_space<vmem>>, vector<1x6xf32>
    %54 = vector.broadcast %53 : vector<1x6xf32> to vector<64x6xf32>
    %55 = arith.addf %52, %54 : vector<64x6xf32>
    %56 = math.absf %55 : vector<64x6xf32>
    %cst_8 = arith.constant 0.000000e+00 : f32
    %57 = vector.broadcast %cst_8 : f32 to vector<64x6xf32>
    %58 = arith.subf %57, %56 : vector<64x6xf32>
    %59 = math.exp %58 : vector<64x6xf32>
    %cst_9 = arith.constant 1.000000e+00 : f32
    %60 = vector.broadcast %cst_9 : f32 to vector<64x6xf32>
    %61 = arith.addf %60, %59 : vector<64x6xf32>
    %62 = tpu.reciprocal %61 {approx = true} : vector<64x6xf32> -> vector<64x6xf32>
    %cst_10 = arith.constant 0.000000e+00 : f32
    %63 = vector.broadcast %cst_10 : f32 to vector<64x6xf32>
    %64 = arith.cmpf oge, %55, %63 : vector<64x6xf32>
    %65 = arith.mulf %59, %62 : vector<64x6xf32>
    %66 = arith.select %64, %62, %65 : vector<64x6xi1>, vector<64x6xf32>
    %67 = arith.mulf %55, %66 : vector<64x6xf32>
    %c1 = arith.constant 1 : index
    %c0_11 = arith.constant 0 : index
    %c0_12 = arith.constant 0 : index
    %68 = vector.load %arg3[%c1, %c0_11, %c0_12] : memref<21x64x128xbf16, #tpu.memory_space<vmem>>, vector<1x6x20xbf16>
    %69 = vector.shape_cast %68 : vector<1x6x20xbf16> to vector<6x20xbf16>
    %70 = arith.truncf %67 : vector<64x6xf32> to vector<64x6xbf16>
    %cst_13 = arith.constant dense<0.000000e+00> : vector<64x20xf32>
    %71 = tpu.matmul %70, %69, %cst_13 {dimension_numbers = #tpu.dot_dimension_numbers<[1], [0], [0], [1], [0, 0, 1, 1], [], []>} : vector<64x6xbf16>, vector<6x20xbf16>, vector<64x20xf32> -> vector<64x20xf32>
    %c32 = arith.constant 32 : index
    %c0_14 = arith.constant 0 : index
    %72 = vector.load %arg2[%c32, %c0_14] : memref<408x128xf32, #tpu.memory_space<vmem>>, vector<1x20xf32>
    %73 = vector.broadcast %72 : vector<1x20xf32> to vector<64x20xf32>
    %74 = arith.addf %71, %73 : vector<64x20xf32>
    %75 = vector.extract_strided_slice %4 {offsets = [256, 0], sizes = [64, 6], strides = [1, 1]} : vector<576x6xf32> to vector<64x6xf32>
    %76 = vector.extract_strided_slice %4 {offsets = [320, 0], sizes = [64, 6], strides = [1, 1]} : vector<576x6xf32> to vector<64x6xf32>
    %77 = arith.maximumf %75, %76 : vector<64x6xf32>
    %78 = vector.extract_strided_slice %4 {offsets = [448, 0], sizes = [64, 6], strides = [1, 1]} : vector<576x6xf32> to vector<64x6xf32>
    %79 = arith.maximumf %77, %78 : vector<64x6xf32>
    %80 = vector.extract_strided_slice %4 {offsets = [512, 0], sizes = [64, 6], strides = [1, 1]} : vector<576x6xf32> to vector<64x6xf32>
    %81 = arith.maximumf %79, %80 : vector<64x6xf32>
    %c0_15 = arith.constant 0 : index
    %c0_16 = arith.constant 0 : index
    %c0_17 = arith.constant 0 : index
    %82 = vector.load %arg3[%c0_15, %c0_16, %c0_17] : memref<21x64x128xbf16, #tpu.memory_space<vmem>>, vector<1x6x20xbf16>
    %83 = vector.shape_cast %82 : vector<1x6x20xbf16> to vector<6x20xbf16>
    %84 = arith.truncf %81 : vector<64x6xf32> to vector<64x6xbf16>
    %cst_18 = arith.constant dense<0.000000e+00> : vector<64x20xf32>
    %85 = tpu.matmul %84, %83, %cst_18 {dimension_numbers = #tpu.dot_dimension_numbers<[1], [0], [0], [1], [0, 0, 1, 1], [], []>} : vector<64x6xbf16>, vector<6x20xbf16>, vector<64x20xf32> -> vector<64x20xf32>
    %86 = arith.addf %74, %85 : vector<64x20xf32>
    %c40 = arith.constant 40 : index
    %c0_19 = arith.constant 0 : index
    %87 = vector.load %arg2[%c40, %c0_19] : memref<408x128xf32, #tpu.memory_space<vmem>>, vector<1x20xf32>
    %88 = vector.broadcast %87 : vector<1x20xf32> to vector<64x20xf32>
    %89 = arith.mulf %86, %88 : vector<64x20xf32>
    %c48 = arith.constant 48 : index
    %c0_20 = arith.constant 0 : index
    %90 = vector.load %arg2[%c48, %c0_20] : memref<408x128xf32, #tpu.memory_space<vmem>>, vector<1x20xf32>
    %91 = vector.broadcast %90 : vector<1x20xf32> to vector<64x20xf32>
    %92 = arith.addf %89, %91 : vector<64x20xf32>
    %93 = math.absf %92 : vector<64x20xf32>
    %cst_21 = arith.constant 0.000000e+00 : f32
    %94 = vector.broadcast %cst_21 : f32 to vector<64x20xf32>
    %95 = arith.subf %94, %93 : vector<64x20xf32>
    %96 = math.exp %95 : vector<64x20xf32>
    %cst_22 = arith.constant 1.000000e+00 : f32
    %97 = vector.broadcast %cst_22 : f32 to vector<64x20xf32>
    %98 = arith.addf %97, %96 : vector<64x20xf32>
    %99 = tpu.reciprocal %98 {approx = true} : vector<64x20xf32> -> vector<64x20xf32>
    %cst_23 = arith.constant 0.000000e+00 : f32
    %100 = vector.broadcast %cst_23 : f32 to vector<64x20xf32>
    %101 = arith.cmpf oge, %92, %100 : vector<64x20xf32>
    %102 = arith.mulf %96, %99 : vector<64x20xf32>
    %103 = arith.select %101, %99, %102 : vector<64x20xi1>, vector<64x20xf32>
    %104 = arith.mulf %92, %103 : vector<64x20xf32>
    %c0_24 = arith.constant 0 : index
    %c0_25 = arith.constant 0 : index
    %105 = vector.load %arg5[%c0_24, %c0_25] : memref<128x64xbf16, #tpu.memory_space<vmem>>, vector<128x64xbf16>
    %106 = arith.truncf %104 : vector<64x20xf32> to vector<64x20xbf16>
    %cst_26 = arith.constant dense<0.000000e+00> : vector<128x20xf32>
    %107 = tpu.matmul %105, %106, %cst_26 {dimension_numbers = #tpu.dot_dimension_numbers<[1], [0], [0], [1], [0, 0, 1, 1], [], []>} : vector<128x64xbf16>, vector<64x20xbf16>, vector<128x20xf32> -> vector<128x20xf32>
    %108 = vector.extract_strided_slice %107 {offsets = [0, 0], sizes = [64, 20], strides = [1, 1]} : vector<128x20xf32> to vector<64x20xf32>
    %c56 = arith.constant 56 : index
    %c0_27 = arith.constant 0 : index
    %109 = vector.load %arg2[%c56, %c0_27] : memref<408x128xf32, #tpu.memory_space<vmem>>, vector<1x20xf32>
    %110 = vector.broadcast %109 : vector<1x20xf32> to vector<64x20xf32>
    %111 = arith.mulf %108, %110 : vector<64x20xf32>
    %c72 = arith.constant 72 : index
    %c0_28 = arith.constant 0 : index
    %112 = vector.load %arg2[%c72, %c0_28] : memref<408x128xf32, #tpu.memory_space<vmem>>, vector<1x20xf32>
    %113 = vector.broadcast %112 : vector<1x20xf32> to vector<64x20xf32>
    %114 = arith.addf %111, %113 : vector<64x20xf32>
    %115 = math.absf %114 : vector<64x20xf32>
    %cst_29 = arith.constant 0.000000e+00 : f32
    %116 = vector.broadcast %cst_29 : f32 to vector<64x20xf32>
    %117 = arith.subf %116, %115 : vector<64x20xf32>
    %118 = math.exp %117 : vector<64x20xf32>
    %cst_30 = arith.constant 1.000000e+00 : f32
    %119 = vector.broadcast %cst_30 : f32 to vector<64x20xf32>
    %120 = arith.addf %119, %118 : vector<64x20xf32>
    %121 = tpu.reciprocal %120 {approx = true} : vector<64x20xf32> -> vector<64x20xf32>
    %cst_31 = arith.constant 0.000000e+00 : f32
    %122 = vector.broadcast %cst_31 : f32 to vector<64x20xf32>
    %123 = arith.cmpf oge, %114, %122 : vector<64x20xf32>
    %124 = arith.mulf %118, %121 : vector<64x20xf32>
    %125 = arith.select %123, %121, %124 : vector<64x20xi1>, vector<64x20xf32>
    %126 = arith.mulf %114, %125 : vector<64x20xf32>
    %127 = vector.extract_strided_slice %107 {offsets = [64, 0], sizes = [64, 20], strides = [1, 1]} : vector<128x20xf32> to vector<64x20xf32>
    %c64 = arith.constant 64 : index
    %c0_32 = arith.constant 0 : index
    %128 = vector.load %arg2[%c64, %c0_32] : memref<408x128xf32, #tpu.memory_space<vmem>>, vector<1x20xf32>
    %129 = vector.broadcast %128 : vector<1x20xf32> to vector<64x20xf32>
    %130 = arith.mulf %127, %129 : vector<64x20xf32>
    %c80 = arith.constant 80 : index
    %c0_33 = arith.constant 0 : index
    %131 = vector.load %arg2[%c80, %c0_33] : memref<408x128xf32, #tpu.memory_space<vmem>>, vector<1x20xf32>
    %132 = vector.broadcast %131 : vector<1x20xf32> to vector<64x20xf32>
    %133 = arith.addf %130, %132 : vector<64x20xf32>
    %134 = math.absf %133 : vector<64x20xf32>
    %cst_34 = arith.constant 0.000000e+00 : f32
    %135 = vector.broadcast %cst_34 : f32 to vector<64x20xf32>
    %136 = arith.subf %135, %134 : vector<64x20xf32>
    %137 = math.exp %136 : vector<64x20xf32>
    %cst_35 = arith.constant 1.000000e+00 : f32
    %138 = vector.broadcast %cst_35 : f32 to vector<64x20xf32>
    %139 = arith.addf %138, %137 : vector<64x20xf32>
    %140 = tpu.reciprocal %139 {approx = true} : vector<64x20xf32> -> vector<64x20xf32>
    %cst_36 = arith.constant 0.000000e+00 : f32
    %141 = vector.broadcast %cst_36 : f32 to vector<64x20xf32>
    %142 = arith.cmpf oge, %133, %141 : vector<64x20xf32>
    %143 = arith.mulf %137, %140 : vector<64x20xf32>
    %144 = arith.select %142, %140, %143 : vector<64x20xi1>, vector<64x20xf32>
    %145 = arith.mulf %133, %144 : vector<64x20xf32>
    %c2 = arith.constant 2 : index
    %c0_37 = arith.constant 0 : index
    %c0_38 = arith.constant 0 : index
    %146 = vector.load %arg3[%c2, %c0_37, %c0_38] : memref<21x64x128xbf16, #tpu.memory_space<vmem>>, vector<1x20x20xbf16>
    %147 = vector.shape_cast %146 : vector<1x20x20xbf16> to vector<20x20xbf16>
    %148 = arith.truncf %126 : vector<64x20xf32> to vector<64x20xbf16>
    %cst_39 = arith.constant dense<0.000000e+00> : vector<64x20xf32>
    %149 = tpu.matmul %148, %147, %cst_39 {dimension_numbers = #tpu.dot_dimension_numbers<[1], [0], [0], [1], [0, 0, 1, 1], [], []>} : vector<64x20xbf16>, vector<20x20xbf16>, vector<64x20xf32> -> vector<64x20xf32>
    %c3 = arith.constant 3 : index
    %c0_40 = arith.constant 0 : index
    %c0_41 = arith.constant 0 : index
    %150 = vector.load %arg3[%c3, %c0_40, %c0_41] : memref<21x64x128xbf16, #tpu.memory_space<vmem>>, vector<1x20x20xbf16>
    %151 = vector.shape_cast %150 : vector<1x20x20xbf16> to vector<20x20xbf16>
    %152 = arith.truncf %145 : vector<64x20xf32> to vector<64x20xbf16>
    %cst_42 = arith.constant dense<0.000000e+00> : vector<64x20xf32>
    %153 = tpu.matmul %152, %151, %cst_42 {dimension_numbers = #tpu.dot_dimension_numbers<[1], [0], [0], [1], [0, 0, 1, 1], [], []>} : vector<64x20xbf16>, vector<20x20xbf16>, vector<64x20xf32> -> vector<64x20xf32>
    %154 = arith.addf %149, %153 : vector<64x20xf32>
    %c88 = arith.constant 88 : index
    %c0_43 = arith.constant 0 : index
    %155 = vector.load %arg2[%c88, %c0_43] : memref<408x128xf32, #tpu.memory_space<vmem>>, vector<1x20xf32>
    %156 = vector.broadcast %155 : vector<1x20xf32> to vector<64x20xf32>
    %157 = arith.mulf %154, %156 : vector<64x20xf32>
    %c96 = arith.constant 96 : index
    %c0_44 = arith.constant 0 : index
    %158 = vector.load %arg2[%c96, %c0_44] : memref<408x128xf32, #tpu.memory_space<vmem>>, vector<1x20xf32>
    %159 = vector.broadcast %158 : vector<1x20xf32> to vector<64x20xf32>
    %160 = arith.addf %157, %159 : vector<64x20xf32>
    %161 = math.absf %160 : vector<64x20xf32>
    %cst_45 = arith.constant 0.000000e+00 : f32
    %162 = vector.broadcast %cst_45 : f32 to vector<64x20xf32>
    %163 = arith.subf %162, %161 : vector<64x20xf32>
    %164 = math.exp %163 : vector<64x20xf32>
    %cst_46 = arith.constant 1.000000e+00 : f32
    %165 = vector.broadcast %cst_46 : f32 to vector<64x20xf32>
    %166 = arith.addf %165, %164 : vector<64x20xf32>
    %167 = tpu.reciprocal %166 {approx = true} : vector<64x20xf32> -> vector<64x20xf32>
    %cst_47 = arith.constant 0.000000e+00 : f32
    %168 = vector.broadcast %cst_47 : f32 to vector<64x20xf32>
    %169 = arith.cmpf oge, %160, %168 : vector<64x20xf32>
    %170 = arith.mulf %164, %167 : vector<64x20xf32>
    %171 = arith.select %169, %167, %170 : vector<64x20xi1>, vector<64x20xf32>
    %172 = arith.mulf %160, %171 : vector<64x20xf32>
    %173 = arith.addf %104, %172 : vector<64x20xf32>
    %c0_48 = arith.constant 0 : index
    %c0_49 = arith.constant 0 : index
    %174 = vector.load %arg6[%c0_48, %c0_49] : memref<144x64xbf16, #tpu.memory_space<vmem>>, vector<144x64xbf16>
    %175 = arith.truncf %173 : vector<64x20xf32> to vector<64x20xbf16>
    %cst_50 = arith.constant dense<0.000000e+00> : vector<144x20xf32>
    %176 = tpu.matmul %174, %175, %cst_50 {dimension_numbers = #tpu.dot_dimension_numbers<[1], [0], [0], [1], [0, 0, 1, 1], [], []>} : vector<144x64xbf16>, vector<64x20xbf16>, vector<144x20xf32> -> vector<144x20xf32>
    %c104 = arith.constant 104 : index
    %c0_51 = arith.constant 0 : index
    %177 = vector.load %arg2[%c104, %c0_51] : memref<408x128xf32, #tpu.memory_space<vmem>>, vector<9x20xf32>
    %178 = vector.extract_strided_slice %176 {offsets = [0, 0], sizes = [16, 20], strides = [1, 1]} : vector<144x20xf32> to vector<16x20xf32>
    %179 = vector.extract_strided_slice %177 {offsets = [0, 0], sizes = [1, 20], strides = [1, 1]} : vector<9x20xf32> to vector<1x20xf32>
    %180 = vector.broadcast %179 : vector<1x20xf32> to vector<16x20xf32>
    %181 = arith.mulf %178, %180 : vector<16x20xf32>
    %182 = vector.extract_strided_slice %176 {offsets = [16, 0], sizes = [16, 20], strides = [1, 1]} : vector<144x20xf32> to vector<16x20xf32>
    %183 = vector.extract_strided_slice %177 {offsets = [1, 0], sizes = [1, 20], strides = [1, 1]} : vector<9x20xf32> to vector<1x20xf32>
    %184 = vector.broadcast %183 : vector<1x20xf32> to vector<16x20xf32>
    %185 = arith.mulf %182, %184 : vector<16x20xf32>
    %186 = arith.addf %181, %185 : vector<16x20xf32>
    %187 = vector.extract_strided_slice %176 {offsets = [32, 0], sizes = [16, 20], strides = [1, 1]} : vector<144x20xf32> to vector<16x20xf32>
    %188 = vector.extract_strided_slice %177 {offsets = [2, 0], sizes = [1, 20], strides = [1, 1]} : vector<9x20xf32> to vector<1x20xf32>
    %189 = vector.broadcast %188 : vector<1x20xf32> to vector<16x20xf32>
    %190 = arith.mulf %187, %189 : vector<16x20xf32>
    %191 = arith.addf %186, %190 : vector<16x20xf32>
    %192 = vector.extract_strided_slice %176 {offsets = [48, 0], sizes = [16, 20], strides = [1, 1]} : vector<144x20xf32> to vector<16x20xf32>
    %193 = vector.extract_strided_slice %177 {offsets = [3, 0], sizes = [1, 20], strides = [1, 1]} : vector<9x20xf32> to vector<1x20xf32>
    %194 = vector.broadcast %193 : vector<1x20xf32> to vector<16x20xf32>
    %195 = arith.mulf %192, %194 : vector<16x20xf32>
    %196 = arith.addf %191, %195 : vector<16x20xf32>
    %197 = vector.extract_strided_slice %176 {offsets = [64, 0], sizes = [16, 20], strides = [1, 1]} : vector<144x20xf32> to vector<16x20xf32>
    %198 = vector.extract_strided_slice %177 {offsets = [4, 0], sizes = [1, 20], strides = [1, 1]} : vector<9x20xf32> to vector<1x20xf32>
    %199 = vector.broadcast %198 : vector<1x20xf32> to vector<16x20xf32>
    %200 = arith.mulf %197, %199 : vector<16x20xf32>
    %201 = arith.addf %196, %200 : vector<16x20xf32>
    %202 = vector.extract_strided_slice %176 {offsets = [80, 0], sizes = [16, 20], strides = [1, 1]} : vector<144x20xf32> to vector<16x20xf32>
    %203 = vector.extract_strided_slice %177 {offsets = [5, 0], sizes = [1, 20], strides = [1, 1]} : vector<9x20xf32> to vector<1x20xf32>
    %204 = vector.broadcast %203 : vector<1x20xf32> to vector<16x20xf32>
    %205 = arith.mulf %202, %204 : vector<16x20xf32>
    %206 = arith.addf %201, %205 : vector<16x20xf32>
    %207 = vector.extract_strided_slice %176 {offsets = [96, 0], sizes = [16, 20], strides = [1, 1]} : vector<144x20xf32> to vector<16x20xf32>
    %208 = vector.extract_strided_slice %177 {offsets = [6, 0], sizes = [1, 20], strides = [1, 1]} : vector<9x20xf32> to vector<1x20xf32>
    %209 = vector.broadcast %208 : vector<1x20xf32> to vector<16x20xf32>
    %210 = arith.mulf %207, %209 : vector<16x20xf32>
    %211 = arith.addf %206, %210 : vector<16x20xf32>
    %212 = vector.extract_strided_slice %176 {offsets = [112, 0], sizes = [16, 20], strides = [1, 1]} : vector<144x20xf32> to vector<16x20xf32>
    %213 = vector.extract_strided_slice %177 {offsets = [7, 0], sizes = [1, 20], strides = [1, 1]} : vector<9x20xf32> to vector<1x20xf32>
    %214 = vector.broadcast %213 : vector<1x20xf32> to vector<16x20xf32>
    %215 = arith.mulf %212, %214 : vector<16x20xf32>
    %216 = arith.addf %211, %215 : vector<16x20xf32>
    %217 = vector.extract_strided_slice %176 {offsets = [128, 0], sizes = [16, 20], strides = [1, 1]} : vector<144x20xf32> to vector<16x20xf32>
    %218 = vector.extract_strided_slice %177 {offsets = [8, 0], sizes = [1, 20], strides = [1, 1]} : vector<9x20xf32> to vector<1x20xf32>
    %219 = vector.broadcast %218 : vector<1x20xf32> to vector<16x20xf32>
    %220 = arith.mulf %217, %219 : vector<16x20xf32>
    %221 = arith.addf %216, %220 : vector<16x20xf32>
    %c120 = arith.constant 120 : index
    %c0_52 = arith.constant 0 : index
    %222 = vector.load %arg2[%c120, %c0_52] : memref<408x128xf32, #tpu.memory_space<vmem>>, vector<1x20xf32>
    %223 = vector.broadcast %222 : vector<1x20xf32> to vector<16x20xf32>
    %224 = arith.mulf %221, %223 : vector<16x20xf32>
    %c128 = arith.constant 128 : index
    %c0_53 = arith.constant 0 : index
    %225 = vector.load %arg2[%c128, %c0_53] : memref<408x128xf32, #tpu.memory_space<vmem>>, vector<1x20xf32>
    %226 = vector.broadcast %225 : vector<1x20xf32> to vector<16x20xf32>
    %227 = arith.addf %224, %226 : vector<16x20xf32>
    %228 = math.absf %227 : vector<16x20xf32>
    %cst_54 = arith.constant 0.000000e+00 : f32
    %229 = vector.broadcast %cst_54 : f32 to vector<16x20xf32>
    %230 = arith.subf %229, %228 : vector<16x20xf32>
    %231 = math.exp %230 : vector<16x20xf32>
    %cst_55 = arith.constant 1.000000e+00 : f32
    %232 = vector.broadcast %cst_55 : f32 to vector<16x20xf32>
    %233 = arith.addf %232, %231 : vector<16x20xf32>
    %234 = tpu.reciprocal %233 {approx = true} : vector<16x20xf32> -> vector<16x20xf32>
    %cst_56 = arith.constant 0.000000e+00 : f32
    %235 = vector.broadcast %cst_56 : f32 to vector<16x20xf32>
    %236 = arith.cmpf oge, %227, %235 : vector<16x20xf32>
    %237 = arith.mulf %231, %234 : vector<16x20xf32>
    %238 = arith.select %236, %234, %237 : vector<16x20xi1>, vector<16x20xf32>
    %239 = arith.mulf %227, %238 : vector<16x20xf32>
    %c5 = arith.constant 5 : index
    %c0_57 = arith.constant 0 : index
    %c0_58 = arith.constant 0 : index
    %240 = vector.load %arg3[%c5, %c0_57, %c0_58] : memref<21x64x128xbf16, #tpu.memory_space<vmem>>, vector<1x20x40xbf16>
    %241 = vector.shape_cast %240 : vector<1x20x40xbf16> to vector<20x40xbf16>
    %242 = arith.truncf %239 : vector<16x20xf32> to vector<16x20xbf16>
    %cst_59 = arith.constant dense<0.000000e+00> : vector<16x40xf32>
    %243 = tpu.matmul %242, %241, %cst_59 {dimension_numbers = #tpu.dot_dimension_numbers<[1], [0], [0], [1], [0, 0, 1, 1], [], []>} : vector<16x20xbf16>, vector<20x40xbf16>, vector<16x40xf32> -> vector<16x40xf32>
    %c136 = arith.constant 136 : index
    %c0_60 = arith.constant 0 : index
    %244 = vector.load %arg2[%c136, %c0_60] : memref<408x128xf32, #tpu.memory_space<vmem>>, vector<1x40xf32>
    %245 = vector.broadcast %244 : vector<1x40xf32> to vector<16x40xf32>
    %246 = arith.addf %243, %245 : vector<16x40xf32>
    %247 = vector.extract_strided_slice %176 {offsets = [64, 0], sizes = [16, 20], strides = [1, 1]} : vector<144x20xf32> to vector<16x20xf32>
    %248 = vector.extract_strided_slice %176 {offsets = [80, 0], sizes = [16, 20], strides = [1, 1]} : vector<144x20xf32> to vector<16x20xf32>
    %249 = arith.maximumf %247, %248 : vector<16x20xf32>
    %250 = vector.extract_strided_slice %176 {offsets = [112, 0], sizes = [16, 20], strides = [1, 1]} : vector<144x20xf32> to vector<16x20xf32>
    %251 = arith.maximumf %249, %250 : vector<16x20xf32>
    %252 = vector.extract_strided_slice %176 {offsets = [128, 0], sizes = [16, 20], strides = [1, 1]} : vector<144x20xf32> to vector<16x20xf32>
    %253 = arith.maximumf %251, %252 : vector<16x20xf32>
    %c4 = arith.constant 4 : index
    %c0_61 = arith.constant 0 : index
    %c0_62 = arith.constant 0 : index
    %254 = vector.load %arg3[%c4, %c0_61, %c0_62] : memref<21x64x128xbf16, #tpu.memory_space<vmem>>, vector<1x20x40xbf16>
    %255 = vector.shape_cast %254 : vector<1x20x40xbf16> to vector<20x40xbf16>
    %256 = arith.truncf %253 : vector<16x20xf32> to vector<16x20xbf16>
    %cst_63 = arith.constant dense<0.000000e+00> : vector<16x40xf32>
    %257 = tpu.matmul %256, %255, %cst_63 {dimension_numbers = #tpu.dot_dimension_numbers<[1], [0], [0], [1], [0, 0, 1, 1], [], []>} : vector<16x20xbf16>, vector<20x40xbf16>, vector<16x40xf32> -> vector<16x40xf32>
    %258 = arith.addf %246, %257 : vector<16x40xf32>
    %c144 = arith.constant 144 : index
    %c0_64 = arith.constant 0 : index
    %259 = vector.load %arg2[%c144, %c0_64] : memref<408x128xf32, #tpu.memory_space<vmem>>, vector<1x40xf32>
    %260 = vector.broadcast %259 : vector<1x40xf32> to vector<16x40xf32>
    %261 = arith.mulf %258, %260 : vector<16x40xf32>
    %c152 = arith.constant 152 : index
    %c0_65 = arith.constant 0 : index
    %262 = vector.load %arg2[%c152, %c0_65] : memref<408x128xf32, #tpu.memory_space<vmem>>, vector<1x40xf32>
    %263 = vector.broadcast %262 : vector<1x40xf32> to vector<16x40xf32>
    %264 = arith.addf %261, %263 : vector<16x40xf32>
    %265 = math.absf %264 : vector<16x40xf32>
    %cst_66 = arith.constant 0.000000e+00 : f32
    %266 = vector.broadcast %cst_66 : f32 to vector<16x40xf32>
    %267 = arith.subf %266, %265 : vector<16x40xf32>
    %268 = math.exp %267 : vector<16x40xf32>
    %cst_67 = arith.constant 1.000000e+00 : f32
    %269 = vector.broadcast %cst_67 : f32 to vector<16x40xf32>
    %270 = arith.addf %269, %268 : vector<16x40xf32>
    %271 = tpu.reciprocal %270 {approx = true} : vector<16x40xf32> -> vector<16x40xf32>
    %cst_68 = arith.constant 0.000000e+00 : f32
    %272 = vector.broadcast %cst_68 : f32 to vector<16x40xf32>
    %273 = arith.cmpf oge, %264, %272 : vector<16x40xf32>
    %274 = arith.mulf %268, %271 : vector<16x40xf32>
    %275 = arith.select %273, %271, %274 : vector<16x40xi1>, vector<16x40xf32>
    %276 = arith.mulf %264, %275 : vector<16x40xf32>
    %c0_69 = arith.constant 0 : index
    %c0_70 = arith.constant 0 : index
    %277 = vector.load %arg7[%c0_69, %c0_70] : memref<144x16xbf16, #tpu.memory_space<vmem>>, vector<144x16xbf16>
    %278 = arith.truncf %276 : vector<16x40xf32> to vector<16x40xbf16>
    %cst_71 = arith.constant dense<0.000000e+00> : vector<144x40xf32>
    %279 = tpu.matmul %277, %278, %cst_71 {dimension_numbers = #tpu.dot_dimension_numbers<[1], [0], [0], [1], [0, 0, 1, 1], [], []>} : vector<144x16xbf16>, vector<16x40xbf16>, vector<144x40xf32> -> vector<144x40xf32>
    %c160 = arith.constant 160 : index
    %c0_72 = arith.constant 0 : index
    %280 = vector.load %arg2[%c160, %c0_72] : memref<408x128xf32, #tpu.memory_space<vmem>>, vector<9x40xf32>
    %281 = vector.extract_strided_slice %279 {offsets = [0, 0], sizes = [16, 40], strides = [1, 1]} : vector<144x40xf32> to vector<16x40xf32>
    %282 = vector.extract_strided_slice %280 {offsets = [0, 0], sizes = [1, 40], strides = [1, 1]} : vector<9x40xf32> to vector<1x40xf32>
    %283 = vector.broadcast %282 : vector<1x40xf32> to vector<16x40xf32>
    %284 = arith.mulf %281, %283 : vector<16x40xf32>
    %285 = vector.extract_strided_slice %279 {offsets = [16, 0], sizes = [16, 40], strides = [1, 1]} : vector<144x40xf32> to vector<16x40xf32>
    %286 = vector.extract_strided_slice %280 {offsets = [1, 0], sizes = [1, 40], strides = [1, 1]} : vector<9x40xf32> to vector<1x40xf32>
    %287 = vector.broadcast %286 : vector<1x40xf32> to vector<16x40xf32>
    %288 = arith.mulf %285, %287 : vector<16x40xf32>
    %289 = arith.addf %284, %288 : vector<16x40xf32>
    %290 = vector.extract_strided_slice %279 {offsets = [32, 0], sizes = [16, 40], strides = [1, 1]} : vector<144x40xf32> to vector<16x40xf32>
    %291 = vector.extract_strided_slice %280 {offsets = [2, 0], sizes = [1, 40], strides = [1, 1]} : vector<9x40xf32> to vector<1x40xf32>
    %292 = vector.broadcast %291 : vector<1x40xf32> to vector<16x40xf32>
    %293 = arith.mulf %290, %292 : vector<16x40xf32>
    %294 = arith.addf %289, %293 : vector<16x40xf32>
    %295 = vector.extract_strided_slice %279 {offsets = [48, 0], sizes = [16, 40], strides = [1, 1]} : vector<144x40xf32> to vector<16x40xf32>
    %296 = vector.extract_strided_slice %280 {offsets = [3, 0], sizes = [1, 40], strides = [1, 1]} : vector<9x40xf32> to vector<1x40xf32>
    %297 = vector.broadcast %296 : vector<1x40xf32> to vector<16x40xf32>
    %298 = arith.mulf %295, %297 : vector<16x40xf32>
    %299 = arith.addf %294, %298 : vector<16x40xf32>
    %300 = vector.extract_strided_slice %279 {offsets = [64, 0], sizes = [16, 40], strides = [1, 1]} : vector<144x40xf32> to vector<16x40xf32>
    %301 = vector.extract_strided_slice %280 {offsets = [4, 0], sizes = [1, 40], strides = [1, 1]} : vector<9x40xf32> to vector<1x40xf32>
    %302 = vector.broadcast %301 : vector<1x40xf32> to vector<16x40xf32>
    %303 = arith.mulf %300, %302 : vector<16x40xf32>
    %304 = arith.addf %299, %303 : vector<16x40xf32>
    %305 = vector.extract_strided_slice %279 {offsets = [80, 0], sizes = [16, 40], strides = [1, 1]} : vector<144x40xf32> to vector<16x40xf32>
    %306 = vector.extract_strided_slice %280 {offsets = [5, 0], sizes = [1, 40], strides = [1, 1]} : vector<9x40xf32> to vector<1x40xf32>
    %307 = vector.broadcast %306 : vector<1x40xf32> to vector<16x40xf32>
    %308 = arith.mulf %305, %307 : vector<16x40xf32>
    %309 = arith.addf %304, %308 : vector<16x40xf32>
    %310 = vector.extract_strided_slice %279 {offsets = [96, 0], sizes = [16, 40], strides = [1, 1]} : vector<144x40xf32> to vector<16x40xf32>
    %311 = vector.extract_strided_slice %280 {offsets = [6, 0], sizes = [1, 40], strides = [1, 1]} : vector<9x40xf32> to vector<1x40xf32>
    %312 = vector.broadcast %311 : vector<1x40xf32> to vector<16x40xf32>
    %313 = arith.mulf %310, %312 : vector<16x40xf32>
    %314 = arith.addf %309, %313 : vector<16x40xf32>
    %315 = vector.extract_strided_slice %279 {offsets = [112, 0], sizes = [16, 40], strides = [1, 1]} : vector<144x40xf32> to vector<16x40xf32>
    %316 = vector.extract_strided_slice %280 {offsets = [7, 0], sizes = [1, 40], strides = [1, 1]} : vector<9x40xf32> to vector<1x40xf32>
    %317 = vector.broadcast %316 : vector<1x40xf32> to vector<16x40xf32>
    %318 = arith.mulf %315, %317 : vector<16x40xf32>
    %319 = arith.addf %314, %318 : vector<16x40xf32>
    %320 = vector.extract_strided_slice %279 {offsets = [128, 0], sizes = [16, 40], strides = [1, 1]} : vector<144x40xf32> to vector<16x40xf32>
    %321 = vector.extract_strided_slice %280 {offsets = [8, 0], sizes = [1, 40], strides = [1, 1]} : vector<9x40xf32> to vector<1x40xf32>
    %322 = vector.broadcast %321 : vector<1x40xf32> to vector<16x40xf32>
    %323 = arith.mulf %320, %322 : vector<16x40xf32>
    %324 = arith.addf %319, %323 : vector<16x40xf32>
    %c176 = arith.constant 176 : index
    %c0_73 = arith.constant 0 : index
    %325 = vector.load %arg2[%c176, %c0_73] : memref<408x128xf32, #tpu.memory_space<vmem>>, vector<1x40xf32>
    %326 = vector.broadcast %325 : vector<1x40xf32> to vector<16x40xf32>
    %327 = arith.mulf %324, %326 : vector<16x40xf32>
    %c184 = arith.constant 184 : index
    %c0_74 = arith.constant 0 : index
    %328 = vector.load %arg2[%c184, %c0_74] : memref<408x128xf32, #tpu.memory_space<vmem>>, vector<1x40xf32>
    %329 = vector.broadcast %328 : vector<1x40xf32> to vector<16x40xf32>
    %330 = arith.addf %327, %329 : vector<16x40xf32>
    %331 = math.absf %330 : vector<16x40xf32>
    %cst_75 = arith.constant 0.000000e+00 : f32
    %332 = vector.broadcast %cst_75 : f32 to vector<16x40xf32>
    %333 = arith.subf %332, %331 : vector<16x40xf32>
    %334 = math.exp %333 : vector<16x40xf32>
    %cst_76 = arith.constant 1.000000e+00 : f32
    %335 = vector.broadcast %cst_76 : f32 to vector<16x40xf32>
    %336 = arith.addf %335, %334 : vector<16x40xf32>
    %337 = tpu.reciprocal %336 {approx = true} : vector<16x40xf32> -> vector<16x40xf32>
    %cst_77 = arith.constant 0.000000e+00 : f32
    %338 = vector.broadcast %cst_77 : f32 to vector<16x40xf32>
    %339 = arith.cmpf oge, %330, %338 : vector<16x40xf32>
    %340 = arith.mulf %334, %337 : vector<16x40xf32>
    %341 = arith.select %339, %337, %340 : vector<16x40xi1>, vector<16x40xf32>
    %342 = arith.mulf %330, %341 : vector<16x40xf32>
    %c6 = arith.constant 6 : index
    %c0_78 = arith.constant 0 : index
    %c0_79 = arith.constant 0 : index
    %343 = vector.load %arg3[%c6, %c0_78, %c0_79] : memref<21x64x128xbf16, #tpu.memory_space<vmem>>, vector<1x40x40xbf16>
    %344 = vector.shape_cast %343 : vector<1x40x40xbf16> to vector<40x40xbf16>
    %345 = arith.truncf %342 : vector<16x40xf32> to vector<16x40xbf16>
    %cst_80 = arith.constant dense<0.000000e+00> : vector<16x40xf32>
    %346 = tpu.matmul %345, %344, %cst_80 {dimension_numbers = #tpu.dot_dimension_numbers<[1], [0], [0], [1], [0, 0, 1, 1], [], []>} : vector<16x40xbf16>, vector<40x40xbf16>, vector<16x40xf32> -> vector<16x40xf32>
    %c192 = arith.constant 192 : index
    %c0_81 = arith.constant 0 : index
    %347 = vector.load %arg2[%c192, %c0_81] : memref<408x128xf32, #tpu.memory_space<vmem>>, vector<1x40xf32>
    %348 = vector.broadcast %347 : vector<1x40xf32> to vector<16x40xf32>
    %349 = arith.mulf %346, %348 : vector<16x40xf32>
    %c200 = arith.constant 200 : index
    %c0_82 = arith.constant 0 : index
    %350 = vector.load %arg2[%c200, %c0_82] : memref<408x128xf32, #tpu.memory_space<vmem>>, vector<1x40xf32>
    %351 = vector.broadcast %350 : vector<1x40xf32> to vector<16x40xf32>
    %352 = arith.addf %349, %351 : vector<16x40xf32>
    %cst_83 = arith.constant dense<0.000000e+00> : vector<40xf32>
    %353 = vector.multi_reduction <add>, %352, %cst_83 [0] : vector<16x40xf32> to vector<40xf32>
    %354 = vector.shape_cast %353 : vector<40xf32> to vector<1x40xf32>
    %cst_84 = arith.constant 1.600000e+01 : f32
    %355 = vector.broadcast %cst_84 : f32 to vector<1x40xf32>
    %356 = arith.divf %354, %355 : vector<1x40xf32>
    %c7 = arith.constant 7 : index
    %c0_85 = arith.constant 0 : index
    %c0_86 = arith.constant 0 : index
    %357 = vector.load %arg3[%c7, %c0_85, %c0_86] : memref<21x64x128xbf16, #tpu.memory_space<vmem>>, vector<1x40x10xbf16>
    %358 = vector.shape_cast %357 : vector<1x40x10xbf16> to vector<40x10xbf16>
    %359 = arith.truncf %356 : vector<1x40xf32> to vector<1x40xbf16>
    %cst_87 = arith.constant dense<0.000000e+00> : vector<1x10xf32>
    %360 = tpu.matmul %359, %358, %cst_87 {dimension_numbers = #tpu.dot_dimension_numbers<[1], [0], [0], [1], [0, 0, 1, 1], [], []>} : vector<1x40xbf16>, vector<40x10xbf16>, vector<1x10xf32> -> vector<1x10xf32>
    %361 = math.absf %360 : vector<1x10xf32>
    %cst_88 = arith.constant 0.000000e+00 : f32
    %362 = vector.broadcast %cst_88 : f32 to vector<1x10xf32>
    %363 = arith.subf %362, %361 : vector<1x10xf32>
    %364 = math.exp %363 : vector<1x10xf32>
    %cst_89 = arith.constant 1.000000e+00 : f32
    %365 = vector.broadcast %cst_89 : f32 to vector<1x10xf32>
    %366 = arith.addf %365, %364 : vector<1x10xf32>
    %367 = tpu.reciprocal %366 {approx = true} : vector<1x10xf32> -> vector<1x10xf32>
    %cst_90 = arith.constant 0.000000e+00 : f32
    %368 = vector.broadcast %cst_90 : f32 to vector<1x10xf32>
    %369 = arith.cmpf oge, %360, %368 : vector<1x10xf32>
    %370 = arith.mulf %364, %367 : vector<1x10xf32>
    %371 = arith.select %369, %367, %370 : vector<1x10xi1>, vector<1x10xf32>
    %372 = arith.mulf %360, %371 : vector<1x10xf32>
    %c8 = arith.constant 8 : index
    %c0_91 = arith.constant 0 : index
    %c0_92 = arith.constant 0 : index
    %373 = vector.load %arg3[%c8, %c0_91, %c0_92] : memref<21x64x128xbf16, #tpu.memory_space<vmem>>, vector<1x10x40xbf16>
    %374 = vector.shape_cast %373 : vector<1x10x40xbf16> to vector<10x40xbf16>
    %375 = arith.truncf %372 : vector<1x10xf32> to vector<1x10xbf16>
    %cst_93 = arith.constant dense<0.000000e+00> : vector<1x40xf32>
    %376 = tpu.matmul %375, %374, %cst_93 {dimension_numbers = #tpu.dot_dimension_numbers<[1], [0], [0], [1], [0, 0, 1, 1], [], []>} : vector<1x10xbf16>, vector<10x40xbf16>, vector<1x40xf32> -> vector<1x40xf32>
    %377 = math.absf %376 : vector<1x40xf32>
    %cst_94 = arith.constant 0.000000e+00 : f32
    %378 = vector.broadcast %cst_94 : f32 to vector<1x40xf32>
    %379 = arith.subf %378, %377 : vector<1x40xf32>
    %380 = math.exp %379 : vector<1x40xf32>
    %cst_95 = arith.constant 1.000000e+00 : f32
    %381 = vector.broadcast %cst_95 : f32 to vector<1x40xf32>
    %382 = arith.addf %381, %380 : vector<1x40xf32>
    %383 = tpu.reciprocal %382 {approx = true} : vector<1x40xf32> -> vector<1x40xf32>
    %cst_96 = arith.constant 0.000000e+00 : f32
    %384 = vector.broadcast %cst_96 : f32 to vector<1x40xf32>
    %385 = arith.cmpf oge, %376, %384 : vector<1x40xf32>
    %386 = arith.mulf %380, %383 : vector<1x40xf32>
    %387 = arith.select %385, %383, %386 : vector<1x40xi1>, vector<1x40xf32>
    %388 = vector.broadcast %387 : vector<1x40xf32> to vector<16x40xf32>
    %389 = arith.mulf %352, %388 : vector<16x40xf32>
    %390 = arith.addf %276, %389 : vector<16x40xf32>
    %391 = math.absf %390 : vector<16x40xf32>
    %cst_97 = arith.constant 0.000000e+00 : f32
    %392 = vector.broadcast %cst_97 : f32 to vector<16x40xf32>
    %393 = arith.subf %392, %391 : vector<16x40xf32>
    %394 = math.exp %393 : vector<16x40xf32>
    %cst_98 = arith.constant 1.000000e+00 : f32
    %395 = vector.broadcast %cst_98 : f32 to vector<16x40xf32>
    %396 = arith.addf %395, %394 : vector<16x40xf32>
    %397 = tpu.reciprocal %396 {approx = true} : vector<16x40xf32> -> vector<16x40xf32>
    %cst_99 = arith.constant 0.000000e+00 : f32
    %398 = vector.broadcast %cst_99 : f32 to vector<16x40xf32>
    %399 = arith.cmpf oge, %390, %398 : vector<16x40xf32>
    %400 = arith.mulf %394, %397 : vector<16x40xf32>
    %401 = arith.select %399, %397, %400 : vector<16x40xi1>, vector<16x40xf32>
    %402 = arith.mulf %390, %401 : vector<16x40xf32>
    %c0_100 = arith.constant 0 : index
    %c0_101 = arith.constant 0 : index
    %403 = vector.load %arg7[%c0_100, %c0_101] : memref<144x16xbf16, #tpu.memory_space<vmem>>, vector<144x16xbf16>
    %404 = arith.truncf %402 : vector<16x40xf32> to vector<16x40xbf16>
    %cst_102 = arith.constant dense<0.000000e+00> : vector<144x40xf32>
    %405 = tpu.matmul %403, %404, %cst_102 {dimension_numbers = #tpu.dot_dimension_numbers<[1], [0], [0], [1], [0, 0, 1, 1], [], []>} : vector<144x16xbf16>, vector<16x40xbf16>, vector<144x40xf32> -> vector<144x40xf32>
    %c208 = arith.constant 208 : index
    %c0_103 = arith.constant 0 : index
    %406 = vector.load %arg2[%c208, %c0_103] : memref<408x128xf32, #tpu.memory_space<vmem>>, vector<9x40xf32>
    %407 = vector.extract_strided_slice %405 {offsets = [0, 0], sizes = [16, 40], strides = [1, 1]} : vector<144x40xf32> to vector<16x40xf32>
    %408 = vector.extract_strided_slice %406 {offsets = [0, 0], sizes = [1, 40], strides = [1, 1]} : vector<9x40xf32> to vector<1x40xf32>
    %409 = vector.broadcast %408 : vector<1x40xf32> to vector<16x40xf32>
    %410 = arith.mulf %407, %409 : vector<16x40xf32>
    %411 = vector.extract_strided_slice %405 {offsets = [16, 0], sizes = [16, 40], strides = [1, 1]} : vector<144x40xf32> to vector<16x40xf32>
    %412 = vector.extract_strided_slice %406 {offsets = [1, 0], sizes = [1, 40], strides = [1, 1]} : vector<9x40xf32> to vector<1x40xf32>
    %413 = vector.broadcast %412 : vector<1x40xf32> to vector<16x40xf32>
    %414 = arith.mulf %411, %413 : vector<16x40xf32>
    %415 = arith.addf %410, %414 : vector<16x40xf32>
    %416 = vector.extract_strided_slice %405 {offsets = [32, 0], sizes = [16, 40], strides = [1, 1]} : vector<144x40xf32> to vector<16x40xf32>
    %417 = vector.extract_strided_slice %406 {offsets = [2, 0], sizes = [1, 40], strides = [1, 1]} : vector<9x40xf32> to vector<1x40xf32>
    %418 = vector.broadcast %417 : vector<1x40xf32> to vector<16x40xf32>
    %419 = arith.mulf %416, %418 : vector<16x40xf32>
    %420 = arith.addf %415, %419 : vector<16x40xf32>
    %421 = vector.extract_strided_slice %405 {offsets = [48, 0], sizes = [16, 40], strides = [1, 1]} : vector<144x40xf32> to vector<16x40xf32>
    %422 = vector.extract_strided_slice %406 {offsets = [3, 0], sizes = [1, 40], strides = [1, 1]} : vector<9x40xf32> to vector<1x40xf32>
    %423 = vector.broadcast %422 : vector<1x40xf32> to vector<16x40xf32>
    %424 = arith.mulf %421, %423 : vector<16x40xf32>
    %425 = arith.addf %420, %424 : vector<16x40xf32>
    %426 = vector.extract_strided_slice %405 {offsets = [64, 0], sizes = [16, 40], strides = [1, 1]} : vector<144x40xf32> to vector<16x40xf32>
    %427 = vector.extract_strided_slice %406 {offsets = [4, 0], sizes = [1, 40], strides = [1, 1]} : vector<9x40xf32> to vector<1x40xf32>
    %428 = vector.broadcast %427 : vector<1x40xf32> to vector<16x40xf32>
    %429 = arith.mulf %426, %428 : vector<16x40xf32>
    %430 = arith.addf %425, %429 : vector<16x40xf32>
    %431 = vector.extract_strided_slice %405 {offsets = [80, 0], sizes = [16, 40], strides = [1, 1]} : vector<144x40xf32> to vector<16x40xf32>
    %432 = vector.extract_strided_slice %406 {offsets = [5, 0], sizes = [1, 40], strides = [1, 1]} : vector<9x40xf32> to vector<1x40xf32>
    %433 = vector.broadcast %432 : vector<1x40xf32> to vector<16x40xf32>
    %434 = arith.mulf %431, %433 : vector<16x40xf32>
    %435 = arith.addf %430, %434 : vector<16x40xf32>
    %436 = vector.extract_strided_slice %405 {offsets = [96, 0], sizes = [16, 40], strides = [1, 1]} : vector<144x40xf32> to vector<16x40xf32>
    %437 = vector.extract_strided_slice %406 {offsets = [6, 0], sizes = [1, 40], strides = [1, 1]} : vector<9x40xf32> to vector<1x40xf32>
    %438 = vector.broadcast %437 : vector<1x40xf32> to vector<16x40xf32>
    %439 = arith.mulf %436, %438 : vector<16x40xf32>
    %440 = arith.addf %435, %439 : vector<16x40xf32>
    %441 = vector.extract_strided_slice %405 {offsets = [112, 0], sizes = [16, 40], strides = [1, 1]} : vector<144x40xf32> to vector<16x40xf32>
    %442 = vector.extract_strided_slice %406 {offsets = [7, 0], sizes = [1, 40], strides = [1, 1]} : vector<9x40xf32> to vector<1x40xf32>
    %443 = vector.broadcast %442 : vector<1x40xf32> to vector<16x40xf32>
    %444 = arith.mulf %441, %443 : vector<16x40xf32>
    %445 = arith.addf %440, %444 : vector<16x40xf32>
    %446 = vector.extract_strided_slice %405 {offsets = [128, 0], sizes = [16, 40], strides = [1, 1]} : vector<144x40xf32> to vector<16x40xf32>
    %447 = vector.extract_strided_slice %406 {offsets = [8, 0], sizes = [1, 40], strides = [1, 1]} : vector<9x40xf32> to vector<1x40xf32>
    %448 = vector.broadcast %447 : vector<1x40xf32> to vector<16x40xf32>
    %449 = arith.mulf %446, %448 : vector<16x40xf32>
    %450 = arith.addf %445, %449 : vector<16x40xf32>
    %c224 = arith.constant 224 : index
    %c0_104 = arith.constant 0 : index
    %451 = vector.load %arg2[%c224, %c0_104] : memref<408x128xf32, #tpu.memory_space<vmem>>, vector<1x40xf32>
    %452 = vector.broadcast %451 : vector<1x40xf32> to vector<16x40xf32>
    %453 = arith.mulf %450, %452 : vector<16x40xf32>
    %c232 = arith.constant 232 : index
    %c0_105 = arith.constant 0 : index
    %454 = vector.load %arg2[%c232, %c0_105] : memref<408x128xf32, #tpu.memory_space<vmem>>, vector<1x40xf32>
    %455 = vector.broadcast %454 : vector<1x40xf32> to vector<16x40xf32>
    %456 = arith.addf %453, %455 : vector<16x40xf32>
    %457 = math.absf %456 : vector<16x40xf32>
    %cst_106 = arith.constant 0.000000e+00 : f32
    %458 = vector.broadcast %cst_106 : f32 to vector<16x40xf32>
    %459 = arith.subf %458, %457 : vector<16x40xf32>
    %460 = math.exp %459 : vector<16x40xf32>
    %cst_107 = arith.constant 1.000000e+00 : f32
    %461 = vector.broadcast %cst_107 : f32 to vector<16x40xf32>
    %462 = arith.addf %461, %460 : vector<16x40xf32>
    %463 = tpu.reciprocal %462 {approx = true} : vector<16x40xf32> -> vector<16x40xf32>
    %cst_108 = arith.constant 0.000000e+00 : f32
    %464 = vector.broadcast %cst_108 : f32 to vector<16x40xf32>
    %465 = arith.cmpf oge, %456, %464 : vector<16x40xf32>
    %466 = arith.mulf %460, %463 : vector<16x40xf32>
    %467 = arith.select %465, %463, %466 : vector<16x40xi1>, vector<16x40xf32>
    %468 = arith.mulf %456, %467 : vector<16x40xf32>
    %c9 = arith.constant 9 : index
    %c0_109 = arith.constant 0 : index
    %c0_110 = arith.constant 0 : index
    %469 = vector.load %arg3[%c9, %c0_109, %c0_110] : memref<21x64x128xbf16, #tpu.memory_space<vmem>>, vector<1x40x40xbf16>
    %470 = vector.shape_cast %469 : vector<1x40x40xbf16> to vector<40x40xbf16>
    %471 = arith.truncf %468 : vector<16x40xf32> to vector<16x40xbf16>
    %cst_111 = arith.constant dense<0.000000e+00> : vector<16x40xf32>
    %472 = tpu.matmul %471, %470, %cst_111 {dimension_numbers = #tpu.dot_dimension_numbers<[1], [0], [0], [1], [0, 0, 1, 1], [], []>} : vector<16x40xbf16>, vector<40x40xbf16>, vector<16x40xf32> -> vector<16x40xf32>
    %c240 = arith.constant 240 : index
    %c0_112 = arith.constant 0 : index
    %473 = vector.load %arg2[%c240, %c0_112] : memref<408x128xf32, #tpu.memory_space<vmem>>, vector<1x40xf32>
    %474 = vector.broadcast %473 : vector<1x40xf32> to vector<16x40xf32>
    %475 = arith.mulf %472, %474 : vector<16x40xf32>
    %c248 = arith.constant 248 : index
    %c0_113 = arith.constant 0 : index
    %476 = vector.load %arg2[%c248, %c0_113] : memref<408x128xf32, #tpu.memory_space<vmem>>, vector<1x40xf32>
    %477 = vector.broadcast %476 : vector<1x40xf32> to vector<16x40xf32>
    %478 = arith.addf %475, %477 : vector<16x40xf32>
    %cst_114 = arith.constant dense<0.000000e+00> : vector<40xf32>
    %479 = vector.multi_reduction <add>, %478, %cst_114 [0] : vector<16x40xf32> to vector<40xf32>
    %480 = vector.shape_cast %479 : vector<40xf32> to vector<1x40xf32>
    %cst_115 = arith.constant 1.600000e+01 : f32
    %481 = vector.broadcast %cst_115 : f32 to vector<1x40xf32>
    %482 = arith.divf %480, %481 : vector<1x40xf32>
    %c10 = arith.constant 10 : index
    %c0_116 = arith.constant 0 : index
    %c0_117 = arith.constant 0 : index
    %483 = vector.load %arg3[%c10, %c0_116, %c0_117] : memref<21x64x128xbf16, #tpu.memory_space<vmem>>, vector<1x40x10xbf16>
    %484 = vector.shape_cast %483 : vector<1x40x10xbf16> to vector<40x10xbf16>
    %485 = arith.truncf %482 : vector<1x40xf32> to vector<1x40xbf16>
    %cst_118 = arith.constant dense<0.000000e+00> : vector<1x10xf32>
    %486 = tpu.matmul %485, %484, %cst_118 {dimension_numbers = #tpu.dot_dimension_numbers<[1], [0], [0], [1], [0, 0, 1, 1], [], []>} : vector<1x40xbf16>, vector<40x10xbf16>, vector<1x10xf32> -> vector<1x10xf32>
    %487 = math.absf %486 : vector<1x10xf32>
    %cst_119 = arith.constant 0.000000e+00 : f32
    %488 = vector.broadcast %cst_119 : f32 to vector<1x10xf32>
    %489 = arith.subf %488, %487 : vector<1x10xf32>
    %490 = math.exp %489 : vector<1x10xf32>
    %cst_120 = arith.constant 1.000000e+00 : f32
    %491 = vector.broadcast %cst_120 : f32 to vector<1x10xf32>
    %492 = arith.addf %491, %490 : vector<1x10xf32>
    %493 = tpu.reciprocal %492 {approx = true} : vector<1x10xf32> -> vector<1x10xf32>
    %cst_121 = arith.constant 0.000000e+00 : f32
    %494 = vector.broadcast %cst_121 : f32 to vector<1x10xf32>
    %495 = arith.cmpf oge, %486, %494 : vector<1x10xf32>
    %496 = arith.mulf %490, %493 : vector<1x10xf32>
    %497 = arith.select %495, %493, %496 : vector<1x10xi1>, vector<1x10xf32>
    %498 = arith.mulf %486, %497 : vector<1x10xf32>
    %c11 = arith.constant 11 : index
    %c0_122 = arith.constant 0 : index
    %c0_123 = arith.constant 0 : index
    %499 = vector.load %arg3[%c11, %c0_122, %c0_123] : memref<21x64x128xbf16, #tpu.memory_space<vmem>>, vector<1x10x40xbf16>
    %500 = vector.shape_cast %499 : vector<1x10x40xbf16> to vector<10x40xbf16>
    %501 = arith.truncf %498 : vector<1x10xf32> to vector<1x10xbf16>
    %cst_124 = arith.constant dense<0.000000e+00> : vector<1x40xf32>
    %502 = tpu.matmul %501, %500, %cst_124 {dimension_numbers = #tpu.dot_dimension_numbers<[1], [0], [0], [1], [0, 0, 1, 1], [], []>} : vector<1x10xbf16>, vector<10x40xbf16>, vector<1x40xf32> -> vector<1x40xf32>
    %503 = math.absf %502 : vector<1x40xf32>
    %cst_125 = arith.constant 0.000000e+00 : f32
    %504 = vector.broadcast %cst_125 : f32 to vector<1x40xf32>
    %505 = arith.subf %504, %503 : vector<1x40xf32>
    %506 = math.exp %505 : vector<1x40xf32>
    %cst_126 = arith.constant 1.000000e+00 : f32
    %507 = vector.broadcast %cst_126 : f32 to vector<1x40xf32>
    %508 = arith.addf %507, %506 : vector<1x40xf32>
    %509 = tpu.reciprocal %508 {approx = true} : vector<1x40xf32> -> vector<1x40xf32>
    %cst_127 = arith.constant 0.000000e+00 : f32
    %510 = vector.broadcast %cst_127 : f32 to vector<1x40xf32>
    %511 = arith.cmpf oge, %502, %510 : vector<1x40xf32>
    %512 = arith.mulf %506, %509 : vector<1x40xf32>
    %513 = arith.select %511, %509, %512 : vector<1x40xi1>, vector<1x40xf32>
    %514 = vector.broadcast %513 : vector<1x40xf32> to vector<16x40xf32>
    %515 = arith.mulf %478, %514 : vector<16x40xf32>
    %516 = arith.addf %402, %515 : vector<16x40xf32>
    %517 = math.absf %516 : vector<16x40xf32>
    %cst_128 = arith.constant 0.000000e+00 : f32
    %518 = vector.broadcast %cst_128 : f32 to vector<16x40xf32>
    %519 = arith.subf %518, %517 : vector<16x40xf32>
    %520 = math.exp %519 : vector<16x40xf32>
    %cst_129 = arith.constant 1.000000e+00 : f32
    %521 = vector.broadcast %cst_129 : f32 to vector<16x40xf32>
    %522 = arith.addf %521, %520 : vector<16x40xf32>
    %523 = tpu.reciprocal %522 {approx = true} : vector<16x40xf32> -> vector<16x40xf32>
    %cst_130 = arith.constant 0.000000e+00 : f32
    %524 = vector.broadcast %cst_130 : f32 to vector<16x40xf32>
    %525 = arith.cmpf oge, %516, %524 : vector<16x40xf32>
    %526 = arith.mulf %520, %523 : vector<16x40xf32>
    %527 = arith.select %525, %523, %526 : vector<16x40xi1>, vector<16x40xf32>
    %528 = arith.mulf %516, %527 : vector<16x40xf32>
    %c0_131 = arith.constant 0 : index
    %c0_132 = arith.constant 0 : index
    %c0_133 = arith.constant 0 : index
    %529 = vector.load %arg10[%c0_131, %c0_132, %c0_133] : memref<1x16x40xf32, #tpu.memory_space<vmem>>, vector<1x16x40xf32>
    %530 = vector.shape_cast %529 : vector<1x16x40xf32> to vector<16x40xf32>
    %531 = vector.shape_cast %528 : vector<16x40xf32> to vector<1x16x40xf32>
    tpu.vector_store %arg10[%c0_131, %c0_132, %c0_133], %531 {strides = array<i32>} : memref<1x16x40xf32, #tpu.memory_space<vmem>>, vector<1x16x40xf32>,
    %c0_134 = arith.constant 0 : index
    %c0_135 = arith.constant 0 : index
    %532 = vector.load %arg8[%c0_134, %c0_135] : memref<36x16xbf16, #tpu.memory_space<vmem>>, vector<36x16xbf16>
    %533 = arith.truncf %528 : vector<16x40xf32> to vector<16x40xbf16>
    %cst_136 = arith.constant dense<0.000000e+00> : vector<36x40xf32>
    %534 = tpu.matmul %532, %533, %cst_136 {dimension_numbers = #tpu.dot_dimension_numbers<[1], [0], [0], [1], [0, 0, 1, 1], [], []>} : vector<36x16xbf16>, vector<16x40xbf16>, vector<36x40xf32> -> vector<36x40xf32>
    %c256 = arith.constant 256 : index
    %c0_137 = arith.constant 0 : index
    %535 = vector.load %arg2[%c256, %c0_137] : memref<408x128xf32, #tpu.memory_space<vmem>>, vector<9x40xf32>
    %536 = vector.extract_strided_slice %534 {offsets = [0, 0], sizes = [4, 40], strides = [1, 1]} : vector<36x40xf32> to vector<4x40xf32>
    %537 = vector.extract_strided_slice %535 {offsets = [0, 0], sizes = [1, 40], strides = [1, 1]} : vector<9x40xf32> to vector<1x40xf32>
    %538 = vector.broadcast %537 : vector<1x40xf32> to vector<4x40xf32>
    %539 = arith.mulf %536, %538 : vector<4x40xf32>
    %540 = vector.extract_strided_slice %534 {offsets = [4, 0], sizes = [4, 40], strides = [1, 1]} : vector<36x40xf32> to vector<4x40xf32>
    %541 = vector.extract_strided_slice %535 {offsets = [1, 0], sizes = [1, 40], strides = [1, 1]} : vector<9x40xf32> to vector<1x40xf32>
    %542 = vector.broadcast %541 : vector<1x40xf32> to vector<4x40xf32>
    %543 = arith.mulf %540, %542 : vector<4x40xf32>
    %544 = arith.addf %539, %543 : vector<4x40xf32>
    %545 = vector.extract_strided_slice %534 {offsets = [8, 0], sizes = [4, 40], strides = [1, 1]} : vector<36x40xf32> to vector<4x40xf32>
    %546 = vector.extract_strided_slice %535 {offsets = [2, 0], sizes = [1, 40], strides = [1, 1]} : vector<9x40xf32> to vector<1x40xf32>
    %547 = vector.broadcast %546 : vector<1x40xf32> to vector<4x40xf32>
    %548 = arith.mulf %545, %547 : vector<4x40xf32>
    %549 = arith.addf %544, %548 : vector<4x40xf32>
    %550 = vector.extract_strided_slice %534 {offsets = [12, 0], sizes = [4, 40], strides = [1, 1]} : vector<36x40xf32> to vector<4x40xf32>
    %551 = vector.extract_strided_slice %535 {offsets = [3, 0], sizes = [1, 40], strides = [1, 1]} : vector<9x40xf32> to vector<1x40xf32>
    %552 = vector.broadcast %551 : vector<1x40xf32> to vector<4x40xf32>
    %553 = arith.mulf %550, %552 : vector<4x40xf32>
    %554 = arith.addf %549, %553 : vector<4x40xf32>
    %555 = vector.extract_strided_slice %534 {offsets = [16, 0], sizes = [4, 40], strides = [1, 1]} : vector<36x40xf32> to vector<4x40xf32>
    %556 = vector.extract_strided_slice %535 {offsets = [4, 0], sizes = [1, 40], strides = [1, 1]} : vector<9x40xf32> to vector<1x40xf32>
    %557 = vector.broadcast %556 : vector<1x40xf32> to vector<4x40xf32>
    %558 = arith.mulf %555, %557 : vector<4x40xf32>
    %559 = arith.addf %554, %558 : vector<4x40xf32>
    %560 = vector.extract_strided_slice %534 {offsets = [20, 0], sizes = [4, 40], strides = [1, 1]} : vector<36x40xf32> to vector<4x40xf32>
    %561 = vector.extract_strided_slice %535 {offsets = [5, 0], sizes = [1, 40], strides = [1, 1]} : vector<9x40xf32> to vector<1x40xf32>
    %562 = vector.broadcast %561 : vector<1x40xf32> to vector<4x40xf32>
    %563 = arith.mulf %560, %562 : vector<4x40xf32>
    %564 = arith.addf %559, %563 : vector<4x40xf32>
    %565 = vector.extract_strided_slice %534 {offsets = [24, 0], sizes = [4, 40], strides = [1, 1]} : vector<36x40xf32> to vector<4x40xf32>
    %566 = vector.extract_strided_slice %535 {offsets = [6, 0], sizes = [1, 40], strides = [1, 1]} : vector<9x40xf32> to vector<1x40xf32>
    %567 = vector.broadcast %566 : vector<1x40xf32> to vector<4x40xf32>
    %568 = arith.mulf %565, %567 : vector<4x40xf32>
    %569 = arith.addf %564, %568 : vector<4x40xf32>
    %570 = vector.extract_strided_slice %534 {offsets = [28, 0], sizes = [4, 40], strides = [1, 1]} : vector<36x40xf32> to vector<4x40xf32>
    %571 = vector.extract_strided_slice %535 {offsets = [7, 0], sizes = [1, 40], strides = [1, 1]} : vector<9x40xf32> to vector<1x40xf32>
    %572 = vector.broadcast %571 : vector<1x40xf32> to vector<4x40xf32>
    %573 = arith.mulf %570, %572 : vector<4x40xf32>
    %574 = arith.addf %569, %573 : vector<4x40xf32>
    %575 = vector.extract_strided_slice %534 {offsets = [32, 0], sizes = [4, 40], strides = [1, 1]} : vector<36x40xf32> to vector<4x40xf32>
    %576 = vector.extract_strided_slice %535 {offsets = [8, 0], sizes = [1, 40], strides = [1, 1]} : vector<9x40xf32> to vector<1x40xf32>
    %577 = vector.broadcast %576 : vector<1x40xf32> to vector<4x40xf32>
    %578 = arith.mulf %575, %577 : vector<4x40xf32>
    %579 = arith.addf %574, %578 : vector<4x40xf32>
    %c272 = arith.constant 272 : index
    %c0_138 = arith.constant 0 : index
    %580 = vector.load %arg2[%c272, %c0_138] : memref<408x128xf32, #tpu.memory_space<vmem>>, vector<1x40xf32>
    %581 = vector.broadcast %580 : vector<1x40xf32> to vector<4x40xf32>
    %582 = arith.mulf %579, %581 : vector<4x40xf32>
    %c280 = arith.constant 280 : index
    %c0_139 = arith.constant 0 : index
    %583 = vector.load %arg2[%c280, %c0_139] : memref<408x128xf32, #tpu.memory_space<vmem>>, vector<1x40xf32>
    %584 = vector.broadcast %583 : vector<1x40xf32> to vector<4x40xf32>
    %585 = arith.addf %582, %584 : vector<4x40xf32>
    %586 = math.absf %585 : vector<4x40xf32>
    %cst_140 = arith.constant 0.000000e+00 : f32
    %587 = vector.broadcast %cst_140 : f32 to vector<4x40xf32>
    %588 = arith.subf %587, %586 : vector<4x40xf32>
    %589 = math.exp %588 : vector<4x40xf32>
    %cst_141 = arith.constant 1.000000e+00 : f32
    %590 = vector.broadcast %cst_141 : f32 to vector<4x40xf32>
    %591 = arith.addf %590, %589 : vector<4x40xf32>
    %592 = tpu.reciprocal %591 {approx = true} : vector<4x40xf32> -> vector<4x40xf32>
    %cst_142 = arith.constant 0.000000e+00 : f32
    %593 = vector.broadcast %cst_142 : f32 to vector<4x40xf32>
    %594 = arith.cmpf oge, %585, %593 : vector<4x40xf32>
    %595 = arith.mulf %589, %592 : vector<4x40xf32>
    %596 = arith.select %594, %592, %595 : vector<4x40xi1>, vector<4x40xf32>
    %597 = arith.mulf %585, %596 : vector<4x40xf32>
    %c13 = arith.constant 13 : index
    %c0_143 = arith.constant 0 : index
    %c0_144 = arith.constant 0 : index
    %598 = vector.load %arg3[%c13, %c0_143, %c0_144] : memref<21x64x128xbf16, #tpu.memory_space<vmem>>, vector<1x40x52xbf16>
    %599 = vector.shape_cast %598 : vector<1x40x52xbf16> to vector<40x52xbf16>
    %600 = arith.truncf %597 : vector<4x40xf32> to vector<4x40xbf16>
    %cst_145 = arith.constant dense<0.000000e+00> : vector<4x52xf32>
    %601 = tpu.matmul %600, %599, %cst_145 {dimension_numbers = #tpu.dot_dimension_numbers<[1], [0], [0], [1], [0, 0, 1, 1], [], []>} : vector<4x40xbf16>, vector<40x52xbf16>, vector<4x52xf32> -> vector<4x52xf32>
    %c288 = arith.constant 288 : index
    %c0_146 = arith.constant 0 : index
    %602 = vector.load %arg2[%c288, %c0_146] : memref<408x128xf32, #tpu.memory_space<vmem>>, vector<1x52xf32>
    %603 = vector.broadcast %602 : vector<1x52xf32> to vector<4x52xf32>
    %604 = arith.addf %601, %603 : vector<4x52xf32>
    %605 = vector.extract_strided_slice %534 {offsets = [16, 0], sizes = [4, 40], strides = [1, 1]} : vector<36x40xf32> to vector<4x40xf32>
    %606 = vector.extract_strided_slice %534 {offsets = [20, 0], sizes = [4, 40], strides = [1, 1]} : vector<36x40xf32> to vector<4x40xf32>
    %607 = arith.maximumf %605, %606 : vector<4x40xf32>
    %608 = vector.extract_strided_slice %534 {offsets = [28, 0], sizes = [4, 40], strides = [1, 1]} : vector<36x40xf32> to vector<4x40xf32>
    %609 = arith.maximumf %607, %608 : vector<4x40xf32>
    %610 = vector.extract_strided_slice %534 {offsets = [32, 0], sizes = [4, 40], strides = [1, 1]} : vector<36x40xf32> to vector<4x40xf32>
    %611 = arith.maximumf %609, %610 : vector<4x40xf32>
    %c12 = arith.constant 12 : index
    %c0_147 = arith.constant 0 : index
    %c0_148 = arith.constant 0 : index
    %612 = vector.load %arg3[%c12, %c0_147, %c0_148] : memref<21x64x128xbf16, #tpu.memory_space<vmem>>, vector<1x40x52xbf16>
    %613 = vector.shape_cast %612 : vector<1x40x52xbf16> to vector<40x52xbf16>
    %614 = arith.truncf %611 : vector<4x40xf32> to vector<4x40xbf16>
    %cst_149 = arith.constant dense<0.000000e+00> : vector<4x52xf32>
    %615 = tpu.matmul %614, %613, %cst_149 {dimension_numbers = #tpu.dot_dimension_numbers<[1], [0], [0], [1], [0, 0, 1, 1], [], []>} : vector<4x40xbf16>, vector<40x52xbf16>, vector<4x52xf32> -> vector<4x52xf32>
    %616 = arith.addf %604, %615 : vector<4x52xf32>
    %c296 = arith.constant 296 : index
    %c0_150 = arith.constant 0 : index
    %617 = vector.load %arg2[%c296, %c0_150] : memref<408x128xf32, #tpu.memory_space<vmem>>, vector<1x52xf32>
    %618 = vector.broadcast %617 : vector<1x52xf32> to vector<4x52xf32>
    %619 = arith.mulf %616, %618 : vector<4x52xf32>
    %c304 = arith.constant 304 : index
    %c0_151 = arith.constant 0 : index
    %620 = vector.load %arg2[%c304, %c0_151] : memref<408x128xf32, #tpu.memory_space<vmem>>, vector<1x52xf32>
    %621 = vector.broadcast %620 : vector<1x52xf32> to vector<4x52xf32>
    %622 = arith.addf %619, %621 : vector<4x52xf32>
    %623 = math.absf %622 : vector<4x52xf32>
    %cst_152 = arith.constant 0.000000e+00 : f32
    %624 = vector.broadcast %cst_152 : f32 to vector<4x52xf32>
    %625 = arith.subf %624, %623 : vector<4x52xf32>
    %626 = math.exp %625 : vector<4x52xf32>
    %cst_153 = arith.constant 1.000000e+00 : f32
    %627 = vector.broadcast %cst_153 : f32 to vector<4x52xf32>
    %628 = arith.addf %627, %626 : vector<4x52xf32>
    %629 = tpu.reciprocal %628 {approx = true} : vector<4x52xf32> -> vector<4x52xf32>
    %cst_154 = arith.constant 0.000000e+00 : f32
    %630 = vector.broadcast %cst_154 : f32 to vector<4x52xf32>
    %631 = arith.cmpf oge, %622, %630 : vector<4x52xf32>
    %632 = arith.mulf %626, %629 : vector<4x52xf32>
    %633 = arith.select %631, %629, %632 : vector<4x52xi1>, vector<4x52xf32>
    %634 = arith.mulf %622, %633 : vector<4x52xf32>
    %c14 = arith.constant 14 : index
    %c0_155 = arith.constant 0 : index
    %c0_156 = arith.constant 0 : index
    %635 = vector.load %arg3[%c14, %c0_155, %c0_156] : memref<21x64x128xbf16, #tpu.memory_space<vmem>>, vector<1x52x52xbf16>
    %636 = vector.shape_cast %635 : vector<1x52x52xbf16> to vector<52x52xbf16>
    %637 = arith.truncf %634 : vector<4x52xf32> to vector<4x52xbf16>
    %cst_157 = arith.constant dense<0.000000e+00> : vector<4x52xf32>
    %638 = tpu.matmul %637, %636, %cst_157 {dimension_numbers = #tpu.dot_dimension_numbers<[1], [0], [0], [1], [0, 0, 1, 1], [], []>} : vector<4x52xbf16>, vector<52x52xbf16>, vector<4x52xf32> -> vector<4x52xf32>
    %c312 = arith.constant 312 : index
    %c0_158 = arith.constant 0 : index
    %639 = vector.load %arg2[%c312, %c0_158] : memref<408x128xf32, #tpu.memory_space<vmem>>, vector<1x52xf32>
    %640 = vector.broadcast %639 : vector<1x52xf32> to vector<4x52xf32>
    %641 = arith.mulf %638, %640 : vector<4x52xf32>
    %c320 = arith.constant 320 : index
    %c0_159 = arith.constant 0 : index
    %642 = vector.load %arg2[%c320, %c0_159] : memref<408x128xf32, #tpu.memory_space<vmem>>, vector<1x52xf32>
    %643 = vector.broadcast %642 : vector<1x52xf32> to vector<4x52xf32>
    %644 = arith.addf %641, %643 : vector<4x52xf32>
    %645 = math.absf %644 : vector<4x52xf32>
    %cst_160 = arith.constant 0.000000e+00 : f32
    %646 = vector.broadcast %cst_160 : f32 to vector<4x52xf32>
    %647 = arith.subf %646, %645 : vector<4x52xf32>
    %648 = math.exp %647 : vector<4x52xf32>
    %cst_161 = arith.constant 1.000000e+00 : f32
    %649 = vector.broadcast %cst_161 : f32 to vector<4x52xf32>
    %650 = arith.addf %649, %648 : vector<4x52xf32>
    %651 = tpu.reciprocal %650 {approx = true} : vector<4x52xf32> -> vector<4x52xf32>
    %cst_162 = arith.constant 0.000000e+00 : f32
    %652 = vector.broadcast %cst_162 : f32 to vector<4x52xf32>
    %653 = arith.cmpf oge, %644, %652 : vector<4x52xf32>
    %654 = arith.mulf %648, %651 : vector<4x52xf32>
    %655 = arith.select %653, %651, %654 : vector<4x52xi1>, vector<4x52xf32>
    %656 = arith.mulf %644, %655 : vector<4x52xf32>
    %c15 = arith.constant 15 : index
    %c0_163 = arith.constant 0 : index
    %c0_164 = arith.constant 0 : index
    %657 = vector.load %arg3[%c15, %c0_163, %c0_164] : memref<21x64x128xbf16, #tpu.memory_space<vmem>>, vector<1x52x52xbf16>
    %658 = vector.shape_cast %657 : vector<1x52x52xbf16> to vector<52x52xbf16>
    %659 = arith.truncf %656 : vector<4x52xf32> to vector<4x52xbf16>
    %cst_165 = arith.constant dense<0.000000e+00> : vector<4x52xf32>
    %660 = tpu.matmul %659, %658, %cst_165 {dimension_numbers = #tpu.dot_dimension_numbers<[1], [0], [0], [1], [0, 0, 1, 1], [], []>} : vector<4x52xbf16>, vector<52x52xbf16>, vector<4x52xf32> -> vector<4x52xf32>
    %c328 = arith.constant 328 : index
    %c0_166 = arith.constant 0 : index
    %661 = vector.load %arg2[%c328, %c0_166] : memref<408x128xf32, #tpu.memory_space<vmem>>, vector<1x52xf32>
    %662 = vector.broadcast %661 : vector<1x52xf32> to vector<4x52xf32>
    %663 = arith.mulf %634, %662 : vector<4x52xf32>
    %c336 = arith.constant 336 : index
    %c0_167 = arith.constant 0 : index
    %664 = vector.load %arg2[%c336, %c0_167] : memref<408x128xf32, #tpu.memory_space<vmem>>, vector<1x52xf32>
    %665 = vector.broadcast %664 : vector<1x52xf32> to vector<4x52xf32>
    %666 = arith.addf %663, %665 : vector<4x52xf32>
    %667 = math.absf %666 : vector<4x52xf32>
    %cst_168 = arith.constant 0.000000e+00 : f32
    %668 = vector.broadcast %cst_168 : f32 to vector<4x52xf32>
    %669 = arith.subf %668, %667 : vector<4x52xf32>
    %670 = math.exp %669 : vector<4x52xf32>
    %cst_169 = arith.constant 1.000000e+00 : f32
    %671 = vector.broadcast %cst_169 : f32 to vector<4x52xf32>
    %672 = arith.addf %671, %670 : vector<4x52xf32>
    %673 = tpu.reciprocal %672 {approx = true} : vector<4x52xf32> -> vector<4x52xf32>
    %cst_170 = arith.constant 0.000000e+00 : f32
    %674 = vector.broadcast %cst_170 : f32 to vector<4x52xf32>
    %675 = arith.cmpf oge, %666, %674 : vector<4x52xf32>
    %676 = arith.mulf %670, %673 : vector<4x52xf32>
    %677 = arith.select %675, %673, %676 : vector<4x52xi1>, vector<4x52xf32>
    %678 = arith.mulf %666, %677 : vector<4x52xf32>
    %c16_171 = arith.constant 16 : index
    %c0_172 = arith.constant 0 : index
    %c0_173 = arith.constant 0 : index
    %679 = vector.load %arg3[%c16_171, %c0_172, %c0_173] : memref<21x64x128xbf16, #tpu.memory_space<vmem>>, vector<1x52x52xbf16>
    %680 = vector.shape_cast %679 : vector<1x52x52xbf16> to vector<52x52xbf16>
    %681 = arith.truncf %678 : vector<4x52xf32> to vector<4x52xbf16>
    %cst_174 = arith.constant dense<0.000000e+00> : vector<4x52xf32>
    %682 = tpu.matmul %681, %680, %cst_174 {dimension_numbers = #tpu.dot_dimension_numbers<[1], [0], [0], [1], [0, 0, 1, 1], [], []>} : vector<4x52xbf16>, vector<52x52xbf16>, vector<4x52xf32> -> vector<4x52xf32>
    %683 = arith.addf %660, %682 : vector<4x52xf32>
    %c344 = arith.constant 344 : index
    %c0_175 = arith.constant 0 : index
    %684 = vector.load %arg2[%c344, %c0_175] : memref<408x128xf32, #tpu.memory_space<vmem>>, vector<1x52xf32>
    %685 = vector.broadcast %684 : vector<1x52xf32> to vector<4x52xf32>
    %686 = arith.mulf %634, %685 : vector<4x52xf32>
    %c352 = arith.constant 352 : index
    %c0_176 = arith.constant 0 : index
    %687 = vector.load %arg2[%c352, %c0_176] : memref<408x128xf32, #tpu.memory_space<vmem>>, vector<1x52xf32>
    %688 = vector.broadcast %687 : vector<1x52xf32> to vector<4x52xf32>
    %689 = arith.addf %686, %688 : vector<4x52xf32>
    %690 = math.absf %689 : vector<4x52xf32>
    %cst_177 = arith.constant 0.000000e+00 : f32
    %691 = vector.broadcast %cst_177 : f32 to vector<4x52xf32>
    %692 = arith.subf %691, %690 : vector<4x52xf32>
    %693 = math.exp %692 : vector<4x52xf32>
    %cst_178 = arith.constant 1.000000e+00 : f32
    %694 = vector.broadcast %cst_178 : f32 to vector<4x52xf32>
    %695 = arith.addf %694, %693 : vector<4x52xf32>
    %696 = tpu.reciprocal %695 {approx = true} : vector<4x52xf32> -> vector<4x52xf32>
    %cst_179 = arith.constant 0.000000e+00 : f32
    %697 = vector.broadcast %cst_179 : f32 to vector<4x52xf32>
    %698 = arith.cmpf oge, %689, %697 : vector<4x52xf32>
    %699 = arith.mulf %693, %696 : vector<4x52xf32>
    %700 = arith.select %698, %696, %699 : vector<4x52xi1>, vector<4x52xf32>
    %701 = arith.mulf %689, %700 : vector<4x52xf32>
    %c17 = arith.constant 17 : index
    %c0_180 = arith.constant 0 : index
    %c0_181 = arith.constant 0 : index
    %702 = vector.load %arg3[%c17, %c0_180, %c0_181] : memref<21x64x128xbf16, #tpu.memory_space<vmem>>, vector<1x52x52xbf16>
    %703 = vector.shape_cast %702 : vector<1x52x52xbf16> to vector<52x52xbf16>
    %704 = arith.truncf %701 : vector<4x52xf32> to vector<4x52xbf16>
    %cst_182 = arith.constant dense<0.000000e+00> : vector<4x52xf32>
    %705 = tpu.matmul %704, %703, %cst_182 {dimension_numbers = #tpu.dot_dimension_numbers<[1], [0], [0], [1], [0, 0, 1, 1], [], []>} : vector<4x52xbf16>, vector<52x52xbf16>, vector<4x52xf32> -> vector<4x52xf32>
    %706 = arith.addf %683, %705 : vector<4x52xf32>
    %c360 = arith.constant 360 : index
    %c0_183 = arith.constant 0 : index
    %707 = vector.load %arg2[%c360, %c0_183] : memref<408x128xf32, #tpu.memory_space<vmem>>, vector<1x52xf32>
    %708 = vector.broadcast %707 : vector<1x52xf32> to vector<4x52xf32>
    %709 = arith.mulf %634, %708 : vector<4x52xf32>
    %c368 = arith.constant 368 : index
    %c0_184 = arith.constant 0 : index
    %710 = vector.load %arg2[%c368, %c0_184] : memref<408x128xf32, #tpu.memory_space<vmem>>, vector<1x52xf32>
    %711 = vector.broadcast %710 : vector<1x52xf32> to vector<4x52xf32>
    %712 = arith.addf %709, %711 : vector<4x52xf32>
    %713 = math.absf %712 : vector<4x52xf32>
    %cst_185 = arith.constant 0.000000e+00 : f32
    %714 = vector.broadcast %cst_185 : f32 to vector<4x52xf32>
    %715 = arith.subf %714, %713 : vector<4x52xf32>
    %716 = math.exp %715 : vector<4x52xf32>
    %cst_186 = arith.constant 1.000000e+00 : f32
    %717 = vector.broadcast %cst_186 : f32 to vector<4x52xf32>
    %718 = arith.addf %717, %716 : vector<4x52xf32>
    %719 = tpu.reciprocal %718 {approx = true} : vector<4x52xf32> -> vector<4x52xf32>
    %cst_187 = arith.constant 0.000000e+00 : f32
    %720 = vector.broadcast %cst_187 : f32 to vector<4x52xf32>
    %721 = arith.cmpf oge, %712, %720 : vector<4x52xf32>
    %722 = arith.mulf %716, %719 : vector<4x52xf32>
    %723 = arith.select %721, %719, %722 : vector<4x52xi1>, vector<4x52xf32>
    %724 = arith.mulf %712, %723 : vector<4x52xf32>
    %c18 = arith.constant 18 : index
    %c0_188 = arith.constant 0 : index
    %c0_189 = arith.constant 0 : index
    %725 = vector.load %arg3[%c18, %c0_188, %c0_189] : memref<21x64x128xbf16, #tpu.memory_space<vmem>>, vector<1x52x52xbf16>
    %726 = vector.shape_cast %725 : vector<1x52x52xbf16> to vector<52x52xbf16>
    %727 = arith.truncf %724 : vector<4x52xf32> to vector<4x52xbf16>
    %cst_190 = arith.constant dense<0.000000e+00> : vector<4x52xf32>
    %728 = tpu.matmul %727, %726, %cst_190 {dimension_numbers = #tpu.dot_dimension_numbers<[1], [0], [0], [1], [0, 0, 1, 1], [], []>} : vector<4x52xbf16>, vector<52x52xbf16>, vector<4x52xf32> -> vector<4x52xf32>
    %729 = arith.addf %706, %728 : vector<4x52xf32>
    %cst_191 = arith.constant dense<0.000000e+00> : vector<52xf32>
    %730 = vector.multi_reduction <add>, %634, %cst_191 [0] : vector<4x52xf32> to vector<52xf32>
    %731 = vector.shape_cast %730 : vector<52xf32> to vector<1x52xf32>
    %cst_192 = arith.constant 4.000000e+00 : f32
    %732 = vector.broadcast %cst_192 : f32 to vector<1x52xf32>
    %733 = arith.divf %731, %732 : vector<1x52xf32>
    %c19 = arith.constant 19 : index
    %c0_193 = arith.constant 0 : index
    %c0_194 = arith.constant 0 : index
    %734 = vector.load %arg3[%c19, %c0_193, %c0_194] : memref<21x64x128xbf16, #tpu.memory_space<vmem>>, vector<1x52x52xbf16>
    %735 = vector.shape_cast %734 : vector<1x52x52xbf16> to vector<52x52xbf16>
    %736 = arith.truncf %733 : vector<1x52xf32> to vector<1x52xbf16>
    %cst_195 = arith.constant dense<0.000000e+00> : vector<1x52xf32>
    %737 = tpu.matmul %736, %735, %cst_195 {dimension_numbers = #tpu.dot_dimension_numbers<[1], [0], [0], [1], [0, 0, 1, 1], [], []>} : vector<1x52xbf16>, vector<52x52xbf16>, vector<1x52xf32> -> vector<1x52xf32>
    %738 = math.absf %737 : vector<1x52xf32>
    %cst_196 = arith.constant 0.000000e+00 : f32
    %739 = vector.broadcast %cst_196 : f32 to vector<1x52xf32>
    %740 = arith.subf %739, %738 : vector<1x52xf32>
    %741 = math.exp %740 : vector<1x52xf32>
    %cst_197 = arith.constant 1.000000e+00 : f32
    %742 = vector.broadcast %cst_197 : f32 to vector<1x52xf32>
    %743 = arith.addf %742, %741 : vector<1x52xf32>
    %744 = tpu.reciprocal %743 {approx = true} : vector<1x52xf32> -> vector<1x52xf32>
    %cst_198 = arith.constant 0.000000e+00 : f32
    %745 = vector.broadcast %cst_198 : f32 to vector<1x52xf32>
    %746 = arith.cmpf oge, %737, %745 : vector<1x52xf32>
    %747 = arith.mulf %741, %744 : vector<1x52xf32>
    %748 = arith.select %746, %744, %747 : vector<1x52xi1>, vector<1x52xf32>
    %749 = arith.mulf %737, %748 : vector<1x52xf32>
    %c376 = arith.constant 376 : index
    %c0_199 = arith.constant 0 : index
    %750 = vector.load %arg2[%c376, %c0_199] : memref<408x128xf32, #tpu.memory_space<vmem>>, vector<1x52xf32>
    %751 = arith.mulf %749, %750 : vector<1x52xf32>
    %c384 = arith.constant 384 : index
    %c0_200 = arith.constant 0 : index
    %752 = vector.load %arg2[%c384, %c0_200] : memref<408x128xf32, #tpu.memory_space<vmem>>, vector<1x52xf32>
    %753 = arith.addf %751, %752 : vector<1x52xf32>
    %c20 = arith.constant 20 : index
    %c0_201 = arith.constant 0 : index
    %c0_202 = arith.constant 0 : index
    %754 = vector.load %arg3[%c20, %c0_201, %c0_202] : memref<21x64x128xbf16, #tpu.memory_space<vmem>>, vector<1x52x52xbf16>
    %755 = vector.shape_cast %754 : vector<1x52x52xbf16> to vector<52x52xbf16>
    %756 = arith.truncf %753 : vector<1x52xf32> to vector<1x52xbf16>
    %cst_203 = arith.constant dense<0.000000e+00> : vector<1x52xf32>
    %757 = tpu.matmul %756, %755, %cst_203 {dimension_numbers = #tpu.dot_dimension_numbers<[1], [0], [0], [1], [0, 0, 1, 1], [], []>} : vector<1x52xbf16>, vector<52x52xbf16>, vector<1x52xf32> -> vector<1x52xf32>
    %758 = vector.broadcast %757 : vector<1x52xf32> to vector<4x52xf32>
    %759 = arith.addf %729, %758 : vector<4x52xf32>
    %c392 = arith.constant 392 : index
    %c0_204 = arith.constant 0 : index
    %760 = vector.load %arg2[%c392, %c0_204] : memref<408x128xf32, #tpu.memory_space<vmem>>, vector<1x52xf32>
    %761 = vector.broadcast %760 : vector<1x52xf32> to vector<4x52xf32>
    %762 = arith.mulf %759, %761 : vector<4x52xf32>
    %c400 = arith.constant 400 : index
    %c0_205 = arith.constant 0 : index
    %763 = vector.load %arg2[%c400, %c0_205] : memref<408x128xf32, #tpu.memory_space<vmem>>, vector<1x52xf32>
    %764 = vector.broadcast %763 : vector<1x52xf32> to vector<4x52xf32>
    %765 = arith.addf %762, %764 : vector<4x52xf32>
    %766 = math.absf %765 : vector<4x52xf32>
    %cst_206 = arith.constant 0.000000e+00 : f32
    %767 = vector.broadcast %cst_206 : f32 to vector<4x52xf32>
    %768 = arith.subf %767, %766 : vector<4x52xf32>
    %769 = math.exp %768 : vector<4x52xf32>
    %cst_207 = arith.constant 1.000000e+00 : f32
    %770 = vector.broadcast %cst_207 : f32 to vector<4x52xf32>
    %771 = arith.addf %770, %769 : vector<4x52xf32>
    %772 = tpu.reciprocal %771 {approx = true} : vector<4x52xf32> -> vector<4x52xf32>
    %cst_208 = arith.constant 0.000000e+00 : f32
    %773 = vector.broadcast %cst_208 : f32 to vector<4x52xf32>
    %774 = arith.cmpf oge, %765, %773 : vector<4x52xf32>
    %775 = arith.mulf %769, %772 : vector<4x52xf32>
    %776 = arith.select %774, %772, %775 : vector<4x52xi1>, vector<4x52xf32>
    %777 = arith.mulf %765, %776 : vector<4x52xf32>
    %c0_209 = arith.constant 0 : index
    %c0_210 = arith.constant 0 : index
    %c0_211 = arith.constant 0 : index
    %778 = vector.load %arg9[%c0_209, %c0_210, %c0_211] : memref<1x4x52xf32, #tpu.memory_space<vmem>>, vector<1x4x52xf32>
    %779 = vector.shape_cast %778 : vector<1x4x52xf32> to vector<4x52xf32>
    %780 = vector.shape_cast %777 : vector<4x52xf32> to vector<1x4x52xf32>
    tpu.vector_store %arg9[%c0_209, %c0_210, %c0_211], %780 {strides = array<i32>} : memref<1x4x52xf32, #tpu.memory_space<vmem>>, vector<1x4x52xf32>,
    return
  }
  func.func @transform_0(%arg0: i32) -> (i32, i32, i32) {
    %c0_i32 = arith.constant 0 : i32
    %c0_i32_0 = arith.constant 0 : i32
    %c0_i32_1 = arith.constant 0 : i32
    return %arg0, %c0_i32, %c0_i32_0 : i32, i32, i32
  }
  func.func @transform_1(%arg0: i32) -> (i32, i32) {
    %c0_i32 = arith.constant 0 : i32
    %c0_i32_0 = arith.constant 0 : i32
    %c0_i32_1 = arith.constant 0 : i32
    return %c0_i32, %c0_i32_0 : i32, i32
  }
  func.func @transform_2(%arg0: i32) -> (i32, i32, i32) {
    %c0_i32 = arith.constant 0 : i32
    %c0_i32_0 = arith.constant 0 : i32
    %c0_i32_1 = arith.constant 0 : i32
    %c0_i32_2 = arith.constant 0 : i32
    return %c0_i32, %c0_i32_0, %c0_i32_1 : i32, i32, i32
  }
  func.func @transform_3(%arg0: i32) -> (i32, i32) {
    %c0_i32 = arith.constant 0 : i32
    %c0_i32_0 = arith.constant 0 : i32
    %c0_i32_1 = arith.constant 0 : i32
    return %c0_i32, %c0_i32_0 : i32, i32
  }
  func.func @transform_4(%arg0: i32) -> (i32, i32) {
    %c0_i32 = arith.constant 0 : i32
    %c0_i32_0 = arith.constant 0 : i32
    %c0_i32_1 = arith.constant 0 : i32
    return %c0_i32, %c0_i32_0 : i32, i32
  }
  func.func @transform_5(%arg0: i32) -> (i32, i32) {
    %c0_i32 = arith.constant 0 : i32
    %c0_i32_0 = arith.constant 0 : i32
    %c0_i32_1 = arith.constant 0 : i32
    return %c0_i32, %c0_i32_0 : i32, i32
  }
  func.func @transform_6(%arg0: i32) -> (i32, i32) {
    %c0_i32 = arith.constant 0 : i32
    %c0_i32_0 = arith.constant 0 : i32
    %c0_i32_1 = arith.constant 0 : i32
    return %c0_i32, %c0_i32_0 : i32, i32
  }
  func.func @transform_7(%arg0: i32) -> (i32, i32) {
    %c0_i32 = arith.constant 0 : i32
    %c0_i32_0 = arith.constant 0 : i32
    %c0_i32_1 = arith.constant 0 : i32
    return %c0_i32, %c0_i32_0 : i32, i32
  }
  func.func @transform_8(%arg0: i32) -> (i32, i32, i32) {
    %c0_i32 = arith.constant 0 : i32
    %c0_i32_0 = arith.constant 0 : i32
    %c0_i32_1 = arith.constant 0 : i32
    return %arg0, %c0_i32, %c0_i32_0 : i32, i32, i32
  }
  func.func @transform_9(%arg0: i32) -> (i32, i32, i32) {
    %c0_i32 = arith.constant 0 : i32
    %c0_i32_0 = arith.constant 0 : i32
    %c0_i32_1 = arith.constant 0 : i32
    return %arg0, %c0_i32, %c0_i32_0 : i32, i32, i32
  }
}

</mosaic_0001>

<bundles_post_ra>
// kernel: mul.116
= control target key start
LH: loop header
LB: loop body
LE: loop exit
PB: predicated region body
PF: predicated region fallthrough
CT: control target
= control target key end

     0   :  { %s34_s0 = inlined_call_operand.vmem [shape: f32[1,20], index: 0, kind: input, shape index: {}]   ;;  %s35_s1 = inlined_call_operand.vmem [shape: f32[1,20], index: 1, kind: input, shape index: {}]   ;;  %s36_s2 = inlined_call_operand.vmem [shape: f32[1,20], index: 2, kind: output, shape index: {}]  }
   0x1   :  { %v3_v0 = vld [vmem:[%s34_s0] sm:$0x1] }
   0x2   :  { %v4_v1 = vld [vmem:[%s35_s1] sm:$0x1] }
   0x3   :  { %v7_v2 = vmul.f32 %v4_v1, %v3_v0 }
   0x5   :  { %9 = vst [vmem:[%s36_s2] sm:$0x1] %v7_v2 }

// kernel: tile.294
= control target key start
LH: loop header
LB: loop body
LE: loop exit
PB: predicated region body
PF: predicated region fallthrough
CT: control target
= control target key end

     0   :  { %vm47_vm0 = vcmask 1047556   ;;  %vm49_vm1 = vcmask 80896   ;;  %vm64_vm2 = vcmask 162896   ;;  %s141_s0 = inlined_call_operand.vmem [shape: f32[9,2,10], index: 0, kind: input, shape index: {}]   ;;  %s142_s1 = inlined_call_operand.vmem [shape: f32[9,20], index: 1, kind: output, shape index: {}]  }
   0x1   :  { %v81_v0 = vld [vmem:[%s141_s0 + $0xe] sm:$0x3]  ;;  %v82_v1 = vld [vmem:[%s141_s0 + $0xc] sm:$0x3]  ;;  %v83_v2 = vld [vmem:[%s141_s0 + $0xa] sm:$0x3] }
   0x2   :  { %13 = vst [vmem:[#allocation0 + $0x38] sm:$0x3] %v81_v0  ;;  %18 = vst [vmem:[#allocation0 + $0x30] sm:$0x3] %v82_v1  ;;  %v84_v3 = vld [vmem:[%s141_s0 + $0x8] sm:$0x3] }
   0x3   :  { %23 = vst [vmem:[#allocation0 + $0x28] sm:$0x3] %v83_v2  ;;  %v85_v4 = vld [vmem:[%s141_s0 + $0x6] sm:$0x3]  ;;  %v86_v5 = vld [vmem:[%s141_s0 + $0x4] sm:$0x3] }
   0x4   :  { %28 = vst [vmem:[#allocation0 + $0x20] sm:$0x3] %v84_v3  ;;  %33 = vst [vmem:[#allocation0 + $0x18] sm:$0x3] %v85_v4  ;;  %v87_v6 = vld [vmem:[%s141_s0 + $0x2] sm:$0x3] }
   0x5   :  { %38 = vst [vmem:[#allocation0 + $0x10] sm:$0x3] %v86_v5  ;;  %v43_v7 = vld [vmem:[%s141_s0] sm:$0x3]  ;;  %42 = vst [vmem:[#allocation0 + $0x8] sm:$0x3] %v87_v6 }
   0x6   :  { %44 = vst [vmem:[#allocation0] sm:$0x3] %v43_v7  ;;  %v80_v8 = vld [vmem:[%s141_s0 + $0x10] sm:$0x3]  ;;  %s91_s0 = smov 10  }
   0x7   :  { %8 = vst [vmem:[#allocation0 + $0x40] sm:$0x3] %v80_v8 }
   0xb   :  { %v59_v9 = vld [vmem:[#allocation0 + $0x1] ss:$8 sm:$0xf0]   ;;  %v46_v10 = vld [vmem:[#allocation0] ss:$8 sm:$0xf0]  }
   0xd   :  { %v45_v11 = vld [vmem:[#allocation0] ss:$8 sm:$0xf]   ;;  %v57_v12 = vld [vmem:[#allocation0 + $0x1] ss:$8 sm:$0xf]  }
   0xe   :  { %v61_v13 = vsel %vm47_vm0, %v59_v9, %v57_v12  ;;  %v48_v14 = vsel %vm47_vm0, %v46_v10, %v45_v11  ;;  %v52_v15 = vld [vmem:[#allocation0 + $0x40] sm:$0x1]   ;;  %v67_v16 = vld [vmem:[#allocation0 + $0x41] sm:$0x1]  }
   0xf   :  { %62 = vrot.lane.b32.xlu0 %v61_v13, %s91_s0  ;;  %50 = vst.msk [vmem:[%s142_s1] sm:$0xff] %vm49_vm1, %v48_v14   ;;  %88 = vst.msk [vmem:[%s142_s1 + $0x8] sm:$0x1] %vm49_vm1, %v52_v15  }
  0x13   :  { %68 = vrot.lane.b32.xlu0 %v67_v16, %s91_s0 }
  0x81   :  { %v63_v17 = vpop.permute.xlu0 %62  }
  0x82   :  { %65 = vst.msk [vmem:[%s142_s1] sm:$0xff] %vm64_vm2, %v63_v17  }
  0x85   :  { %v69_v18 = vpop.permute.xlu0 %68  }
  0x86   :  { %89 = vst.msk [vmem:[%s142_s1 + $0x8] sm:$0x1] %vm64_vm2, %v69_v18  }

// kernel: tile.324
= control target key start
LH: loop header
LB: loop body
LE: loop exit
PB: predicated region body
PF: predicated region fallthrough
CT: control target
= control target key end

     0   :  { %vm47_vm0 = vcmask 1047556   ;;  %vm49_vm1 = vcmask 162816   ;;  %vm64_vm2 = vcmask 326816   ;;  %s141_s0 = inlined_call_operand.vmem [shape: f32[9,2,20], index: 0, kind: input, shape index: {}]   ;;  %s142_s1 = inlined_call_operand.vmem [shape: f32[9,40], index: 1, kind: output, shape index: {}]  }
   0x1   :  { %v81_v0 = vld [vmem:[%s141_s0 + $0xe] sm:$0x3]  ;;  %v82_v1 = vld [vmem:[%s141_s0 + $0xc] sm:$0x3]  ;;  %v83_v2 = vld [vmem:[%s141_s0 + $0xa] sm:$0x3] }
   0x2   :  { %13 = vst [vmem:[#allocation0 + $0x38] sm:$0x3] %v81_v0  ;;  %18 = vst [vmem:[#allocation0 + $0x30] sm:$0x3] %v82_v1  ;;  %v84_v3 = vld [vmem:[%s141_s0 + $0x8] sm:$0x3] }
   0x3   :  { %23 = vst [vmem:[#allocation0 + $0x28] sm:$0x3] %v83_v2  ;;  %v85_v4 = vld [vmem:[%s141_s0 + $0x6] sm:$0x3]  ;;  %v86_v5 = vld [vmem:[%s141_s0 + $0x4] sm:$0x3] }
   0x4   :  { %28 = vst [vmem:[#allocation0 + $0x20] sm:$0x3] %v84_v3  ;;  %33 = vst [vmem:[#allocation0 + $0x18] sm:$0x3] %v85_v4  ;;  %v87_v6 = vld [vmem:[%s141_s0 + $0x2] sm:$0x3] }
   0x5   :  { %38 = vst [vmem:[#allocation0 + $0x10] sm:$0x3] %v86_v5  ;;  %v43_v7 = vld [vmem:[%s141_s0] sm:$0x3]  ;;  %42 = vst [vmem:[#allocation0 + $0x8] sm:$0x3] %v87_v6 }
   0x6   :  { %44 = vst [vmem:[#allocation0] sm:$0x3] %v43_v7  ;;  %v80_v8 = vld [vmem:[%s141_s0 + $0x10] sm:$0x3]  ;;  %s91_s0 = smov 20  }
   0x7   :  { %8 = vst [vmem:[#allocation0 + $0x40] sm:$0x3] %v80_v8 }
   0xb   :  { %v59_v9 = vld [vmem:[#allocation0 + $0x1] ss:$8 sm:$0xf0]   ;;  %v46_v10 = vld [vmem:[#allocation0] ss:$8 sm:$0xf0]  }
   0xd   :  { %v45_v11 = vld [vmem:[#allocation0] ss:$8 sm:$0xf]   ;;  %v57_v12 = vld [vmem:[#allocation0 + $0x1] ss:$8 sm:$0xf]  }
   0xe   :  { %v61_v13 = vsel %vm47_vm0, %v59_v9, %v57_v12  ;;  %v48_v14 = vsel %vm47_vm0, %v46_v10, %v45_v11  ;;  %v52_v15 = vld [vmem:[#allocation0 + $0x40] sm:$0x1]   ;;  %v67_v16 = vld [vmem:[#allocation0 + $0x41] sm:$0x1]  }
   0xf   :  { %62 = vrot.lane.b32.xlu0 %v61_v13, %s91_s0  ;;  %50 = vst.msk [vmem:[%s142_s1] sm:$0xff] %vm49_vm1, %v48_v14   ;;  %88 = vst.msk [vmem:[%s142_s1 + $0x8] sm:$0x1] %vm49_vm1, %v52_v15  }
  0x13   :  { %68 = vrot.lane.b32.xlu0 %v67_v16, %s91_s0 }
  0x81   :  { %v63_v17 = vpop.permute.xlu0 %62  }
  0x82   :  { %65 = vst.msk [vmem:[%s142_s1] sm:$0xff] %vm64_vm2, %v63_v17  }
  0x85   :  { %v69_v18 = vpop.permute.xlu0 %68  }
  0x86   :  { %89 = vst.msk [vmem:[%s142_s1 + $0x8] sm:$0x1] %vm64_vm2, %v69_v18  }

// kernel: tile.234
= control target key start
LH: loop header
LB: loop body
LE: loop exit
PB: predicated region body
PF: predicated region fallthrough
CT: control target
= control target key end

     0   :  { %vm11_vm0 = vcmask 72704   ;;  %s42_s0 = inlined_call_operand.vmem [shape: f32[9,2,3], index: 0, kind: input, shape index: {}]   ;;  %s43_s1 = inlined_call_operand.vmem [shape: f32[9,6], index: 1, kind: output, shape index: {}]  }
   0x1   :  { %v18_v0 = vld [vmem:[%s42_s0 + $0x4] sm:$0xf]  ;;  %v8_v1 = vld [vmem:[%s42_s0] sm:$0xf] }
   0x2   :  { %7 = vst [vmem:[#allocation0 + $0x8] sm:$0xf] %v18_v0  ;;  %9 = vst [vmem:[#allocation0] sm:$0xf] %v8_v1 }
   0x9   :  { %v10_v2 = vld [vmem:[#allocation0] sm:$0x7]   ;;  %v14_v3 = vld [vmem:[#allocation0 + $0x8] sm:$0x7]  }
   0xa   :  { %12 = vst.msk [vmem:[%s43_s1] sm:$0x7] %vm11_vm0, %v10_v2   ;;  %19 = vst.msk [vmem:[%s43_s1 + $0x3] sm:$0x7] %vm11_vm0, %v14_v3  }

// kernel: micronet_forward.1
= control target key start
LH: loop header
LB: loop body
LE: loop exit
PB: predicated region body
PF: predicated region fallthrough
CT: control target
= control target key end

     0   :  { %v6057_v0 = vmov 0   ;;  %vm1137_vm0 = vcmask 1042432   ;;  %vm1124_vm3 = vcmask 48128   ;;  %vm1489_vm10 = vcmask 523264   ;;  %s7753_s0 = inlined_call_operand.vmem [shape: f32[1,256,6], index: 0, kind: input, shape index: {}]   ;;  %s7754_s3 = inlined_call_operand.vmem [shape: bf16[576,256], index: 3, kind: input, shape index: {}]   ;;  %s7755_s1 = inlined_call_operand.vmem [shape: f32[408,128], index: 1, kind: input, shape index: {}]   ;;  %s7756_s2 = inlined_call_operand.vmem [shape: bf16[21,64,128], index: 2, kind: input, shape index: {}]   ;;  %s7757_s4 = inlined_call_operand.vmem [shape: bf16[128,64], index: 4, kind: input, shape index: {}]   ;;  %s7758_s5 = inlined_call_operand.vmem [shape: bf16[144,64], index: 5, kind: input, shape index: {}]   ;;  %s7759_s6 = inlined_call_operand.vmem [shape: bf16[144,16], index: 6, kind: input, shape index: {}]   ;;  %s7760_s7 = inlined_call_operand.vmem [shape: bf16[36,16], index: 7, kind: input, shape index: {}]   ;;  %s7761_s9 = inlined_call_operand.vmem [shape: f32[1,16,40], index: 9, kind: output, shape index: {1}]   ;;  %s7762_s8 = inlined_call_operand.vmem [shape: f32[1,4,52], index: 8, kind: output, shape index: {0}]  }
   0x1   :  { %512 = vmatprep.subr.bf16.mxu0 %v6057_v0  ;;  %v32_v1 = vld [vmem:[%s7753_s0] sm:$0xff]  ;;  %v33_v2 = vld [vmem:[%s7753_s0 + $0x8] sm:$0xff]  ;;  %v34_v3 = vld [vmem:[%s7753_s0 + $0x10] sm:$0xff] }
   0x2   :  { %v136_v4 = vpack.c.bf16 %v33_v2, %v32_v1  ;;  %v35_v5 = vld [vmem:[%s7753_s0 + $0x18] sm:$0xff]  ;;  %v36_v7 = vld [vmem:[%s7753_s0 + $0x20] sm:$0xff]  ;;  %v37_v8 = vld [vmem:[%s7753_s0 + $0x28] sm:$0xff] }
   0x3   :  { %v137_v6 = vpack.c.bf16 %v35_v5, %v34_v3  ;;  %v138_v9 = vpack.c.bf16 %v37_v8, %v36_v7  ;;  %v38_v10 = vld [vmem:[%s7753_s0 + $0x30] sm:$0xff]  ;;  %v39_v11 = vld [vmem:[%s7753_s0 + $0x38] sm:$0xff]  ;;  %v40_v13 = vld [vmem:[%s7753_s0 + $0x40] sm:$0xff] }
   0x4   :  { %513 = vmatpush1.bf16.msra.mxu0 %v136_v4  ;;  %v139_v12 = vpack.c.bf16 %v39_v11, %v38_v10  ;;  %v5610_v14 = vld [vmem:[%s7754_s3 + $0x4] ss:$8 sps:$4 sm:$0xff]   ;;  %v42_v17 = vld [vmem:[%s7753_s0 + $0x50] sm:$0xff]  ;;  %v43_v18 = vld [vmem:[%s7753_s0 + $0x58] sm:$0xff] }
   0x5   :  { %514 = vmatprep.subr.bf16.mxu0 %v6057_v0  ;;  %v41_v15 = vld [vmem:[%s7753_s0 + $0x48] sm:$0xff]  ;;  %544 = vmatprep.mubr.bf16.mxu0 %v5610_v14  ;;  %v141_v19 = vpack.c.bf16 %v43_v18, %v42_v17  ;;  %v44_v20 = vld [vmem:[%s7753_s0 + $0x60] sm:$0xff]  ;;  %v46_v23 = vld [vmem:[%s7753_s0 + $0x70] sm:$0xff] }
   0x6   :  { %v140_v16 = vpack.c.bf16 %v41_v15, %v40_v13  ;;  %v45_v21 = vld [vmem:[%s7753_s0 + $0x68] sm:$0xff]  ;;  %v47_v24 = vld [vmem:[%s7753_s0 + $0x78] sm:$0xff]  ;;  %v48_v26 = vld [vmem:[%s7753_s0 + $0x80] sm:$0xff] }
   0x7   :  { %v142_v22 = vpack.c.bf16 %v45_v21, %v44_v20  ;;  %v143_v25 = vpack.c.bf16 %v47_v24, %v46_v23  ;;  %v49_v27 = vld [vmem:[%s7753_s0 + $0x88] sm:$0xff]  ;;  %v50_v28 = vld [vmem:[%s7753_s0 + $0x90] sm:$0xff]  ;;  %v51_v29 = vld [vmem:[%s7753_s0 + $0x98] sm:$0xff] }
   0x8   :  { %515 = vmatpush1.bf16.msra.mxu0 %v137_v6  ;;  %v144_v30 = vpack.c.bf16 %v49_v27, %v48_v26  ;;  %v52_v31 = vld [vmem:[%s7753_s0 + $0xa0] sm:$0xff]  ;;  %v145_v32 = vpack.c.bf16 %v51_v29, %v50_v28  ;;  %v53_v33 = vld [vmem:[%s7753_s0 + $0xa8] sm:$0xff]  ;;  %v54_v34 = vld [vmem:[%s7753_s0 + $0xb0] sm:$0xff] }
   0x9   :  { %516 = vmatprep.subr.bf16.mxu0 %v6057_v0  ;;  %v55_v35 = vld [vmem:[%s7753_s0 + $0xb8] sm:$0xff]  ;;  %v146_v36 = vpack.c.bf16 %v53_v33, %v52_v31  ;;  %v56_v38 = vld [vmem:[%s7753_s0 + $0xc0] sm:$0xff]  ;;  %v57_v39 = vld [vmem:[%s7753_s0 + $0xc8] sm:$0xff] }
   0xa   :  { %v147_v37 = vpack.c.bf16 %v55_v35, %v54_v34  ;;  %v148_v40 = vpack.c.bf16 %v57_v39, %v56_v38  ;;  %v58_v41 = vld [vmem:[%s7753_s0 + $0xd0] sm:$0xff]  ;;  %v59_v42 = vld [vmem:[%s7753_s0 + $0xd8] sm:$0xff]  ;;  %v60_v44 = vld [vmem:[%s7753_s0 + $0xe0] sm:$0xff] }
   0xb   :  { %v149_v43 = vpack.c.bf16 %v59_v42, %v58_v41  ;;  %v61_v45 = vld [vmem:[%s7753_s0 + $0xe8] sm:$0xff]  ;;  %v62_v47 = vld [vmem:[%s7753_s0 + $0xf0] sm:$0xff]  ;;  %v63_v48 = vld [vmem:[%s7753_s0 + $0xf8] sm:$0xff] }
   0xc   :  { %517 = vmatpush1.bf16.msra.mxu0 %v138_v9  ;;  %v150_v46 = vpack.c.bf16 %v61_v45, %v60_v44  ;;  %v151_v49 = vpack.c.bf16 %v63_v48, %v62_v47  ;;  %v5608_v50 = vld [vmem:[%s7754_s3] ss:$8 sps:$4 sm:$0xff]   ;;  %v5611_v51 = vld [vmem:[%s7754_s3 + $0x14] ss:$8 sps:$4 sm:$0xff]   ;;  %v5613_v52 = vld [vmem:[%s7754_s3 + $0x10] ss:$8 sps:$4 sm:$0xff]  }
   0xd   :  { %518 = vmatprep.subr.bf16.mxu0 %v6057_v0  ;;  %v5614_v53 = vld [vmem:[%s7754_s3 + $0x24] ss:$8 sps:$4 sm:$0xff]   ;;  %v5616_v54 = vld [vmem:[%s7754_s3 + $0x20] ss:$8 sps:$4 sm:$0xff]   ;;  %v5617_v55 = vld [vmem:[%s7754_s3 + $0x34] ss:$8 sps:$4 sm:$0xff]  }
   0xe   :  { %v5619_v56 = vld [vmem:[%s7754_s3 + $0x30] ss:$8 sps:$4 sm:$0xff]   ;;  %v5620_v57 = vld [vmem:[%s7754_s3 + $0x44] ss:$8 sps:$4 sm:$0xff]   ;;  %v5622_v58 = vld [vmem:[%s7754_s3 + $0x40] ss:$8 sps:$4 sm:$0xff]  }
   0xf   :  { %v5623_v59 = vld [vmem:[%s7754_s3 + $0x54] ss:$8 sps:$4 sm:$0xff]   ;;  %v5625_v60 = vld [vmem:[%s7754_s3 + $0x50] ss:$8 sps:$4 sm:$0xff]   ;;  %v5626_v61 = vld [vmem:[%s7754_s3 + $0x64] ss:$8 sps:$4 sm:$0xff]  }
  0x10   :  { %519 = vmatpush1.bf16.msra.mxu0 %v139_v12  ;;  %v5628_v62 = vld [vmem:[%s7754_s3 + $0x60] ss:$8 sps:$4 sm:$0xff]   ;;  %v5629_v63 = vld [vmem:[%s7754_s3 + $0x74] ss:$8 sps:$4 sm:$0xff]   ;;  %v5632_v1 = vld [vmem:[%s7754_s3 + $0x84] ss:$8 sps:$4 sm:$0xff]  }
  0x11   :  { %520 = vmatprep.subr.bf16.mxu0 %v6057_v0  ;;  %v5634_v2 = vld [vmem:[%s7754_s3 + $0x80] ss:$8 sps:$4 sm:$0xff]   ;;  %v5635_v3 = vld [vmem:[%s7754_s3 + $0x94] ss:$8 sps:$4 sm:$0xff]   ;;  %v5637_v4 = vld [vmem:[%s7754_s3 + $0x90] ss:$8 sps:$4 sm:$0xff]  }
  0x12   :  { %v5638_v5 = vld [vmem:[%s7754_s3 + $0xa4] ss:$8 sps:$4 sm:$0xff]   ;;  %v5640_v6 = vld [vmem:[%s7754_s3 + $0xa0] ss:$8 sps:$4 sm:$0xff]   ;;  %v5641_v7 = vld [vmem:[%s7754_s3 + $0xb4] ss:$8 sps:$4 sm:$0xff]  }
  0x13   :  { %v5643_v8 = vld [vmem:[%s7754_s3 + $0xb0] ss:$8 sps:$4 sm:$0xff]   ;;  %v5644_v9 = vld [vmem:[%s7754_s3 + $0xc4] ss:$8 sps:$4 sm:$0xff]   ;;  %v5646_v10 = vld [vmem:[%s7754_s3 + $0xc0] ss:$8 sps:$4 sm:$0xff]  }
  0x14   :  { %521 = vmatpush1.bf16.msra.mxu0 %v140_v16  ;;  %v5647_v11 = vld [vmem:[%s7754_s3 + $0xd4] ss:$8 sps:$4 sm:$0xff]   ;;  %v5649_v12 = vld [vmem:[%s7754_s3 + $0xd0] ss:$8 sps:$4 sm:$0xff]   ;;  %v5650_v13 = vld [vmem:[%s7754_s3 + $0xe4] ss:$8 sps:$4 sm:$0xff]  }
  0x15   :  { %522 = vmatprep.subr.bf16.mxu0 %v6057_v0  ;;  %v5652_v14 = vld [vmem:[%s7754_s3 + $0xe0] ss:$8 sps:$4 sm:$0xff]   ;;  %v5653_v15 = vld [vmem:[%s7754_s3 + $0xf4] ss:$8 sps:$4 sm:$0xff]   ;;  %v5655_v16 = vld [vmem:[%s7754_s3 + $0xf0] ss:$8 sps:$4 sm:$0xff]  }
  0x16   :  { %v5656_v17 = vld [vmem:[%s7754_s3 + $0x104] ss:$8 sps:$4 sm:$0xff]   ;;  %v5658_v18 = vld [vmem:[%s7754_s3 + $0x100] ss:$8 sps:$4 sm:$0xff]   ;;  %v5661_v20 = vld [vmem:[%s7754_s3 + $0x110] ss:$8 sps:$4 sm:$0xff]  }
  0x17   :  { %v5662_v21 = vld [vmem:[%s7754_s3 + $0x124] ss:$8 sps:$4 sm:$0xff]   ;;  %v5665_v23 = vld [vmem:[%s7754_s3 + $0x134] ss:$8 sps:$4 sm:$0xff]   ;;  %v5667_v24 = vld [vmem:[%s7754_s3 + $0x130] ss:$8 sps:$4 sm:$0xff]  }
  0x18   :  { %523 = vmatpush1.bf16.msra.mxu0 %v141_v19  ;;  %v5659_v19 = vld [vmem:[%s7754_s3 + $0x114] ss:$8 sps:$4 sm:$0xff]   ;;  %v5670_v26 = vld [vmem:[%s7754_s3 + $0x140] ss:$8 sps:$4 sm:$0xff]   ;;  %v5673_v28 = vld [vmem:[%s7754_s3 + $0x150] ss:$8 sps:$4 sm:$0xff]  }
  0x19   :  { %524 = vmatprep.subr.bf16.mxu0 %v6057_v0  ;;  %v5671_v27 = vld [vmem:[%s7754_s3 + $0x154] ss:$8 sps:$4 sm:$0xff]   ;;  %v5674_v29 = vld [vmem:[%s7754_s3 + $0x164] ss:$8 sps:$4 sm:$0xff]   ;;  %v5682_v34 = vld [vmem:[%s7754_s3 + $0x180] ss:$8 sps:$4 sm:$0xff]  }
  0x1a   :  { %v5677_v31 = vld [vmem:[%s7754_s3 + $0x174] ss:$8 sps:$4 sm:$0xff]   ;;  %v5680_v33 = vld [vmem:[%s7754_s3 + $0x184] ss:$8 sps:$4 sm:$0xff]   ;;  %v5688_v38 = vld [vmem:[%s7754_s3 + $0x1a0] ss:$8 sps:$4 sm:$0xff]  }
  0x1b   :  { %v5683_v35 = vld [vmem:[%s7754_s3 + $0x194] ss:$8 sps:$4 sm:$0xff]   ;;  %v5691_v42 = vld [vmem:[%s7754_s3 + $0x1b0] ss:$8 sps:$4 sm:$0xff]   ;;  %v5692_v44 = vld [vmem:[%s7754_s3 + $0x1c4] ss:$8 sps:$4 sm:$0xff]  }
  0x1c   :  { %525 = vmatpush1.bf16.msra.mxu0 %v142_v22  ;;  %v5664_v22 = vld [vmem:[%s7754_s3 + $0x120] ss:$8 sps:$4 sm:$0xff]   ;;  %v5689_v39 = vld [vmem:[%s7754_s3 + $0x1b4] ss:$8 sps:$4 sm:$0xff]  }
  0x1d   :  { %526 = vmatprep.subr.bf16.mxu0 %v6057_v0  ;;  %v5694_v48 = vld [vmem:[%s7754_s3 + $0x1c0] ss:$8 sps:$4 sm:$0xff]  }
  0x20   :  { %527 = vmatpush1.bf16.msra.mxu0 %v143_v25  ;;  %v5668_v25 = vld [vmem:[%s7754_s3 + $0x144] ss:$8 sps:$4 sm:$0xff]  }
  0x21   :  { %528 = vmatprep.subr.bf16.mxu0 %v6057_v0 }
  0x24   :  { %529 = vmatpush1.bf16.msra.mxu0 %v144_v30  ;;  %v5676_v30 = vld [vmem:[%s7754_s3 + $0x160] ss:$8 sps:$4 sm:$0xff]  }
  0x25   :  { %530 = vmatprep.subr.bf16.mxu0 %v6057_v0 }
  0x28   :  { %531 = vmatpush1.bf16.msra.mxu0 %v145_v32  ;;  %v5679_v32 = vld [vmem:[%s7754_s3 + $0x170] ss:$8 sps:$4 sm:$0xff]  }
  0x29   :  { %532 = vmatprep.subr.bf16.mxu0 %v6057_v0 }
  0x2c   :  { %533 = vmatpush1.bf16.msra.mxu0 %v146_v36  ;;  %v5685_v36 = vld [vmem:[%s7754_s3 + $0x190] ss:$8 sps:$4 sm:$0xff]  }
  0x2d   :  { %534 = vmatprep.subr.bf16.mxu0 %v6057_v0 }
  0x30   :  { %535 = vmatpush1.bf16.msra.mxu0 %v147_v37  ;;  %v5686_v37 = vld [vmem:[%s7754_s3 + $0x1a4] ss:$8 sps:$4 sm:$0xff]  }
  0x31   :  { %536 = vmatprep.subr.bf16.mxu0 %v6057_v0 }
  0x34   :  { %537 = vmatpush1.bf16.msra.mxu0 %v148_v40 }
  0x35   :  { %538 = vmatprep.subr.bf16.mxu0 %v6057_v0 }
  0x38   :  { %539 = vmatpush1.bf16.msra.mxu0 %v149_v43 }
  0x39   :  { %540 = vmatprep.subr.bf16.mxu0 %v6057_v0 }
  0x3c   :  { %541 = vmatpush1.bf16.msra.mxu0 %v150_v46 }
  0x3d   :  { %542 = vmatprep.subr.bf16.mxu0 %v6057_v0  ;;  %v5631_v0 = vld [vmem:[%s7754_s3 + $0x70] ss:$8 sps:$4 sm:$0xff]  }
  0x40   :  { %543 = vmatpush1.bf16.msra.mxu0 %v151_v49 }
  0x43   :  { %545 = vmatmul.mubr.bf16.vlgmr.msra.gmra.mrb[0].mxu0 %v5608_v50  ;;  %v5695_v50 = vld [vmem:[%s7754_s3 + $0x1d4] ss:$8 sps:$4 sm:$0xff]  }
  0x44   :  { %552 = vmatprep.mubr.bf16.mxu0 %v5611_v51 }
  0x4b   :  { %553 = vmatmul.mubr.bf16.gmra.mrb[4].mxu0 %v5613_v52 }
  0x4c   :  { %560 = vmatprep.mubr.bf16.mxu0 %v5614_v53  ;;  %v835_v53 = vlaneseq }
  0x53   :  { %561 = vmatmul.mubr.bf16.gmra.mrb[8].mxu0 %v5616_v54 }
  0x54   :  { %568 = vmatprep.mubr.bf16.mxu0 %v5617_v55  ;;  %v5697_v55 = vld [vmem:[%s7754_s3 + $0x1d0] ss:$8 sps:$4 sm:$0xff]  }
  0x5b   :  { %569 = vmatmul.mubr.bf16.gmra.mrb[12].mxu0 %v5619_v56 }
  0x5c   :  { %576 = vmatprep.mubr.bf16.mxu0 %v5620_v57  ;;  %v5698_v57 = vld [vmem:[%s7754_s3 + $0x1e4] ss:$8 sps:$4 sm:$0xff]  }
  0x63   :  { %577 = vmatmul.mubr.bf16.gmra.mrb[16].mxu0 %v5622_v58 }
  0x64   :  { %584 = vmatprep.mubr.bf16.mxu0 %v5623_v59  ;;  %v6405_v59 = vshrl.u32 %v835_v53, 7 }
  0x6b   :  { %585 = vmatmul.mubr.bf16.gmra.mrb[20].mxu0 %v5625_v60 }
  0x6c   :  { %592 = vmatprep.mubr.bf16.mxu0 %v5626_v61  ;;  %v6408_v61 = vsub.s32 0, %v6405_v59 }
  0x73   :  { %593 = vmatmul.mubr.bf16.gmra.mrb[24].mxu0 %v5628_v62 }
  0x74   :  { %600 = vmatprep.mubr.bf16.mxu0 %v5629_v63  ;;  %v5700_v63 = vld [vmem:[%s7754_s3 + $0x1e0] ss:$8 sps:$4 sm:$0xff]  }
  0x7b   :  { %601 = vmatmul.mubr.bf16.gmra.mrb[28].mxu0 %v5631_v0  ;;  %v6414_v0 = vsub.s32 1, %v6405_v59 }
  0x7c   :  { %608 = vmatprep.mubr.bf16.mxu0 %v5632_v1  ;;  %v6419_v1 = vld [vmem:[%s7755_s1] sm:$0xff] }
  0x83   :  { %609 = vmatmul.mubr.bf16.gmra.mrb[32].mxu0 %v5634_v2 }
  0x84   :  { %616 = vmatprep.mubr.bf16.mxu0 %v5635_v3  ;;  %v5701_v3 = vld [vmem:[%s7754_s3 + $0x1f4] ss:$8 sps:$4 sm:$0xff]  }
  0x8b   :  { %617 = vmatmul.mubr.bf16.gmra.mrb[36].mxu0 %v5637_v4 }
  0x8c   :  { %624 = vmatprep.mubr.bf16.mxu0 %v5638_v5  ;;  %v838_v5 = vrot.slane %v6419_v1, %v6408_v61 }
  0x93   :  { %625 = vmatmul.mubr.bf16.gmra.mrb[40].mxu0 %v5640_v6  ;;  %v850_v6 = vrot.slane %v6419_v1, %v6414_v0 }
  0x94   :  { %632 = vmatprep.mubr.bf16.mxu0 %v5641_v7 }
  0x9b   :  { %633 = vmatmul.mubr.bf16.gmra.mrb[44].mxu0 %v5643_v8 }
  0x9c   :  { %640 = vmatprep.mubr.bf16.mxu0 %v5644_v9 }
  0xa3   :  { %641 = vmatmul.mubr.bf16.gmra.mrb[48].mxu0 %v5646_v10 }
  0xa4   :  { %648 = vmatprep.mubr.bf16.mxu0 %v5647_v11  ;;  %v5703_v11 = vld [vmem:[%s7754_s3 + $0x1f0] ss:$8 sps:$4 sm:$0xff]  }
  0xab   :  { %649 = vmatmul.mubr.bf16.gmra.mrb[52].mxu0 %v5649_v12 }
  0xac   :  { %656 = vmatprep.mubr.bf16.mxu0 %v5650_v13  ;;  %v5704_v13 = vld [vmem:[%s7754_s3 + $0x204] ss:$8 sps:$4 sm:$0xff]  }
  0xb3   :  { %657 = vmatmul.mubr.bf16.gmra.mrb[56].mxu0 %v5652_v14 }
  0xb4   :  { %664 = vmatprep.mubr.bf16.mxu0 %v5653_v15 }
  0xbb   :  { %665 = vmatmul.mubr.bf16.gmra.mrb[60].mxu0 %v5655_v16 }
  0xbc   :  { %672 = vmatprep.mubr.bf16.mxu0 %v5656_v17 }
  0xc3   :  { %673 = vmatmul.mubr.bf16.gmra.mrb[64].mxu0 %v5658_v18 }
  0xc4   :  { %680 = vmatprep.mubr.bf16.mxu0 %v5659_v19 }
  0xcb   :  { %681 = vmatmul.mubr.bf16.gmra.mrb[68].mxu0 %v5661_v20 }
  0xcc   :  { %688 = vmatprep.mubr.bf16.mxu0 %v5662_v21 }
  0xd3   :  { %689 = vmatmul.mubr.bf16.gmra.mrb[72].mxu0 %v5664_v22 }
  0xd4   :  { %696 = vmatprep.mubr.bf16.mxu0 %v5665_v23  ;;  %v5706_v23 = vld [vmem:[%s7754_s3 + $0x200] ss:$8 sps:$4 sm:$0xff]  }
  0xdb   :  { %697 = vmatmul.mubr.bf16.gmra.mrb[76].mxu0 %v5667_v24 }
  0xdc   :  { %704 = vmatprep.mubr.bf16.mxu0 %v5668_v25  ;;  %v5707_v25 = vld [vmem:[%s7754_s3 + $0x214] ss:$8 sps:$4 sm:$0xff]  }
  0xe3   :  { %705 = vmatmul.mubr.bf16.gmra.mrb[80].mxu0 %v5670_v26 }
  0xe4   :  { %712 = vmatprep.mubr.bf16.mxu0 %v5671_v27 }
  0xeb   :  { %713 = vmatmul.mubr.bf16.gmra.mrb[84].mxu0 %v5673_v28 }
  0xec   :  { %720 = vmatprep.mubr.bf16.mxu0 %v5674_v29 }
  0xf3   :  { %721 = vmatmul.mubr.bf16.gmra.mrb[88].mxu0 %v5676_v30 }
  0xf4   :  { %728 = vmatprep.mubr.bf16.mxu0 %v5677_v31 }
  0xfb   :  { %729 = vmatmul.mubr.bf16.gmra.mrb[92].mxu0 %v5679_v32 }
  0xfc   :  { %736 = vmatprep.mubr.bf16.mxu0 %v5680_v33 }
 0x103   :  { %737 = vmatmul.mubr.bf16.gmra.mrb[96].mxu0 %v5682_v34 }
 0x104   :  { %744 = vmatprep.mubr.bf16.mxu0 %v5683_v35  ;;  %v5709_v35 = vld [vmem:[%s7754_s3 + $0x210] ss:$8 sps:$4 sm:$0xff]  }
 0x10b   :  { %745 = vmatmul.mubr.bf16.gmra.mrb[100].mxu0 %v5685_v36 }
 0x10c   :  { %752 = vmatprep.mubr.bf16.mxu0 %v5686_v37  ;;  %v5710_v37 = vld [vmem:[%s7754_s3 + $0x224] ss:$8 sps:$4 sm:$0xff]  }
 0x113   :  { %753 = vmatmul.mubr.bf16.gmra.mrb[104].mxu0 %v5688_v38 }
 0x114   :  { %760 = vmatprep.mubr.bf16.mxu0 %v5689_v39 }
 0x116   :  { %v546_v40 = vpop.f32.mrb[0].mxu0 }
 0x117   :  { %v548_v41 = vpop.f32.mrb[1].mxu0  ;;  %v839_v8 = vmul.f32 %v838_v5, %v546_v40 }
 0x118   :  { %v549_v43 = vpop.f32.mrb[2].mxu0 }
 0x119   :  { %v551_v45 = vpop.f32.mrb[3].mxu0  ;;  %v840_v14 = vmul.f32 %v838_v5, %v549_v43 }
 0x11b   :  { %761 = vmatmul.mubr.bf16.gmra.mrb[108].mxu0 %v5691_v42 }
 0x11c   :  { %768 = vmatprep.mubr.bf16.mxu0 %v5692_v44 }
 0x11e   :  { %v554_v46 = vpop.f32.mrb[4].mxu0 }
 0x11f   :  { %v556_v47 = vpop.f32.mrb[5].mxu0  ;;  %v841_v20 = vmul.f32 %v838_v5, %v554_v46 }
 0x120   :  { %v557_v49 = vpop.f32.mrb[6].mxu0  ;;  %v5712_v47 = vld [vmem:[%s7754_s3 + $0x220] ss:$8 sps:$4 sm:$0xff]  }
 0x121   :  { %v559_v51 = vpop.f32.mrb[7].mxu0  ;;  %v842_v26 = vmul.f32 %v838_v5, %v557_v49 }
 0x123   :  { %769 = vmatmul.mubr.bf16.gmra.mrb[112].mxu0 %v5694_v48  ;;  %v6450_v48 = vsub.s32 2, %v6405_v59 }
 0x124   :  { %776 = vmatprep.mubr.bf16.mxu0 %v5695_v50  ;;  %v5713_v50 = vld [vmem:[%s7754_s3 + $0x234] ss:$8 sps:$4 sm:$0xff]  }
 0x126   :  { %v562_v52 = vpop.f32.mrb[8].mxu0 }
 0x127   :  { %v564_v54 = vpop.f32.mrb[9].mxu0  ;;  %v843_v32 = vmul.f32 %v838_v5, %v562_v52 }
 0x128   :  { %v565_v56 = vpop.f32.mrb[10].mxu0 }
 0x129   :  { %v567_v58 = vpop.f32.mrb[11].mxu0  ;;  %v844_v38 = vmul.f32 %v838_v5, %v565_v56  ;;  %v870_v56 = vrot.slane %v6419_v1, %v6450_v48 }
 0x12b   :  { %777 = vmatmul.mubr.bf16.gmra.mrb[116].mxu0 %v5697_v55 }
 0x12c   :  { %784 = vmatprep.mubr.bf16.mxu0 %v5698_v57 }
 0x12e   :  { %v570_v60 = vpop.f32.mrb[12].mxu0 }
 0x12f   :  { %v572_v62 = vpop.f32.mrb[13].mxu0  ;;  %v845_v44 = vmul.f32 %v838_v5, %v570_v60 }
 0x130   :  { %v573_v2 = vpop.f32.mrb[14].mxu0  ;;  %v5715_v62 = vld [vmem:[%s7754_s3 + $0x230] ss:$8 sps:$4 sm:$0xff]  }
 0x131   :  { %v575_v4 = vpop.f32.mrb[15].mxu0  ;;  %v846_v51 = vmul.f32 %v838_v5, %v573_v2 }
 0x133   :  { %785 = vmatmul.mubr.bf16.gmra.mrb[120].mxu0 %v5700_v63 }
 0x134   :  { %792 = vmatprep.mubr.bf16.mxu0 %v5701_v3 }
 0x136   :  { %v578_v7 = vpop.f32.mrb[16].mxu0 }
 0x137   :  { %v851_v9 = vmul.f32 %v850_v6, %v578_v7  ;;  %v580_v10 = vpop.f32.mrb[17].mxu0 }
 0x138   :  { %v581_v12 = vpop.f32.mrb[18].mxu0 }
 0x139   :  { %v859_v15 = vadd.f32 %v851_v9, %v839_v8  ;;  %v852_v16 = vmul.f32 %v850_v6, %v581_v12  ;;  %v583_v17 = vpop.f32.mrb[19].mxu0 }
 0x13b   :  { %v860_v18 = vadd.f32 %v852_v16, %v840_v14  ;;  %793 = vmatmul.mubr.bf16.gmra.mrb[124].mxu0 %v5703_v11 }
 0x13c   :  { %800 = vmatprep.mubr.bf16.mxu0 %v5704_v13 }
 0x13e   :  { %v586_v19 = vpop.f32.mrb[20].mxu0 }
 0x13f   :  { %v853_v21 = vmul.f32 %v850_v6, %v586_v19  ;;  %v588_v22 = vpop.f32.mrb[21].mxu0 }
 0x140   :  { %v589_v24 = vpop.f32.mrb[22].mxu0 }
 0x141   :  { %v861_v27 = vadd.f32 %v853_v21, %v841_v20  ;;  %v854_v28 = vmul.f32 %v850_v6, %v589_v24  ;;  %v591_v29 = vpop.f32.mrb[23].mxu0 }
 0x143   :  { %v862_v30 = vadd.f32 %v854_v28, %v842_v26  ;;  %801 = vmatmul.mubr.bf16.gmra.mrb[128].mxu0 %v5706_v23 }
 0x144   :  { %808 = vmatprep.mubr.bf16.mxu0 %v5707_v25  ;;  %v6461_v25 = vsub.s32 3, %v6405_v59 }
 0x146   :  { %v594_v31 = vpop.f32.mrb[24].mxu0 }
 0x147   :  { %v855_v33 = vmul.f32 %v850_v6, %v594_v31  ;;  %v596_v34 = vpop.f32.mrb[25].mxu0 }
 0x148   :  { %v597_v36 = vpop.f32.mrb[26].mxu0 }
 0x149   :  { %v863_v39 = vadd.f32 %v855_v33, %v843_v32  ;;  %v856_v40 = vmul.f32 %v850_v6, %v597_v36  ;;  %v599_v41 = vpop.f32.mrb[27].mxu0 }
 0x14b   :  { %v864_v42 = vadd.f32 %v856_v40, %v844_v38  ;;  %809 = vmatmul.mubr.bf16.gmra.mrb[132].mxu0 %v5709_v35 }
 0x14c   :  { %816 = vmatprep.mubr.bf16.mxu0 %v5710_v37 }
 0x14e   :  { %v602_v43 = vpop.f32.mrb[28].mxu0 }
 0x14f   :  { %v857_v45 = vmul.f32 %v850_v6, %v602_v43  ;;  %v604_v46 = vpop.f32.mrb[29].mxu0 }
 0x150   :  { %v605_v49 = vpop.f32.mrb[30].mxu0 }
 0x151   :  { %v865_v52 = vadd.f32 %v857_v45, %v845_v44  ;;  %v858_v53 = vmul.f32 %v850_v6, %v605_v49  ;;  %v607_v54 = vpop.f32.mrb[31].mxu0 }
 0x153   :  { %v866_v55 = vadd.f32 %v858_v53, %v846_v51  ;;  %817 = vmatmul.mubr.bf16.gmra.mrb[136].mxu0 %v5712_v47 }
 0x154   :  { %824 = vmatprep.mubr.bf16.mxu0 %v5713_v50 }
 0x156   :  { %v610_v57 = vpop.f32.mrb[32].mxu0 }
 0x157   :  { %v871_v58 = vmul.f32 %v870_v56, %v610_v57  ;;  %v612_v60 = vpop.f32.mrb[33].mxu0 }
 0x158   :  { %v613_v63 = vpop.f32.mrb[34].mxu0 }
 0x159   :  { %v879_v3 = vadd.f32 %v871_v58, %v859_v15  ;;  %v872_v4 = vmul.f32 %v870_v56, %v613_v63  ;;  %v615_v2 = vpop.f32.mrb[35].mxu0 }
 0x15b   :  { %v880_v5 = vadd.f32 %v872_v4, %v860_v18  ;;  %825 = vmatmul.mubr.bf16.gmra.mrb[140].mxu0 %v5715_v62  ;;  %v6466_v62 = vsub.s32 4, %v6405_v59 }
 0x15e   :  { %v618_v6 = vpop.f32.mrb[36].mxu0 }
 0x15f   :  { %v873_v7 = vmul.f32 %v870_v56, %v618_v6  ;;  %v620_v8 = vpop.f32.mrb[37].mxu0  ;;  %v910_v6 = vrot.slane %v6419_v1, %v6466_v62 }
 0x160   :  { %v621_v9 = vpop.f32.mrb[38].mxu0 }
 0x161   :  { %v881_v10 = vadd.f32 %v873_v7, %v861_v27  ;;  %v874_v11 = vmul.f32 %v870_v56, %v621_v9  ;;  %v623_v12 = vpop.f32.mrb[39].mxu0 }
 0x163   :  { %v882_v13 = vadd.f32 %v874_v11, %v862_v30  ;;  %v890_v30 = vrot.slane %v6419_v1, %v6461_v25 }
 0x166   :  { %v626_v14 = vpop.f32.mrb[40].mxu0 }
 0x167   :  { %v875_v16 = vmul.f32 %v870_v56, %v626_v14  ;;  %v628_v17 = vpop.f32.mrb[41].mxu0 }
 0x168   :  { %v629_v19 = vpop.f32.mrb[42].mxu0 }
 0x169   :  { %v883_v20 = vadd.f32 %v875_v16, %v863_v39  ;;  %v876_v21 = vmul.f32 %v870_v56, %v629_v19  ;;  %v631_v22 = vpop.f32.mrb[43].mxu0 }
 0x16b   :  { %v884_v15 = vadd.f32 %v876_v21, %v864_v42 }
 0x16e   :  { %v634_v23 = vpop.f32.mrb[44].mxu0 }
 0x16f   :  { %v877_v24 = vmul.f32 %v870_v56, %v634_v23  ;;  %v636_v18 = vpop.f32.mrb[45].mxu0 }
 0x170   :  { %v637_v26 = vpop.f32.mrb[46].mxu0 }
 0x171   :  { %v885_v28 = vadd.f32 %v877_v24, %v865_v52  ;;  %v878_v27 = vmul.f32 %v870_v56, %v637_v26  ;;  %v639_v29 = vpop.f32.mrb[47].mxu0 }
 0x173   :  { %v886_v31 = vadd.f32 %v878_v27, %v866_v55 }
 0x176   :  { %v642_v32 = vpop.f32.mrb[48].mxu0 }
 0x177   :  { %v891_v33 = vmul.f32 %v890_v30, %v642_v32  ;;  %v644_v34 = vpop.f32.mrb[49].mxu0 }
 0x178   :  { %v645_v35 = vpop.f32.mrb[50].mxu0 }
 0x179   :  { %v899_v36 = vadd.f32 %v891_v33, %v879_v3  ;;  %v892_v37 = vmul.f32 %v890_v30, %v645_v35  ;;  %v647_v38 = vpop.f32.mrb[51].mxu0  ;;  %v6492_v35 = vsub.s32 5, %v6405_v59 }
 0x17b   :  { %v900_v39 = vadd.f32 %v892_v37, %v880_v5 }
 0x17e   :  { %v650_v40 = vpop.f32.mrb[52].mxu0 }
 0x17f   :  { %v893_v41 = vmul.f32 %v890_v30, %v650_v40  ;;  %v652_v42 = vpop.f32.mrb[53].mxu0 }
 0x180   :  { %v653_v43 = vpop.f32.mrb[54].mxu0 }
 0x181   :  { %v901_v44 = vadd.f32 %v893_v41, %v881_v10  ;;  %v894_v45 = vmul.f32 %v890_v30, %v653_v43  ;;  %v655_v46 = vpop.f32.mrb[55].mxu0  ;;  %v930_v41 = vrot.slane %v6419_v1, %v6492_v35 }
 0x183   :  { %v902_v47 = vadd.f32 %v894_v45, %v882_v13 }
 0x186   :  { %v658_v49 = vpop.f32.mrb[56].mxu0 }
 0x187   :  { %v895_v50 = vmul.f32 %v890_v30, %v658_v49  ;;  %v660_v51 = vpop.f32.mrb[57].mxu0 }
 0x188   :  { %v661_v52 = vpop.f32.mrb[58].mxu0 }
 0x189   :  { %v903_v53 = vadd.f32 %v895_v50, %v883_v20  ;;  %v896_v54 = vmul.f32 %v890_v30, %v661_v52  ;;  %v663_v55 = vpop.f32.mrb[59].mxu0 }
 0x18b   :  { %v904_v56 = vadd.f32 %v896_v54, %v884_v15 }
 0x18e   :  { %v666_v57 = vpop.f32.mrb[60].mxu0 }
 0x18f   :  { %v897_v58 = vmul.f32 %v890_v30, %v666_v57  ;;  %v668_v60 = vpop.f32.mrb[61].mxu0 }
 0x190   :  { %v669_v63 = vpop.f32.mrb[62].mxu0 }
 0x191   :  { %v905_v3 = vadd.f32 %v897_v58, %v885_v28  ;;  %v898_v4 = vmul.f32 %v890_v30, %v669_v63  ;;  %v671_v2 = vpop.f32.mrb[63].mxu0 }
 0x193   :  { %v906_v5 = vadd.f32 %v898_v4, %v886_v31 }
 0x196   :  { %v6470_v7 = vpop.f32.mrb[64].mxu0 }
 0x197   :  { %v911_v8 = vmul.f32 %v910_v6, %v6470_v7  ;;  %v676_v9 = vpop.f32.mrb[65].mxu0 }
 0x198   :  { %v6473_v10 = vpop.f32.mrb[66].mxu0 }
 0x199   :  { %v919_v11 = vadd.f32 %v911_v8, %v899_v36  ;;  %v912_v12 = vmul.f32 %v910_v6, %v6473_v10  ;;  %v679_v13 = vpop.f32.mrb[67].mxu0 }
 0x19b   :  { %v920_v14 = vadd.f32 %v912_v12, %v900_v39 }
 0x19e   :  { %v6476_v16 = vpop.f32.mrb[68].mxu0 }
 0x19f   :  { %v913_v17 = vmul.f32 %v910_v6, %v6476_v16  ;;  %v684_v19 = vpop.f32.mrb[69].mxu0 }
 0x1a0   :  { %v6479_v20 = vpop.f32.mrb[70].mxu0 }
 0x1a1   :  { %v921_v21 = vadd.f32 %v913_v17, %v901_v44  ;;  %v914_v22 = vmul.f32 %v910_v6, %v6479_v20  ;;  %v687_v15 = vpop.f32.mrb[71].mxu0  ;;  %v4759_v17 = vld [vmem:[%s7756_s2 + $0x20] sm:$0x7] }
 0x1a2   :  { %5601 = vmatprep.subr.msk.bf16.mxu1 %vm1137_vm0, %v4759_v17 }
 0x1a3   :  { %v922_v23 = vadd.f32 %v914_v22, %v902_v47 }
 0x1a6   :  { %v6482_v24 = vpop.f32.mrb[72].mxu0 }
 0x1a7   :  { %v915_v18 = vmul.f32 %v910_v6, %v6482_v24  ;;  %v692_v26 = vpop.f32.mrb[73].mxu0 }
 0x1a8   :  { %v6485_v28 = vpop.f32.mrb[74].mxu0  ;;  %v6540_v26 = vsub.s32 6, %v6405_v59 }
 0x1a9   :  { %v923_v27 = vadd.f32 %v915_v18, %v903_v53  ;;  %v916_v29 = vmul.f32 %v910_v6, %v6485_v28  ;;  %v695_v31 = vpop.f32.mrb[75].mxu0 }
 0x1ab   :  { %v924_v30 = vadd.f32 %v916_v29, %v904_v56 }
 0x1ae   :  { %v6488_v32 = vpop.f32.mrb[76].mxu0 }
 0x1af   :  { %v917_v33 = vmul.f32 %v910_v6, %v6488_v32  ;;  %v700_v34 = vpop.f32.mrb[77].mxu0 }
 0x1b0   :  { %v6494_v36 = vpop.f32.mrb[78].mxu0 }
 0x1b1   :  { %v925_v37 = vadd.f32 %v917_v33, %v905_v3  ;;  %v918_v38 = vmul.f32 %v910_v6, %v6494_v36  ;;  %v703_v39 = vpop.f32.mrb[79].mxu0 }
 0x1b3   :  { %v926_v40 = vadd.f32 %v918_v38, %v906_v5  ;;  %v950_v38 = vrot.slane %v6419_v1, %v6540_v26 }
 0x1b6   :  { %v6499_v42 = vpop.f32.mrb[80].mxu0 }
 0x1b7   :  { %v931_v43 = vmul.f32 %v930_v41, %v6499_v42  ;;  %v1206_v44 = vmax.f32 %v6470_v7, %v6499_v42  ;;  %v708_v45 = vpop.f32.mrb[81].mxu0 }
 0x1b8   :  { %v6504_v46 = vpop.f32.mrb[82].mxu0 }
 0x1b9   :  { %v939_v47 = vadd.f32 %v931_v43, %v919_v11  ;;  %v932_v49 = vmul.f32 %v930_v41, %v6504_v46  ;;  %v1207_v50 = vmax.f32 %v6473_v10, %v6504_v46  ;;  %v711_v51 = vpop.f32.mrb[83].mxu0  ;;  %v1230_v43 = vld [vmem:[%s7756_s2] sm:$0x7] }
 0x1bb   :  { %v940_v52 = vadd.f32 %v932_v49, %v920_v14 }
 0x1be   :  { %v6509_v53 = vpop.f32.mrb[84].mxu0 }
 0x1bf   :  { %v933_v54 = vmul.f32 %v930_v41, %v6509_v53  ;;  %v1208_v55 = vmax.f32 %v6476_v16, %v6509_v53  ;;  %v716_v56 = vpop.f32.mrb[85].mxu0 }
 0x1c0   :  { %v6514_v57 = vpop.f32.mrb[86].mxu0 }
 0x1c1   :  { %v941_v58 = vadd.f32 %v933_v54, %v921_v21  ;;  %v934_v60 = vmul.f32 %v930_v41, %v6514_v57  ;;  %v1209_v63 = vmax.f32 %v6479_v20, %v6514_v57  ;;  %v719_v3 = vpop.f32.mrb[87].mxu0  ;;  %v1139_v21 = vsel %vm1137_vm0, %v4759_v17, 0 }
 0x1c2   :  { %5193 = vmatpush3.bf16.msra.mxu1 %v1139_v21 }
 0x1c3   :  { %v942_v4 = vadd.f32 %v934_v60, %v922_v23  ;;  %5602 = vmatprep.subr.msk.bf16.mxu1 %vm1137_vm0, %v1230_v43 }
 0x1c6   :  { %v6519_v2 = vpop.f32.mrb[88].mxu0 }
 0x1c7   :  { %v935_v5 = vmul.f32 %v930_v41, %v6519_v2  ;;  %v1210_v6 = vmax.f32 %v6482_v24, %v6519_v2  ;;  %v724_v8 = vpop.f32.mrb[89].mxu0 }
 0x1c8   :  { %v6524_v9 = vpop.f32.mrb[90].mxu0 }
 0x1c9   :  { %v943_v11 = vadd.f32 %v935_v5, %v923_v27  ;;  %v936_v12 = vmul.f32 %v930_v41, %v6524_v9  ;;  %v1211_v13 = vmax.f32 %v6485_v28, %v6524_v9  ;;  %v727_v14 = vpop.f32.mrb[91].mxu0 }
 0x1cb   :  { %v944_v19 = vadd.f32 %v936_v12, %v924_v30 }
 0x1ce   :  { %v6534_v22 = vpop.f32.mrb[92].mxu0 }
 0x1cf   :  { %v937_v15 = vmul.f32 %v930_v41, %v6534_v22  ;;  %v1212_v23 = vmax.f32 %v6488_v32, %v6534_v22  ;;  %v732_v18 = vpop.f32.mrb[93].mxu0 }
 0x1d0   :  { %v6542_v27 = vpop.f32.mrb[94].mxu0 }
 0x1d1   :  { %v945_v29 = vadd.f32 %v937_v15, %v925_v37  ;;  %v938_v31 = vmul.f32 %v930_v41, %v6542_v27  ;;  %v735_v33 = vpop.f32.mrb[95].mxu0  ;;  %v6554_v37 = vsel %vm1137_vm0, %v1230_v43, 0  ;;  %v7763_v28 = vmax.f32 %v6494_v36, %v6542_v27 }
 0x1d3   :  { %v946_v34 = vadd.f32 %v938_v31, %v926_v40 }
 0x1d6   :  { %v738_v39 = vpop.f32.mrb[96].mxu0 }
 0x1d7   :  { %v951_v45 = vmul.f32 %v950_v38, %v738_v39  ;;  %v740_v49 = vpop.f32.mrb[97].mxu0 }
 0x1d8   :  { %v741_v41 = vpop.f32.mrb[98].mxu0 }
 0x1d9   :  { %v959_v51 = vadd.f32 %v951_v45, %v939_v47  ;;  %v952_v54 = vmul.f32 %v950_v38, %v741_v41  ;;  %v743_v56 = vpop.f32.mrb[99].mxu0 }
 0x1db   :  { %v960_v40 = vadd.f32 %v952_v54, %v940_v52  ;;  %v6557_v52 = vsub.s32 7, %v6405_v59 }
 0x1de   :  { %v746_v60 = vpop.f32.mrb[100].mxu0 }
 0x1df   :  { %v953_v3 = vmul.f32 %v950_v38, %v746_v60  ;;  %v748_v5 = vpop.f32.mrb[101].mxu0 }
 0x1e0   :  { %v749_v8 = vpop.f32.mrb[102].mxu0 }
 0x1e1   :  { %v961_v12 = vadd.f32 %v953_v3, %v941_v58  ;;  %v954_v14 = vmul.f32 %v950_v38, %v749_v8  ;;  %v751_v17 = vpop.f32.mrb[103].mxu0 }
 0x1e3   :  { %v962_v21 = vadd.f32 %v954_v14, %v942_v4  ;;  %v970_v4 = vrot.slane %v6419_v1, %v6557_v52 }
 0x1e6   :  { %v754_v15 = vpop.f32.mrb[104].mxu0 }
 0x1e7   :  { %v955_v18 = vmul.f32 %v950_v38, %v754_v15  ;;  %v756_v31 = vpop.f32.mrb[105].mxu0 }
 0x1e8   :  { %v757_v33 = vpop.f32.mrb[106].mxu0 }
 0x1e9   :  { %v963_v39 = vadd.f32 %v955_v18, %v943_v11  ;;  %v956_v43 = vmul.f32 %v950_v38, %v757_v33  ;;  %v759_v49 = vpop.f32.mrb[107].mxu0 }
 0x1eb   :  { %v964_v30 = vadd.f32 %v956_v43, %v944_v19 }
 0x1ee   :  { %v762_v47 = vpop.f32.mrb[108].mxu0 }
 0x1ef   :  { %v957_v45 = vmul.f32 %v950_v38, %v762_v47  ;;  %v764_v41 = vpop.f32.mrb[109].mxu0  ;;  %v6606_v47 = vld [vmem:[%s7755_s1 + $0x8] ss:$0 sm:$0xff] }
 0x1f0   :  { %v765_v54 = vpop.f32.mrb[110].mxu0  ;;  %v6612_v41 = vld [vmem:[%s7755_s1 + $0x10] ss:$0 sm:$0xff] }
 0x1f1   :  { %v965_v56 = vadd.f32 %v957_v45, %v945_v29  ;;  %v958_v58 = vmul.f32 %v950_v38, %v765_v54  ;;  %v767_v60 = vpop.f32.mrb[111].mxu0 }
 0x1f2   :  { %v6618_v60 = vld [vmem:[%s7755_s1 + $0x18] ss:$0 sm:$0xff] }
 0x1f3   :  { %v966_v3 = vadd.f32 %v958_v58, %v946_v34 }
 0x1f6   :  { %v770_v5 = vpop.f32.mrb[112].mxu0 }
 0x1f7   :  { %v971_v8 = vmul.f32 %v970_v4, %v770_v5  ;;  %v1214_v11 = vmax.f32 %v1206_v44, %v770_v5  ;;  %v772_v19 = vpop.f32.mrb[113].mxu0 }
 0x1f8   :  { %v773_v14 = vpop.f32.mrb[114].mxu0 }
 0x1f9   :  { %v979_v17 = vadd.f32 %v971_v8, %v959_v51  ;;  %v972_v15 = vmul.f32 %v970_v4, %v773_v14  ;;  %v1215_v59 = vmax.f32 %v1207_v50, %v773_v14  ;;  %v775_v29 = vpop.f32.mrb[115].mxu0 }
 0x1fb   :  { %v980_v38 = vadd.f32 %v972_v15, %v960_v40 }
 0x1fe   :  { %v778_v34 = vpop.f32.mrb[116].mxu0 }
 0x1ff   :  { %v973_v18 = vmul.f32 %v970_v4, %v778_v34  ;;  %v6570_v1 = vmax.f32 %v1208_v55, %v778_v34  ;;  %v780_v31 = vpop.f32.mrb[117].mxu0 }
 0x200   :  { %v781_v7 = vpop.f32.mrb[118].mxu0 }
 0x201   :  { %v981_v42 = vadd.f32 %v973_v18, %v961_v12  ;;  %v974_v44 = vmul.f32 %v970_v4, %v781_v7  ;;  %v1217_v51 = vmax.f32 %v1209_v63, %v781_v7  ;;  %v783_v33 = vpop.f32.mrb[119].mxu0 }
 0x203   :  { %v982_v10 = vadd.f32 %v974_v44, %v962_v21 }
 0x206   :  { %v786_v46 = vpop.f32.mrb[120].mxu0 }
 0x207   :  { %v975_v50 = vmul.f32 %v970_v4, %v786_v46  ;;  %v6578_v40 = vmax.f32 %v1210_v6, %v786_v46  ;;  %v788_v16 = vpop.f32.mrb[121].mxu0 }
 0x208   :  { %v789_v53 = vpop.f32.mrb[122].mxu0 }
 0x209   :  { %v6580_v55 = vadd.f32 %v975_v50, %v963_v39  ;;  %v976_v43 = vmul.f32 %v970_v4, %v789_v53  ;;  %v6585_v12 = vmax.f32 %v1211_v13, %v789_v53  ;;  %v791_v20 = vpop.f32.mrb[123].mxu0 }
 0x20b   :  { %v6587_v57 = vadd.f32 %v976_v43, %v964_v30 }
 0x20e   :  { %v794_v63 = vpop.f32.mrb[124].mxu0 }
 0x20f   :  { %v977_v21 = vmul.f32 %v970_v4, %v794_v63  ;;  %v6592_v24 = vmax.f32 %v1212_v23, %v794_v63  ;;  %v796_v2 = vpop.f32.mrb[125].mxu0 }
 0x210   :  { %v797_v6 = vpop.f32.mrb[126].mxu0 }
 0x211   :  { %v6594_v39 = vadd.f32 %v977_v21, %v965_v56  ;;  %v978_v49 = vmul.f32 %v970_v4, %v797_v6  ;;  %v6599_v9 = vmax.f32 %v7763_v28, %v797_v6  ;;  %v799_v13 = vpop.f32.mrb[127].mxu0 }
 0x213   :  { %v6601_v30 = vadd.f32 %v978_v49, %v966_v3 }
 0x216   :  { %v802_v32 = vpop.f32.mrb[128].mxu0 }
 0x217   :  { %v991_v22 = vmul.f32 %v6606_v47, %v802_v32  ;;  %v1222_v23 = vmax.f32 %v1214_v11, %v802_v32  ;;  %v804_v45 = vpop.f32.mrb[129].mxu0 }
 0x218   :  { %v805_v36 = vpop.f32.mrb[130].mxu0 }
 0x219   :  { %v999_v27 = vadd.f32 %v991_v22, %v979_v17  ;;  %v992_v54 = vmul.f32 %v6606_v47, %v805_v36  ;;  %v1223_v56 = vmax.f32 %v1215_v59, %v805_v36  ;;  %v807_v58 = vpop.f32.mrb[131].mxu0 }
 0x21b   :  { %v1012_v3 = vmul.f32 %v6612_v41, %v999_v27  ;;  %v1000_v4 = vadd.f32 %v992_v54, %v980_v38  ;;  %v6621_v5 = vpack.c.bf16 %v1223_v56, %v1222_v23 }
 0x21d   :  { %v6624_v8 = vadd.f32 %v6618_v60, %v1012_v3  ;;  %v1013_v11 = vmul.f32 %v6612_v41, %v1000_v4 }
 0x21e   :  { %v810_v19 = vpop.f32.mrb[132].mxu0 }
 0x21f   :  { %v1033_v14 = vand.u32 2147483647, %v6624_v8  ;;  %v6629_v17 = vadd.f32 %v6618_v60, %v1013_v11  ;;  %v993_v15 = vmul.f32 %v6606_v47, %v810_v19  ;;  %v1224_v59 = vmax.f32 %v6570_v1, %v810_v19  ;;  %v812_v29 = vpop.f32.mrb[133].mxu0 }
 0x220   :  { %v813_v34 = vpop.f32.mrb[134].mxu0  ;;  %vm1081_vm1 = vcmp.ge.f32.partialorder %v6624_v8, 0.0 }
 0x221   :  { %v1041_v38 = vsub.f32 0.0, %v1033_v14  ;;  %v1034_v18 = vand.u32 2147483647, %v6629_v17  ;;  %v1001_v31 = vadd.f32 %v993_v15, %v981_v42  ;;  %v994_v7 = vmul.f32 %v6606_v47, %v813_v34  ;;  %v815_v44 = vpop.f32.mrb[135].mxu0 }
 0x222   :  { %v1225_v33 = vmax.f32 %v1217_v51, %v813_v34  ;;  %vm1082_vm2 = vcmp.ge.f32.partialorder %v6629_v17, 0.0 }
 0x223   :  { %v1049_v46 = vmul.f32 1.442695, %v1041_v38  ;;  %v1042_v50 = vsub.f32 0.0, %v1034_v18  ;;  %v1014_v16 = vmul.f32 %v6612_v41, %v1001_v31  ;;  %v1002_v53 = vadd.f32 %v994_v7, %v982_v10 }
 0x224   :  { %v6636_v43 = vpack.c.bf16 %v1225_v33, %v1224_v59 }
 0x225   :  { %5801 = vpow2.f32 %v1049_v46  ;;  %v1051_v20 = vmul.f32 1.442695, %v1042_v50  ;;  %v6639_v1 = vadd.f32 %v6618_v60, %v1014_v16  ;;  %v1015_v63 = vmul.f32 %v6612_v41, %v1002_v53 }
 0x226   :  { %v818_v21 = vpop.f32.mrb[136].mxu0 }
 0x227   :  { %5803 = vpow2.f32 %v1051_v20  ;;  %v1035_v42 = vand.u32 2147483647, %v6639_v1  ;;  %v6644_v51 = vadd.f32 %v6618_v60, %v1015_v63  ;;  %v820_v2 = vpop.f32.mrb[137].mxu0  ;;  %v995_v6 = vmul.f32 %v6606_v47, %v818_v21 }
 0x228   :  { %v1226_v10 = vmax.f32 %v6578_v40, %v818_v21  ;;  %v821_v49 = vpop.f32.mrb[138].mxu0  ;;  %vm1083_vm4 = vcmp.ge.f32.partialorder %v6639_v1, 0.0 }
 0x229   :  { %v1043_v28 = vsub.f32 0.0, %v1035_v42  ;;  %v1036_v13 = vand.u32 2147483647, %v6644_v51  ;;  %v996_v32 = vmul.f32 %v6606_v47, %v821_v49  ;;  %v823_v22 = vpop.f32.mrb[139].mxu0  ;;  %v1003_v23 = vadd.f32 %v995_v6, %v6580_v55 }
 0x22a   :  { %v1227_v45 = vmax.f32 %v6585_v12, %v821_v49  ;;  %vm1084_vm5 = vcmp.ge.f32.partialorder %v6644_v51, 0.0 }
 0x22b   :  { %v1053_v36 = vmul.f32 1.442695, %v1043_v28  ;;  %v1044_v27 = vsub.f32 0.0, %v1036_v13  ;;  %v1004_v54 = vadd.f32 %v996_v32, %v6587_v57  ;;  %v1016_v56 = vmul.f32 %v6612_v41, %v1003_v23 }
 0x22c   :  { %v6654_v58 = vpack.c.bf16 %v1227_v45, %v1226_v10 }
 0x22d   :  { %5805 = vpow2.f32 %v1053_v36  ;;  %v1055_v40 = vmul.f32 1.442695, %v1044_v27  ;;  %v1017_v3 = vmul.f32 %v6612_v41, %v1004_v54  ;;  %v6658_v4 = vadd.f32 %v6618_v60, %v1016_v56 }
 0x22e   :  { %v826_v11 = vpop.f32.mrb[140].mxu0 }
 0x22f   :  { %v5802_v19 = vpop.eup %5801  ;;  %5807 = vpow2.f32 %v1055_v40  ;;  %v6661_v55 = vadd.f32 %v6618_v60, %v1017_v3  ;;  %v997_v12 = vmul.f32 %v6606_v47, %v826_v11  ;;  %v1228_v57 = vmax.f32 %v6592_v24, %v826_v11  ;;  %v828_v14 = vpop.f32.mrb[141].mxu0 }
 0x230   :  { %v1037_v15 = vand.u32 2147483647, %v6658_v4  ;;  %v829_v59 = vpop.f32.mrb[142].mxu0  ;;  %v1065_v29 = vadd.f32 1.0, %v5802_v19  ;;  %vm1085_vm6 = vcmp.ge.f32.partialorder %v6658_v4, 0.0 }
 0x231   :  { %v5804_v34 = vpop.eup %5803  ;;  %v1038_v38 = vand.u32 2147483647, %v6661_v55  ;;  %v1005_v18 = vadd.f32 %v997_v12, %v6594_v39  ;;  %v998_v31 = vmul.f32 %v6606_v47, %v829_v59  ;;  %v831_v7 = vpop.f32.mrb[143].mxu0  ;;  %v1229_v33 = vmax.f32 %v6599_v9, %v829_v59 }
 0x232   :  { %v1045_v44 = vsub.f32 0.0, %v1037_v15  ;;  %v1066_v46 = vadd.f32 1.0, %v5804_v34  ;;  %5809 = vrcp.f32 %v1065_v29  ;;  %vm1086_vm7 = vcmp.ge.f32.partialorder %v6661_v55, 0.0 }
 0x233   :  { %v1046_v50 = vsub.f32 0.0, %v1038_v38  ;;  %v1018_v24 = vmul.f32 %v6612_v41, %v1005_v18  ;;  %v1006_v16 = vadd.f32 %v998_v31, %v6601_v30  ;;  %v6672_v20 = vpack.c.bf16 %v1229_v33, %v1228_v57 }
 0x234   :  { %v1057_v53 = vmul.f32 1.442695, %v1045_v44  ;;  %5811 = vrcp.f32 %v1066_v46 }
 0x235   :  { %v1059_v63 = vmul.f32 1.442695, %v1046_v50  ;;  %v6675_v39 = vadd.f32 %v6618_v60, %v1018_v24  ;;  %v1019_v47 = vmul.f32 %v6612_v41, %v1006_v16 }
 0x236   :  { %5813 = vpow2.f32 %v1057_v53 }
 0x237   :  { %v5806_v21 = vpop.eup %5805  ;;  %5815 = vpow2.f32 %v1059_v63  ;;  %v1039_v9 = vand.u32 2147483647, %v6675_v39  ;;  %v6680_v42 = vadd.f32 %v6618_v60, %v1019_v47  ;;  %vm1087_vm8 = vcmp.ge.f32.partialorder %v6675_v39, 0.0 }
 0x238   :  { %v1067_v2 = vadd.f32 1.0, %v5806_v21 }
 0x239   :  { %v5808_v30 = vpop.eup %5807  ;;  %v1047_v6 = vsub.f32 0.0, %v1039_v9  ;;  %v1040_v10 = vand.u32 2147483647, %v6680_v42  ;;  %vm1088_vm9 = vcmp.ge.f32.partialorder %v6680_v42, 0.0 }
 0x23a   :  { %5817 = vrcp.f32 %v1067_v2  ;;  %v1068_v49 = vadd.f32 1.0, %v5808_v30 }
 0x23b   :  { %v1061_v28 = vmul.f32 1.442695, %v1047_v6  ;;  %v1048_v13 = vsub.f32 0.0, %v1040_v10 }
 0x23c   :  { %v5810_v32 = vpop.eup %5809  ;;  %5819 = vrcp.f32 %v1068_v49 }
 0x23d   :  { %5821 = vpow2.f32 %v1061_v28  ;;  %v1063_v41 = vmul.f32 1.442695, %v1048_v13  ;;  %v1089_v22 = vmul.f32 %v5810_v32, %v5802_v19 }
 0x23e   :  { %v5812_v23 = vpop.eup %5811 }
 0x23f   :  { %5823 = vpow2.f32 %v1063_v41  ;;  %v1090_v60 = vmul.f32 %v5812_v23, %v5804_v34  ;;  %v1097_v45 = vsel %vm1081_vm1, %v5810_v32, %v1089_v22 }
 0x240   :  { %v5814_v36 = vpop.eup %5813  ;;  %v1105_v3 = vmul.f32 %v1097_v45, %v6624_v8 }
 0x241   :  { %v5816_v27 = vpop.eup %5815  ;;  %v1069_v54 = vadd.f32 1.0, %v5814_v36  ;;  %v1098_v56 = vsel %vm1082_vm2, %v5812_v23, %v1090_v60 }
 0x242   :  { %v1070_v40 = vadd.f32 1.0, %v5816_v27  ;;  %v1106_v11 = vmul.f32 %v1098_v56, %v6629_v17 }
 0x243   :  { %5825 = vrcp.f32 %v1069_v54 }
 0x244   :  { %v5818_v19 = vpop.eup %5817  ;;  %5827 = vrcp.f32 %v1070_v40  ;;  %v1115_v12 = vpack.c.bf16 %v1106_v11, %v1105_v3 }
 0x245   :  { %v1091_v57 = vmul.f32 %v5818_v19, %v5806_v21 }
 0x246   :  { %v5820_v14 = vpop.eup %5819  ;;  %5194 = vmatprep.mubr.msk.bf16.mxu1 %vm1124_vm3, %v1115_v12 }
 0x247   :  { %v5822_v15 = vpop.eup %5821  ;;  %v1092_v59 = vmul.f32 %v5820_v14, %v5808_v30  ;;  %v1099_v29 = vsel %vm1083_vm4, %v5818_v19, %v1091_v57 }
 0x248   :  { %v1071_v34 = vadd.f32 1.0, %v5822_v15  ;;  %v1107_v18 = vmul.f32 %v1099_v29, %v6639_v1 }
 0x249   :  { %v5824_v8 = vpop.eup %5823  ;;  %v1100_v38 = vsel %vm1084_vm5, %v5820_v14, %v1092_v59 }
 0x24a   :  { %5829 = vrcp.f32 %v1071_v34  ;;  %v1072_v17 = vadd.f32 1.0, %v5824_v8  ;;  %v1108_v31 = vmul.f32 %v1100_v38, %v6644_v51 }
 0x24c   :  { %5831 = vrcp.f32 %v1072_v17  ;;  %v1116_v7 = vpack.c.bf16 %v1108_v31, %v1107_v18 }
 0x24d   :  { %v5826_v44 = vpop.eup %5825 }
 0x24e   :  { %v5828_v33 = vpop.eup %5827  ;;  %5195 = vmatmul.mubr.msk.bf16.vlgmr.msra.gmra.mrb[0].mxu1 %vm1124_vm3, %v1116_v7  ;;  %v1093_v46 = vmul.f32 %v5826_v44, %v5814_v36 }
 0x24f   :  { %v1094_v50 = vmul.f32 %v5828_v33, %v5816_v27  ;;  %5203 = vmatpush3.bf16.msra.mxu1 %v6554_v37 }
 0x250   :  { %v1101_v24 = vsel %vm1085_vm6, %v5826_v44, %v1093_v46 }
 0x251   :  { %v1102_v16 = vsel %vm1086_vm7, %v5828_v33, %v1094_v50  ;;  %v1109_v1 = vmul.f32 %v1101_v24, %v6658_v4 }
 0x252   :  { %v1110_v51 = vmul.f32 %v1102_v16, %v6661_v55  ;;  %v5716_v55 = vld [vmem:[%s7757_s4] sm:$0xff]  }
 0x254   :  { %v5830_v53 = vpop.eup %5829  ;;  %v1117_v63 = vpack.c.bf16 %v1110_v51, %v1109_v1 }
 0x255   :  { %v1095_v47 = vmul.f32 %v5830_v53, %v5822_v15 }
 0x256   :  { %v5832_v21 = vpop.eup %5831  ;;  %5198 = vmatprep.mubr.msk.bf16.mxu1 %vm1124_vm3, %v1117_v63 }
 0x257   :  { %v1096_v9 = vmul.f32 %v5832_v21, %v5824_v8  ;;  %v1103_v2 = vsel %vm1087_vm8, %v5830_v53, %v1095_v47 }
 0x258   :  { %v1111_v30 = vmul.f32 %v1103_v2, %v6675_v39 }
 0x259   :  { %v1104_v37 = vsel %vm1088_vm9, %v5832_v21, %v1096_v9 }
 0x25a   :  { %v1112_v6 = vmul.f32 %v1104_v37, %v6680_v42 }
 0x25c   :  { %v1118_v4 = vpack.c.bf16 %v1112_v6, %v1111_v30 }
 0x25e   :  { %5199 = vmatmul.mubr.msk.bf16.gmra.mrb[4].mxu1 %vm1124_vm3, %v1118_v4 }
 0x25f   :  { %5204 = vmatprep.mubr.msk.bf16.mxu1 %vm1124_vm3, %v6621_v5  ;;  %v4760_v5 = vld [vmem:[%s7755_s1 + $0x20] ss:$0 sm:$0xff] }
 0x266   :  { %5205 = vmatmul.mubr.msk.bf16.vlgmr.msra.gmra.mrb[0].mxu1 %vm1124_vm3, %v6636_v43  ;;  %v4769_v43 = vld [vmem:[%s7755_s1 + $0x28] ss:$0 sm:$0xff] }
 0x267   :  { %5208 = vmatprep.mubr.msk.bf16.mxu1 %vm1124_vm3, %v6654_v58 }
 0x26e   :  { %5209 = vmatmul.mubr.msk.bf16.gmra.mrb[4].mxu1 %vm1124_vm3, %v6672_v20  ;;  %v4770_v20 = vld [vmem:[%s7755_s1 + $0x30] ss:$0 sm:$0xff]  ;;  %vm1861_vm3 = vcmask 1041408  }
 0x26f   :  { %5220 = vmatprep.mubr.msk.bf16.mxu1 %vm1489_vm10, %v5716_v55 }
 0x339   :  { %v5206_v39 = vpop.f32.mrb[0].mxu1 }
 0x33a   :  { %v5566_v58 = vadd.f32 %v5206_v39, %v4760_v5  ;;  %v1284_v42 = vpop.f32.mrb[1].mxu1 }
 0x33b   :  { %v5567_v10 = vadd.f32 %v4760_v5, %v1284_v42  ;;  %v5207_v49 = vpop.f32.mrb[2].mxu1 }
 0x33c   :  { %v1330_v28 = vmul.f32 %v5566_v58, %v4769_v43  ;;  %v5568_v13 = vadd.f32 %v5207_v49, %v4760_v5  ;;  %v1287_v32 = vpop.f32.mrb[3].mxu1 }
 0x33d   :  { %v1328_v41 = vmul.f32 %v5567_v10, %v4769_v43  ;;  %v5569_v22 = vadd.f32 %v4760_v5, %v1287_v32 }
 0x33e   :  { %v6725_v23 = vadd.f32 %v4770_v20, %v1330_v28  ;;  %v1331_v60 = vmul.f32 %v5568_v13, %v4769_v43 }
 0x33f   :  { %v6727_v45 = vadd.f32 %v4770_v20, %v1328_v41  ;;  %v1329_v36 = vmul.f32 %v5569_v22, %v4769_v43 }
 0x340   :  { %v1351_v27 = vand.u32 2147483647, %v6725_v23  ;;  %v6730_v54 = vadd.f32 %v4770_v20, %v1331_v60  ;;  %vm1399_vm13 = vcmp.ge.f32.partialorder %v6725_v23, 0.0 }
 0x341   :  { %v1349_v56 = vand.u32 2147483647, %v6727_v45  ;;  %v6733_v40 = vadd.f32 %v4770_v20, %v1329_v36  ;;  %v5210_v3 = vpop.f32.mrb[4].mxu1  ;;  %vm1397_vm11 = vcmp.ge.f32.partialorder %v6727_v45, 0.0 }
 0x342   :  { %v1359_v11 = vsub.f32 0.0, %v1351_v27  ;;  %v1352_v19 = vand.u32 2147483647, %v6730_v54  ;;  %v5570_v12 = vadd.f32 %v5210_v3, %v4760_v5  ;;  %v1300_v57 = vpop.f32.mrb[5].mxu1  ;;  %vm1400_vm12 = vcmp.ge.f32.partialorder %v6730_v54, 0.0 }
 0x343   :  { %v1357_v14 = vsub.f32 0.0, %v1349_v56  ;;  %v1350_v15 = vand.u32 2147483647, %v6733_v40  ;;  %v5571_v59 = vadd.f32 %v4760_v5, %v1300_v57  ;;  %v5211_v29 = vpop.f32.mrb[6].mxu1  ;;  %vm1398_vm14 = vcmp.ge.f32.partialorder %v6733_v40, 0.0 }
 0x344   :  { %v1369_v34 = vmul.f32 1.442695, %v1359_v11  ;;  %v1360_v8 = vsub.f32 0.0, %v1352_v19  ;;  %v1334_v38 = vmul.f32 %v5570_v12, %v4769_v43  ;;  %v5572_v17 = vadd.f32 %v5211_v29, %v4760_v5  ;;  %v1303_v18 = vpop.f32.mrb[7].mxu1 }
 0x345   :  { %v1365_v31 = vmul.f32 1.442695, %v1357_v14  ;;  %v1358_v7 = vsub.f32 0.0, %v1350_v15  ;;  %v1332_v44 = vmul.f32 %v5571_v59, %v4769_v43  ;;  %v5573_v33 = vadd.f32 %v4760_v5, %v1303_v18 }
 0x346   :  { %5833 = vpow2.f32 %v1369_v34  ;;  %v1371_v46 = vmul.f32 1.442695, %v1360_v8  ;;  %v6737_v50 = vadd.f32 %v4770_v20, %v1334_v38  ;;  %v1335_v24 = vmul.f32 %v5572_v17, %v4769_v43 }
 0x347   :  { %5835 = vpow2.f32 %v1365_v31  ;;  %v1367_v16 = vmul.f32 1.442695, %v1358_v7  ;;  %v6739_v1 = vadd.f32 %v4770_v20, %v1332_v44  ;;  %v1333_v51 = vmul.f32 %v5573_v33, %v4769_v43 }
 0x348   :  { %5837 = vpow2.f32 %v1371_v46  ;;  %v1355_v53 = vand.u32 2147483647, %v6737_v50  ;;  %v6742_v63 = vadd.f32 %v4770_v20, %v1335_v24  ;;  %vm1403_vm1 = vcmp.ge.f32.partialorder %v6737_v50, 0.0 }
 0x349   :  { %5839 = vpow2.f32 %v1367_v16  ;;  %v1353_v47 = vand.u32 2147483647, %v6739_v1  ;;  %v6745_v21 = vadd.f32 %v4770_v20, %v1333_v51  ;;  %vm1401_vm15 = vcmp.ge.f32.partialorder %v6739_v1, 0.0 }
 0x34a   :  { %v1363_v9 = vsub.f32 0.0, %v1355_v53  ;;  %v1356_v2 = vand.u32 2147483647, %v6742_v63  ;;  %vm1404_vm0 = vcmp.ge.f32.partialorder %v6742_v63, 0.0 }
 0x34b   :  { %v1361_v37 = vsub.f32 0.0, %v1353_v47  ;;  %v1354_v30 = vand.u32 2147483647, %v6745_v21  ;;  %vm1402_vm2 = vcmp.ge.f32.partialorder %v6745_v21, 0.0 }
 0x34c   :  { %v1377_v6 = vmul.f32 1.442695, %v1363_v9  ;;  %v1364_v4 = vsub.f32 0.0, %v1356_v2 }
 0x34d   :  { %v1373_v55 = vmul.f32 1.442695, %v1361_v37  ;;  %v1362_v5 = vsub.f32 0.0, %v1354_v30 }
 0x34e   :  { %5841 = vpow2.f32 %v1377_v6  ;;  %v1379_v39 = vmul.f32 1.442695, %v1364_v4 }
 0x34f   :  { %5843 = vpow2.f32 %v1373_v55  ;;  %v1375_v43 = vmul.f32 1.442695, %v1362_v5 }
 0x350   :  { %v5834_v58 = vpop.eup %5833  ;;  %5845 = vpow2.f32 %v1379_v39 }
 0x351   :  { %v5836_v42 = vpop.eup %5835  ;;  %v1383_v10 = vadd.f32 1.0, %v5834_v58  ;;  %5847 = vpow2.f32 %v1375_v43 }
 0x352   :  { %v5838_v20 = vpop.eup %5837  ;;  %v1381_v49 = vadd.f32 1.0, %v5836_v42 }
 0x353   :  { %v5840_v28 = vpop.eup %5839  ;;  %5849 = vrcp.f32 %v1383_v10  ;;  %v1384_v13 = vadd.f32 1.0, %v5838_v20  ;;  %v5723_v10 = vld [vmem:[%s7757_s4 + $0x38] sm:$0xff]  }
 0x354   :  { %5851 = vrcp.f32 %v1381_v49  ;;  %v1382_v32 = vadd.f32 1.0, %v5840_v28  ;;  %v5725_v49 = vld [vmem:[%s7756_s2 + $0x68] ss:$0 sps:$4 sm:$0x33]  }
 0x355   :  { %5853 = vrcp.f32 %v1384_v13  ;;  %v6828_v13 = vld [vmem:[%s7756_s2 + $0x40] sm:$0xff]  }
 0x356   :  { %5855 = vrcp.f32 %v1382_v32  ;;  %v4787_v32 = vld [vmem:[%s7755_s1 + $0x38] ss:$0 sm:$0xff] }
 0x358   :  { %v5842_v41 = vpop.eup %5841 }
 0x359   :  { %v5844_v22 = vpop.eup %5843  ;;  %v1387_v60 = vadd.f32 1.0, %v5842_v41 }
 0x35a   :  { %v5846_v36 = vpop.eup %5845  ;;  %v1385_v27 = vadd.f32 1.0, %v5844_v22 }
 0x35b   :  { %v5848_v56 = vpop.eup %5847  ;;  %5857 = vrcp.f32 %v1387_v60  ;;  %v1388_v3 = vadd.f32 1.0, %v5846_v36 }
 0x35c   :  { %5859 = vrcp.f32 %v1385_v27  ;;  %v1386_v11 = vadd.f32 1.0, %v5848_v56 }
 0x35d   :  { %v5850_v19 = vpop.eup %5849  ;;  %5861 = vrcp.f32 %v1388_v3 }
 0x35e   :  { %v5852_v12 = vpop.eup %5851  ;;  %5863 = vrcp.f32 %v1386_v11  ;;  %v1407_v15 = vmul.f32 %v5850_v19, %v5834_v58  ;;  %v5721_v58 = vld [vmem:[%s7757_s4 + $0x28] sm:$0xff]  }
 0x35f   :  { %v5854_v57 = vpop.eup %5853  ;;  %v1405_v14 = vmul.f32 %v5852_v12, %v5836_v42  ;;  %v5722_v42 = vld [vmem:[%s7757_s4 + $0x30] sm:$0xff]  }
 0x360   :  { %v5856_v59 = vpop.eup %5855  ;;  %v1408_v29 = vmul.f32 %v5854_v57, %v5838_v20  ;;  %v1415_v18 = vsel %vm1399_vm13, %v5850_v19, %v1407_v15  ;;  %v5724_v20 = vld [vmem:[%s7756_s2 + $0x60] sm:$0xff]  }
 0x361   :  { %v1406_v34 = vmul.f32 %v5856_v59, %v5840_v28  ;;  %v1413_v8 = vsel %vm1397_vm11, %v5852_v12, %v1405_v14  ;;  %v6765_v16 = vmul.f32 %v1415_v18, %v6725_v23  ;;  %v1863_v28 = vsel %vm1861_vm3, %v5725_v49, 0 }
 0x362   :  { %v1416_v38 = vsel %vm1400_vm12, %v5854_v57, %v1408_v29  ;;  %v6754_v31 = vmul.f32 %v1413_v8, %v6727_v45 }
 0x363   :  { %v1414_v17 = vsel %vm1398_vm14, %v5856_v59, %v1406_v34  ;;  %v6760_v44 = vmul.f32 %v1416_v38, %v6730_v54 }
 0x364   :  { %v6757_v7 = vmul.f32 %v1414_v17, %v6733_v40 }
 0x365   :  { %v5858_v33 = vpop.eup %5857  ;;  %v1446_v45 = vpack.c.bf16 %v6760_v44, %v6765_v16 }
 0x366   :  { %v5860_v46 = vpop.eup %5859  ;;  %v1445_v24 = vpack.c.bf16 %v6757_v7, %v6754_v31  ;;  %v1411_v47 = vmul.f32 %v5858_v33, %v5842_v41 }
 0x367   :  { %v5862_v51 = vpop.eup %5861  ;;  %v1409_v53 = vmul.f32 %v5860_v46, %v5844_v22  ;;  %v4788_v22 = vld [vmem:[%s7755_s1 + $0x48] ss:$0 sm:$0xff] }
 0x368   :  { %v5864_v9 = vpop.eup %5863  ;;  %5212 = vmatprep.subr.bf16.mxu1 %v1445_v24  ;;  %v1412_v54 = vmul.f32 %v5862_v51, %v5846_v36  ;;  %v1419_v30 = vsel %vm1403_vm1, %v5858_v33, %v1411_v47 }
 0x369   :  { %5213 = vmatpush3.bf16.msra.mxu1 %v1445_v24  ;;  %v1410_v40 = vmul.f32 %v5864_v9, %v5848_v56  ;;  %v1417_v2 = vsel %vm1401_vm15, %v5860_v46, %v1409_v53  ;;  %v6785_v39 = vmul.f32 %v1419_v30, %v6737_v50  ;;  %v5719_v50 = vld [vmem:[%s7757_s4 + $0x18] sm:$0xff]  }
 0x36a   :  { %5214 = vmatprep.subr.bf16.mxu1 %v1446_v45  ;;  %v1420_v23 = vsel %vm1404_vm0, %v5862_v51, %v1412_v54  ;;  %v6774_v6 = vmul.f32 %v1417_v2, %v6739_v1  ;;  %v5717_v1 = vld [vmem:[%s7757_s4 + $0x8] sm:$0xff]  }
 0x36b   :  { %v1418_v37 = vsel %vm1402_vm2, %v5864_v9, %v1410_v40  ;;  %v6780_v55 = vmul.f32 %v1420_v23, %v6742_v63  ;;  %v5718_v63 = vld [vmem:[%s7757_s4 + $0x10] sm:$0xff]  }
 0x36c   :  { %v6777_v4 = vmul.f32 %v1418_v37, %v6745_v21  ;;  %v5720_v21 = vld [vmem:[%s7757_s4 + $0x20] sm:$0xff]  }
 0x36d   :  { %5215 = vmatpush3.bf16.msra.mxu1 %v1446_v45  ;;  %v1448_v43 = vpack.c.bf16 %v6780_v55, %v6785_v39 }
 0x36e   :  { %v1447_v5 = vpack.c.bf16 %v6777_v4, %v6774_v6 }
 0x370   :  { %5216 = vmatprep.subr.bf16.mxu1 %v1447_v5 }
 0x371   :  { %5217 = vmatpush3.bf16.msra.mxu1 %v1447_v5 }
 0x372   :  { %5218 = vmatprep.subr.bf16.mxu1 %v1448_v43 }
 0x375   :  { %5219 = vmatpush3.bf16.msra.mxu1 %v1448_v43 }
 0x376   :  { %5236 = vmatprep.subr.bf16.mxu1 %v5724_v20 }
 0x378   :  { %5221 = vmatmul.mubr.msk.bf16.vlgmr.msra.gmra.mrb[8].mxu1 %vm1489_vm10, %v5717_v1 }
 0x379   :  { %5224 = vmatprep.mubr.msk.bf16.mxu1 %vm1489_vm10, %v5718_v63  ;;  %5237 = vmatpush3.bf16.msra.mxu1 %v5724_v20 }
 0x37a   :  { %5603 = vmatprep.subr.msk.bf16.mxu1 %vm1861_vm3, %v5725_v49 }
 0x37d   :  { %5239 = vmatpush3.bf16.msra.mxu1 %v1863_v28  ;;  %v6869_v28 = vld [vmem:[%s7755_s1 + $0x50] ss:$0 sm:$0xff] }
 0x37e   :  { %5248 = vmatprep.subr.bf16.mxu1 %v6828_v13 }
 0x380   :  { %5225 = vmatmul.mubr.msk.bf16.gmra.mrb[12].mxu1 %vm1489_vm10, %v5719_v50 }
 0x381   :  { %5228 = vmatprep.mubr.msk.bf16.mxu1 %vm1489_vm10, %v5720_v21  ;;  %v6862_v21 = vld [vmem:[%s7755_s1 + $0x40] ss:$0 sm:$0xff] }
 0x388   :  { %5229 = vmatmul.mubr.msk.bf16.gmra.mrb[16].mxu1 %vm1489_vm10, %v5721_v58 }
 0x389   :  { %5232 = vmatprep.mubr.msk.bf16.mxu1 %vm1489_vm10, %v5722_v42 }
 0x390   :  { %5233 = vmatmul.mubr.msk.bf16.gmra.mrb[20].mxu1 %vm1489_vm10, %v5723_v10 }
 0x44b   :  { %v5222_v41 = vpop.f32.mrb[8].mxu1 }
 0x44c   :  { %v1618_v60 = vmul.f32 %v5222_v41, %v4787_v32  ;;  %v1548_v36 = vpop.f32.mrb[9].mxu1 }
 0x44d   :  { %v1616_v27 = vmul.f32 %v4787_v32, %v1548_v36  ;;  %v5223_v56 = vpop.f32.mrb[10].mxu1 }
 0x44e   :  { %v6837_v3 = vadd.f32 %v4788_v22, %v1618_v60  ;;  %v1619_v11 = vmul.f32 %v5223_v56, %v4787_v32  ;;  %v1551_v19 = vpop.f32.mrb[11].mxu1 }
 0x44f   :  { %v6839_v12 = vadd.f32 %v4788_v22, %v1616_v27  ;;  %v1617_v57 = vmul.f32 %v4787_v32, %v1551_v19 }
 0x450   :  { %v1639_v14 = vand.u32 2147483647, %v6837_v3  ;;  %v6842_v15 = vadd.f32 %v4788_v22, %v1619_v11  ;;  %vm1687_vm4 = vcmp.ge.f32.partialorder %v6837_v3, 0.0 }
 0x451   :  { %v1637_v59 = vand.u32 2147483647, %v6839_v12  ;;  %v6845_v29 = vadd.f32 %v4788_v22, %v1617_v57  ;;  %vm1685_vm5 = vcmp.ge.f32.partialorder %v6839_v12, 0.0 }
 0x452   :  { %v1647_v34 = vsub.f32 0.0, %v1639_v14  ;;  %v1640_v8 = vand.u32 2147483647, %v6842_v15  ;;  %vm1688_vm6 = vcmp.ge.f32.partialorder %v6842_v15, 0.0 }
 0x453   :  { %v1645_v38 = vsub.f32 0.0, %v1637_v59  ;;  %v1638_v17 = vand.u32 2147483647, %v6845_v29  ;;  %v5226_v18 = vpop.f32.mrb[12].mxu1  ;;  %vm1686_vm7 = vcmp.ge.f32.partialorder %v6845_v29, 0.0 }
 0x454   :  { %v1657_v33 = vmul.f32 1.442695, %v1647_v34  ;;  %v1648_v46 = vsub.f32 0.0, %v1640_v8  ;;  %v1622_v24 = vmul.f32 %v5226_v18, %v4787_v32  ;;  %v1564_v51 = vpop.f32.mrb[13].mxu1 }
 0x455   :  { %v1653_v53 = vmul.f32 1.442695, %v1645_v38  ;;  %v1646_v47 = vsub.f32 0.0, %v1638_v17  ;;  %v1620_v9 = vmul.f32 %v4787_v32, %v1564_v51  ;;  %v5227_v45 = vpop.f32.mrb[14].mxu1 }
 0x456   :  { %5865 = vpow2.f32 %v1657_v33  ;;  %v1659_v54 = vmul.f32 1.442695, %v1648_v46  ;;  %v6849_v40 = vadd.f32 %v4788_v22, %v1622_v24  ;;  %v1623_v2 = vmul.f32 %v5227_v45, %v4787_v32  ;;  %v1567_v23 = vpop.f32.mrb[15].mxu1 }
 0x457   :  { %5867 = vpow2.f32 %v1653_v53  ;;  %v1655_v37 = vmul.f32 1.442695, %v1646_v47  ;;  %v6851_v30 = vadd.f32 %v4788_v22, %v1620_v9  ;;  %v1621_v5 = vmul.f32 %v4787_v32, %v1567_v23 }
 0x458   :  { %5869 = vpow2.f32 %v1659_v54  ;;  %v1643_v43 = vand.u32 2147483647, %v6849_v40  ;;  %v6854_v1 = vadd.f32 %v4788_v22, %v1623_v2  ;;  %vm1691_vm8 = vcmp.ge.f32.partialorder %v6849_v40, 0.0 }
 0x459   :  { %5871 = vpow2.f32 %v1655_v37  ;;  %v1641_v63 = vand.u32 2147483647, %v6851_v30  ;;  %v6857_v50 = vadd.f32 %v4788_v22, %v1621_v5  ;;  %vm1689_vm9 = vcmp.ge.f32.partialorder %v6851_v30, 0.0 }
 0x45a   :  { %v1651_v58 = vsub.f32 0.0, %v1643_v43  ;;  %v1644_v42 = vand.u32 2147483647, %v6854_v1  ;;  %vm1692_vm11 = vcmp.ge.f32.partialorder %v6854_v1, 0.0 }
 0x45b   :  { %v1649_v10 = vsub.f32 0.0, %v1641_v63  ;;  %v1642_v20 = vand.u32 2147483647, %v6857_v50  ;;  %v5230_v49 = vpop.f32.mrb[16].mxu1  ;;  %vm1690_vm12 = vcmp.ge.f32.partialorder %v6857_v50, 0.0 }
 0x45c   :  { %v1665_v32 = vmul.f32 1.442695, %v1651_v58  ;;  %v1652_v41 = vsub.f32 0.0, %v1644_v42  ;;  %v1724_v22 = vmul.f32 %v5230_v49, %v6862_v21  ;;  %v1580_v60 = vpop.f32.mrb[17].mxu1 }
 0x45d   :  { %v1661_v36 = vmul.f32 1.442695, %v1649_v10  ;;  %v1650_v27 = vsub.f32 0.0, %v1642_v20  ;;  %v1722_v56 = vmul.f32 %v6862_v21, %v1580_v60  ;;  %v5231_v11 = vpop.f32.mrb[18].mxu1 }
 0x45e   :  { %5873 = vpow2.f32 %v1665_v32  ;;  %v1667_v19 = vmul.f32 1.442695, %v1652_v41  ;;  %v6874_v57 = vadd.f32 %v6869_v28, %v1724_v22  ;;  %v1725_v14 = vmul.f32 %v5231_v11, %v6862_v21  ;;  %v1583_v59 = vpop.f32.mrb[19].mxu1 }
 0x45f   :  { %5875 = vpow2.f32 %v1661_v36  ;;  %v1663_v34 = vmul.f32 1.442695, %v1650_v27  ;;  %v6878_v8 = vadd.f32 %v6869_v28, %v1722_v56  ;;  %v1723_v38 = vmul.f32 %v6862_v21, %v1583_v59 }
 0x460   :  { %v6881_v17 = vpop.eup %5865  ;;  %5877 = vpow2.f32 %v1667_v19  ;;  %v1745_v18 = vand.u32 2147483647, %v6874_v57  ;;  %v6885_v33 = vadd.f32 %v6869_v28, %v1725_v14  ;;  %vm1793_vm13 = vcmp.ge.f32.partialorder %v6874_v57, 0.0 }
 0x461   :  { %v6887_v46 = vpop.eup %5867  ;;  %v1671_v24 = vadd.f32 1.0, %v6881_v17  ;;  %5879 = vpow2.f32 %v1663_v34  ;;  %v1743_v51 = vand.u32 2147483647, %v6878_v8  ;;  %v6899_v37 = vadd.f32 %v6869_v28, %v1723_v38 }
 0x462   :  { %v6891_v53 = vpop.eup %5869  ;;  %v1669_v47 = vadd.f32 1.0, %v6887_v46  ;;  %v1753_v9 = vsub.f32 0.0, %v1745_v18  ;;  %v1746_v45 = vand.u32 2147483647, %v6885_v33  ;;  %vm1794_vm14 = vcmp.ge.f32.partialorder %v6885_v33, 0.0 }
 0x463   :  { %v6895_v54 = vpop.eup %5871  ;;  %5881 = vrcp.f32 %v1671_v24  ;;  %v1672_v2 = vadd.f32 1.0, %v6891_v53  ;;  %v1751_v23 = vsub.f32 0.0, %v1743_v51  ;;  %v5234_v5 = vpop.f32.mrb[20].mxu1  ;;  %v1744_v20 = vand.u32 2147483647, %v6899_v37 }
 0x464   :  { %5883 = vrcp.f32 %v1669_v47  ;;  %v1670_v43 = vadd.f32 1.0, %v6895_v54  ;;  %v1763_v63 = vmul.f32 1.442695, %v1753_v9  ;;  %v1754_v58 = vsub.f32 0.0, %v1746_v45  ;;  %v1596_v42 = vpop.f32.mrb[21].mxu1 }
 0x465   :  { %5885 = vrcp.f32 %v1672_v2  ;;  %v1759_v10 = vmul.f32 1.442695, %v1751_v23  ;;  %v5235_v49 = vpop.f32.mrb[22].mxu1  ;;  %v1728_v41 = vmul.f32 %v5234_v5, %v6862_v21  ;;  %v1726_v22 = vmul.f32 %v6862_v21, %v1596_v42 }
 0x466   :  { %5887 = vrcp.f32 %v1670_v43  ;;  %v1765_v32 = vmul.f32 1.442695, %v1754_v58  ;;  %v1599_v60 = vpop.f32.mrb[23].mxu1  ;;  %v1752_v36 = vsub.f32 0.0, %v1744_v20  ;;  %v1729_v27 = vmul.f32 %v5235_v49, %v6862_v21 }
 0x467   :  { %5889 = vpow2.f32 %v1763_v63  ;;  %v6909_v11 = vadd.f32 %v6869_v28, %v1728_v41  ;;  %v6912_v19 = vadd.f32 %v6869_v28, %v1726_v22  ;;  %v1727_v38 = vmul.f32 %v6862_v21, %v1599_v60 }
 0x468   :  { %v6906_v56 = vpop.eup %5873  ;;  %5891 = vpow2.f32 %v1759_v10  ;;  %v6918_v34 = vadd.f32 %v6869_v28, %v1729_v27  ;;  %v1761_v2 = vmul.f32 1.442695, %v1752_v36  ;;  %vm1791_vm15 = vcmp.ge.f32.partialorder %v6878_v8, 0.0 }
 0x469   :  { %v6914_v14 = vpop.eup %5875  ;;  %v1675_v59 = vadd.f32 1.0, %v6906_v56  ;;  %5893 = vpow2.f32 %v1765_v32  ;;  %v1749_v51 = vand.u32 2147483647, %v6909_v11  ;;  %v1747_v47 = vand.u32 2147483647, %v6912_v19 }
 0x46a   :  { %v6921_v18 = vpop.eup %5877  ;;  %v1673_v24 = vadd.f32 1.0, %v6914_v14  ;;  %v1750_v23 = vand.u32 2147483647, %v6918_v34  ;;  %v6934_v42 = vadd.f32 %v6869_v28, %v1727_v38  ;;  %vm1792_vm0 = vcmp.ge.f32.partialorder %v6899_v37, 0.0 }
 0x46b   :  { %v6927_v9 = vpop.eup %5879  ;;  %5895 = vrcp.f32 %v1675_v59  ;;  %v1676_v45 = vadd.f32 1.0, %v6921_v18  ;;  %v1757_v5 = vsub.f32 0.0, %v1749_v51  ;;  %v1755_v43 = vsub.f32 0.0, %v1747_v47 }
 0x46c   :  { %5897 = vrcp.f32 %v1673_v24  ;;  %v1674_v21 = vadd.f32 1.0, %v6927_v9  ;;  %v1758_v58 = vsub.f32 0.0, %v1750_v23  ;;  %v1748_v36 = vand.u32 2147483647, %v6934_v42 }
 0x46d   :  { %v5882_v63 = vpop.eup %5881  ;;  %5899 = vrcp.f32 %v1676_v45  ;;  %v1771_v49 = vmul.f32 1.442695, %v1757_v5  ;;  %v1767_v32 = vmul.f32 1.442695, %v1755_v43  ;;  %vm1797_vm1 = vcmp.ge.f32.partialorder %v6909_v11, 0.0 }
 0x46e   :  { %v5884_v10 = vpop.eup %5883  ;;  %v1695_v20 = vmul.f32 %v5882_v63, %v6881_v17  ;;  %5901 = vrcp.f32 %v1674_v21  ;;  %v1773_v60 = vmul.f32 1.442695, %v1758_v58  ;;  %v1756_v5 = vsub.f32 0.0, %v1748_v36 }
 0x46f   :  { %v5886_v41 = vpop.eup %5885  ;;  %v1693_v22 = vmul.f32 %v5884_v10, %v6887_v46  ;;  %5903 = vpow2.f32 %v1761_v2  ;;  %vm1798_vm2 = vcmp.ge.f32.partialorder %v6918_v34, 0.0 }
 0x470   :  { %v5888_v27 = vpop.eup %5887  ;;  %v1703_v59 = vsel %vm1687_vm4, %v5882_v63, %v1695_v20  ;;  %v1696_v28 = vmul.f32 %v5886_v41, %v6891_v53  ;;  %5905 = vpow2.f32 %v1771_v49  ;;  %vm1848_vm4 = vcmask 162816  }
 0x471   :  { %v5890_v17 = vpop.eup %5889  ;;  %v1701_v38 = vsel %vm1685_vm5, %v5884_v10, %v1693_v22  ;;  %v1694_v46 = vmul.f32 %v5888_v27, %v6895_v54  ;;  %5907 = vpow2.f32 %v1767_v32  ;;  %v6950_v51 = vmul.f32 %v1703_v59, %v6837_v3 }
 0x472   :  { %v6947_v24 = vpop.eup %5891  ;;  %v1704_v47 = vsel %vm1688_vm6, %v5886_v41, %v1696_v28  ;;  %v1777_v45 = vadd.f32 1.0, %v5890_v17  ;;  %5909 = vpow2.f32 %v1773_v60  ;;  %v6957_v43 = vmul.f32 %v1701_v38, %v6839_v12 }
 0x473   :  { %v5894_v2 = vpop.eup %5893  ;;  %v6953_v53 = vmul.f32 %v1704_v47, %v6842_v15  ;;  %v1702_v23 = vsel %vm1686_vm7, %v5888_v27, %v1694_v46  ;;  %v1775_v21 = vadd.f32 1.0, %v6947_v24  ;;  %v1769_v10 = vmul.f32 1.442695, %v1756_v5 }
 0x474   :  { %v6960_v54 = vmul.f32 %v1702_v23, %v6845_v29  ;;  %5911 = vrcp.f32 %v1777_v45  ;;  %v1778_v3 = vadd.f32 1.0, %v5894_v2  ;;  %vm1795_vm5 = vcmp.ge.f32.partialorder %v6912_v19, 0.0 }
 0x475   :  { %v5896_v63 = vpop.eup %5895  ;;  %v1828_v58 = vpack.c.bf16 %v6953_v53, %v6950_v51  ;;  %5913 = vrcp.f32 %v1775_v21  ;;  %vm1796_vm6 = vcmp.ge.f32.partialorder %v6934_v42, 0.0  ;;  %vm6059_vm7 = vmmov 0   ;;  %v4810_v51 = vld [vmem:[%s7755_s1 + $0x60] ss:$0 sm:$0xff] }
 0x476   :  { %v5898_v15 = vpop.eup %5897  ;;  %v1699_v20 = vmul.f32 %v5896_v63, %v6906_v56  ;;  %5915 = vrcp.f32 %v1778_v3  ;;  %v1827_v49 = vpack.c.bf16 %v6960_v54, %v6957_v43 }
 0x477   :  { %v5900_v12 = vpop.eup %5899  ;;  %v1697_v29 = vmul.f32 %v5898_v15, %v6914_v14  ;;  %5917 = vpow2.f32 %v1769_v10 }
 0x478   :  { %v5902_v32 = vpop.eup %5901  ;;  %v1707_v41 = vsel %vm1691_vm8, %v5896_v63, %v1699_v20  ;;  %v1700_v22 = vmul.f32 %v5900_v12, %v6921_v18 }
 0x479   :  { %v5904_v60 = vpop.eup %5903  ;;  %v1705_v36 = vsel %vm1689_vm9, %v5898_v15, %v1697_v29  ;;  %v1698_v56 = vmul.f32 %v5902_v32, %v6927_v9  ;;  %v6975_v14 = vmul.f32 %v1707_v41, %v6849_v40 }
 0x47a   :  { %v5906_v27 = vpop.eup %5905  ;;  %v1708_v59 = vsel %vm1692_vm11, %v5900_v12, %v1700_v22  ;;  %v1776_v28 = vadd.f32 1.0, %v5904_v60  ;;  %v6981_v23 = vmul.f32 %v1705_v36, %v6851_v30 }
 0x47b   :  { %v5908_v38 = vpop.eup %5907  ;;  %v6978_v46 = vmul.f32 %v1708_v59, %v6854_v1  ;;  %v1706_v47 = vsel %vm1690_vm12, %v5902_v32, %v1698_v56  ;;  %v1781_v18 = vadd.f32 1.0, %v5906_v27 }
 0x47c   :  { %v5910_v45 = vpop.eup %5909  ;;  %v6984_v9 = vmul.f32 %v1706_v47, %v6857_v50  ;;  %5919 = vrcp.f32 %v1776_v28  ;;  %v1779_v21 = vadd.f32 1.0, %v5908_v38 }
 0x47d   :  { %5921 = vrcp.f32 %v1781_v18  ;;  %v1782_v5 = vadd.f32 1.0, %v5910_v45  ;;  %v1830_v40 = vpack.c.bf16 %v6978_v46, %v6975_v14 }
 0x47e   :  { %v5912_v3 = vpop.eup %5911  ;;  %5923 = vrcp.f32 %v1779_v21  ;;  %v1829_v1 = vpack.c.bf16 %v6984_v9, %v6981_v23 }
 0x47f   :  { %v5914_v63 = vpop.eup %5913  ;;  %v1801_v10 = vmul.f32 %v5912_v3, %v5890_v17  ;;  %5925 = vrcp.f32 %v1782_v5 }
 0x480   :  { %v5916_v30 = vpop.eup %5915  ;;  %v1799_v29 = vmul.f32 %v5914_v63, %v6947_v24 }
 0x481   :  { %v5918_v50 = vpop.eup %5917  ;;  %v1809_v15 = vsel %vm1793_vm13, %v5912_v3, %v1801_v10  ;;  %v1802_v20 = vmul.f32 %v5916_v30, %v5894_v2 }
 0x482   :  { %v1780_v12 = vadd.f32 1.0, %v5918_v50  ;;  %v1817_v41 = vmul.f32 %v1809_v15, %v6874_v57  ;;  %v1807_v59 = vsel %vm1791_vm15, %v5914_v63, %v1799_v29  ;;  %v5727_v63 = vld [vmem:[%s7756_s2 + $0x48] ss:$0 sps:$4 sm:$0x33]  }
 0x483   :  { %v1810_v32 = vsel %vm1794_vm14, %v5916_v30, %v1802_v20  ;;  %v1815_v57 = vmul.f32 %v1807_v59, %v6878_v8 }
 0x484   :  { %v1818_v22 = vmul.f32 %v1810_v32, %v6885_v33  ;;  %5927 = vrcp.f32 %v1780_v12 }
 0x486   :  { %v5920_v36 = vpop.eup %5919  ;;  %v1836_v17 = vpack.c.bf16 %v1818_v22, %v1817_v41 }
 0x487   :  { %v5922_v56 = vpop.eup %5921  ;;  %v1800_v28 = vmul.f32 %v5920_v36, %v5904_v60 }
 0x488   :  { %v5924_v47 = vpop.eup %5923  ;;  %v1805_v2 = vmul.f32 %v5922_v56, %v5906_v27 }
 0x489   :  { %v5926_v18 = vpop.eup %5925  ;;  %v1808_v23 = vsel %vm1792_vm0, %v5920_v36, %v1800_v28  ;;  %v1803_v21 = vmul.f32 %v5924_v47, %v5908_v38 }
 0x48a   :  { %v1816_v33 = vmul.f32 %v1808_v23, %v6899_v37  ;;  %v1813_v24 = vsel %vm1797_vm1, %v5922_v56, %v1805_v2  ;;  %v1806_v9 = vmul.f32 %v5926_v18, %v5910_v45 }
 0x48b   :  { %v1821_v3 = vmul.f32 %v1813_v24, %v6909_v11  ;;  %v1811_v8 = vsel %vm1795_vm5, %v5924_v47, %v1803_v21  ;;  %vm2671_vm5 = vcmask 130048  }
 0x48c   :  { %v1814_v5 = vsel %vm1798_vm2, %v5926_v18, %v1806_v9  ;;  %v1835_v60 = vpack.c.bf16 %v1816_v33, %v1815_v57  ;;  %v1819_v45 = vmul.f32 %v1811_v8, %v6912_v19  ;;  %v4809_v19 = vld [vmem:[%s7755_s1 + $0x58] ss:$0 sm:$0xff] }
 0x48d   :  { %v1822_v27 = vmul.f32 %v1814_v5, %v6918_v34  ;;  %v1952_v34 = vsel %vm1861_vm3, %v5727_v63, 0 }
 0x48e   :  { %v5928_v10 = vpop.eup %5927  ;;  %5240 = vmatprep.mubr.msk.bf16.mxu1 %vm1848_vm4, %v1835_v60 }
 0x48f   :  { %v1804_v37 = vmul.f32 %v5928_v10, %v5918_v50  ;;  %5241 = vmatmul.mubr.msk.bf16.vlgmr.msra.gmra.mrb[24].mxu1 %vm1848_vm4, %v1836_v17  ;;  %v1838_v38 = vpack.c.bf16 %v1822_v27, %v1821_v3 }
 0x490   :  { %5249 = vmatpush3.bf16.msra.mxu1 %v6828_v13  ;;  %v6058_v13 = vmov 0.0  }
 0x491   :  { %v1812_v11 = vsel %vm1796_vm6, %v5928_v10, %v1804_v37  ;;  %5604 = vmatprep.subr.msk.bf16.mxu1 %vm1861_vm3, %v5727_v63  ;;  %5422 = vmatprep.subr.bf16.mxu0 %v6058_v13  ;;  %vm2936_vm6 = vcmask 1043456  }
 0x492   :  { %v1820_v30 = vmul.f32 %v1812_v11, %v6934_v42  ;;  %5428 = vmatprep.mubr.msk.bf16.mxu0 %vm6059_vm7, %v6058_v13 }
 0x494   :  { %v1837_v15 = vpack.c.bf16 %v1820_v30, %v1819_v45  ;;  %5251 = vmatpush3.bf16.msra.mxu1 %v1952_v34 }
 0x495   :  { %5260 = vmatprep.subr.bf16.mxu1 %v6058_v13 }
 0x496   :  { %5244 = vmatprep.mubr.msk.bf16.mxu1 %vm1848_vm4, %v1837_v15 }
 0x497   :  { %5245 = vmatmul.mubr.msk.bf16.gmra.mrb[28].mxu1 %vm1848_vm4, %v1838_v38 }
 0x498   :  { %5252 = vmatprep.mubr.msk.bf16.mxu1 %vm1848_vm4, %v1827_v49 }
 0x49f   :  { %5253 = vmatmul.mubr.msk.bf16.vlgmr.msra.gmra.mrb[24].mxu1 %vm1848_vm4, %v1828_v58 }
 0x4a0   :  { %5256 = vmatprep.mubr.msk.bf16.mxu1 %vm1848_vm4, %v1829_v1 }
 0x4a7   :  { %5257 = vmatmul.mubr.msk.bf16.gmra.mrb[28].mxu1 %vm1848_vm4, %v1830_v40 }
 0x4a8   :  { %5268 = vmatprep.mubr.msk.bf16.mxu1 %vm6059_vm7, %v6058_v13 }
 0x572   :  { %v5254_v42 = vpop.f32.mrb[24].mxu1 }
 0x573   :  { %v2026_v53 = vmul.f32 %v5254_v42, %v4809_v19  ;;  %v1988_v43 = vpop.f32.mrb[25].mxu1 }
 0x574   :  { %v2024_v54 = vmul.f32 %v4809_v19, %v1988_v43  ;;  %v5255_v58 = vpop.f32.mrb[26].mxu1 }
 0x575   :  { %v7042_v49 = vadd.f32 %v4810_v51, %v2026_v53  ;;  %v2027_v14 = vmul.f32 %v5255_v58, %v4809_v19  ;;  %v1991_v46 = vpop.f32.mrb[27].mxu1 }
 0x576   :  { %v7044_v40 = vadd.f32 %v4810_v51, %v2024_v54  ;;  %v2025_v1 = vmul.f32 %v4809_v19, %v1991_v46 }
 0x577   :  { %v2047_v50 = vand.u32 2147483647, %v7042_v49  ;;  %v7047_v20 = vadd.f32 %v4810_v51, %v2027_v14  ;;  %vm2095_vm8 = vcmp.ge.f32.partialorder %v7042_v49, 0.0 }
 0x578   :  { %v2045_v12 = vand.u32 2147483647, %v7044_v40  ;;  %v7050_v29 = vadd.f32 %v4810_v51, %v2025_v1  ;;  %vm2093_vm9 = vcmp.ge.f32.partialorder %v7044_v40, 0.0 }
 0x579   :  { %v2055_v32 = vsub.f32 0.0, %v2047_v50  ;;  %v2048_v41 = vand.u32 2147483647, %v7047_v20  ;;  %vm2096_vm11 = vcmp.ge.f32.partialorder %v7047_v20, 0.0 }
 0x57a   :  { %v2053_v22 = vsub.f32 0.0, %v2045_v12  ;;  %v2046_v36 = vand.u32 2147483647, %v7050_v29  ;;  %v5258_v17 = vpop.f32.mrb[28].mxu1  ;;  %vm2094_vm12 = vcmp.ge.f32.partialorder %v7050_v29, 0.0 }
 0x57b   :  { %v2065_v56 = vmul.f32 1.442695, %v2055_v32  ;;  %v2056_v59 = vsub.f32 0.0, %v2048_v41  ;;  %v2030_v28 = vmul.f32 %v5258_v17, %v4809_v19  ;;  %v2004_v47 = vpop.f32.mrb[29].mxu1 }
 0x57c   :  { %v2061_v2 = vmul.f32 1.442695, %v2053_v22  ;;  %v2054_v18 = vsub.f32 0.0, %v2046_v36  ;;  %v2028_v23 = vmul.f32 %v4809_v19, %v2004_v47  ;;  %v5259_v57 = vpop.f32.mrb[30].mxu1 }
 0x57d   :  { %5929 = vpow2.f32 %v2065_v56  ;;  %v2067_v33 = vmul.f32 1.442695, %v2056_v59  ;;  %v7054_v24 = vadd.f32 %v4810_v51, %v2030_v28  ;;  %v2031_v9 = vmul.f32 %v5259_v57, %v4809_v19  ;;  %v2007_v21 = vpop.f32.mrb[31].mxu1 }
 0x57e   :  { %5931 = vpow2.f32 %v2061_v2  ;;  %v2063_v5 = vmul.f32 1.442695, %v2054_v18  ;;  %v7056_v60 = vadd.f32 %v4810_v51, %v2028_v23  ;;  %v2029_v3 = vmul.f32 %v4809_v19, %v2007_v21 }
 0x57f   :  { %5933 = vpow2.f32 %v2067_v33  ;;  %v2051_v27 = vand.u32 2147483647, %v7054_v24  ;;  %v7059_v63 = vadd.f32 %v4810_v51, %v2031_v9  ;;  %vm2099_vm13 = vcmp.ge.f32.partialorder %v7054_v24, 0.0 }
 0x580   :  { %5935 = vpow2.f32 %v2063_v5  ;;  %v2049_v10 = vand.u32 2147483647, %v7056_v60  ;;  %v7062_v8 = vadd.f32 %v4810_v51, %v2029_v3  ;;  %vm2097_vm14 = vcmp.ge.f32.partialorder %v7056_v60, 0.0 }
 0x581   :  { %v2059_v37 = vsub.f32 0.0, %v2051_v27  ;;  %v2052_v38 = vand.u32 2147483647, %v7059_v63  ;;  %vm2100_vm15 = vcmp.ge.f32.partialorder %v7059_v63, 0.0 }
 0x582   :  { %v2057_v11 = vsub.f32 0.0, %v2049_v10  ;;  %v2050_v34 = vand.u32 2147483647, %v7062_v8  ;;  %vm2098_vm0 = vcmp.ge.f32.partialorder %v7062_v8, 0.0 }
 0x583   :  { %v2073_v45 = vmul.f32 1.442695, %v2059_v37  ;;  %v2060_v30 = vsub.f32 0.0, %v2052_v38 }
 0x584   :  { %v2069_v15 = vmul.f32 1.442695, %v2057_v11  ;;  %v2058_v19 = vsub.f32 0.0, %v2050_v34 }
 0x585   :  { %5937 = vpow2.f32 %v2073_v45  ;;  %v2075_v42 = vmul.f32 1.442695, %v2060_v30 }
 0x586   :  { %5939 = vpow2.f32 %v2069_v15  ;;  %v2071_v53 = vmul.f32 1.442695, %v2058_v19 }
 0x587   :  { %v5930_v43 = vpop.eup %5929  ;;  %5941 = vpow2.f32 %v2075_v42 }
 0x588   :  { %v5932_v54 = vpop.eup %5931  ;;  %v2079_v58 = vadd.f32 1.0, %v5930_v43  ;;  %5943 = vpow2.f32 %v2071_v53 }
 0x589   :  { %v5934_v51 = vpop.eup %5933  ;;  %v2077_v14 = vadd.f32 1.0, %v5932_v54 }
 0x58a   :  { %v5936_v46 = vpop.eup %5935  ;;  %5945 = vrcp.f32 %v2079_v58  ;;  %v2080_v1 = vadd.f32 1.0, %v5934_v51 }
 0x58b   :  { %5947 = vrcp.f32 %v2077_v14  ;;  %v2078_v50 = vadd.f32 1.0, %v5936_v46 }
 0x58c   :  { %5949 = vrcp.f32 %v2080_v1 }
 0x58d   :  { %5951 = vrcp.f32 %v2078_v50 }
 0x58f   :  { %v5938_v12 = vpop.eup %5937 }
 0x590   :  { %v5940_v32 = vpop.eup %5939  ;;  %v2083_v41 = vadd.f32 1.0, %v5938_v12 }
 0x591   :  { %v5942_v22 = vpop.eup %5941  ;;  %v2081_v36 = vadd.f32 1.0, %v5940_v32 }
 0x592   :  { %v5944_v17 = vpop.eup %5943  ;;  %5953 = vrcp.f32 %v2083_v41  ;;  %v2084_v56 = vadd.f32 1.0, %v5942_v22 }
 0x593   :  { %5955 = vrcp.f32 %v2081_v36  ;;  %v2082_v59 = vadd.f32 1.0, %v5944_v17  ;;  %v5735_v36 = vld [vmem:[%s7758_s5 + $0x38] sm:$0xff]  }
 0x594   :  { %v5946_v28 = vpop.eup %5945  ;;  %5957 = vrcp.f32 %v2084_v56  ;;  %v5737_v56 = vld [vmem:[%s7756_s2 + $0xa0] sm:$0xff]  }
 0x595   :  { %v5948_v47 = vpop.eup %5947  ;;  %v2103_v2 = vmul.f32 %v5946_v28, %v5930_v43  ;;  %5959 = vrcp.f32 %v2082_v59  ;;  %v5738_v59 = vld [vmem:[%s7756_s2 + $0xa8] ss:$0 sps:$4 sm:$0x33]  }
 0x596   :  { %v5950_v18 = vpop.eup %5949  ;;  %v2101_v23 = vmul.f32 %v5948_v47, %v5932_v54 }
 0x597   :  { %v5952_v57 = vpop.eup %5951  ;;  %v2111_v33 = vsel %vm2095_vm8, %v5946_v28, %v2103_v2  ;;  %v2104_v9 = vmul.f32 %v5950_v18, %v5934_v51  ;;  %v2461_v28 = vsel %vm1861_vm3, %v5738_v59, 0 }
 0x598   :  { %v2119_v21 = vmul.f32 %v2111_v33, %v7042_v49  ;;  %v2109_v5 = vsel %vm2093_vm9, %v5948_v47, %v2101_v23  ;;  %v2102_v3 = vmul.f32 %v5952_v57, %v5936_v46 }
 0x599   :  { %v2117_v27 = vmul.f32 %v2109_v5, %v7044_v40  ;;  %v2112_v10 = vsel %vm2096_vm11, %v5950_v18, %v2104_v9  ;;  %v2332_v18 = vld [vmem:[%s7755_s1 + $0x68] sm:$0xff]  ;;  %vm2932_vm11 = vcmask 326656  }
 0x59a   :  { %v2120_v37 = vmul.f32 %v2112_v10, %v7047_v20  ;;  %v2110_v38 = vsel %vm2094_vm12, %v5952_v57, %v2102_v3  ;;  %v2127_v45 = vadd.f32 %v2119_v21, %v6765_v16  ;;  %v2337_v33 = vrot.slane %v2332_v18, %v6408_v61 }
 0x59b   :  { %v2118_v11 = vmul.f32 %v2110_v38, %v7050_v29  ;;  %v2125_v15 = vadd.f32 %v2117_v27, %v6754_v31  ;;  %v2343_v9 = vrot.slane %v2332_v18, %v6414_v0  ;;  %vm3097_vm12 = vcmask 1044480  }
 0x59c   :  { %v5954_v34 = vpop.eup %5953  ;;  %v2128_v30 = vadd.f32 %v2120_v37, %v6760_v44 }
 0x59d   :  { %v5956_v49 = vpop.eup %5955  ;;  %v2126_v19 = vadd.f32 %v2118_v11, %v6757_v7  ;;  %v2107_v42 = vmul.f32 %v5954_v34, %v5938_v12 }
 0x59e   :  { %v5958_v40 = vpop.eup %5957  ;;  %v2105_v53 = vmul.f32 %v5956_v49, %v5940_v32  ;;  %v2152_v43 = vpack.c.bf16 %v2128_v30, %v2127_v45  ;;  %v2351_v30 = vrot.slane %v2332_v18, %v6450_v48 }
 0x59f   :  { %v5960_v20 = vpop.eup %5959  ;;  %v2115_v54 = vsel %vm2099_vm13, %v5954_v34, %v2107_v42  ;;  %v2108_v29 = vmul.f32 %v5958_v40, %v5942_v22  ;;  %v2151_v58 = vpack.c.bf16 %v2126_v19, %v2125_v15  ;;  %v5734_v22 = vld [vmem:[%s7758_s5 + $0x30] sm:$0xff]  }
 0x5a0   :  { %v2123_v16 = vmul.f32 %v2115_v54, %v7054_v24  ;;  %v2113_v44 = vsel %vm2097_vm14, %v5956_v49, %v2105_v53  ;;  %v2106_v31 = vmul.f32 %v5960_v20, %v5944_v17  ;;  %v5736_v17 = vld [vmem:[%s7758_s5 + $0x40] sm:$0xff]   ;;  %v2359_v54 = vrot.slane %v2332_v18, %v6461_v25 }
 0x5a1   :  { %v2121_v7 = vmul.f32 %v2113_v44, %v7056_v60  ;;  %v2116_v51 = vsel %vm2100_vm15, %v5958_v40, %v2108_v29  ;;  %5261 = vmatpush3.bf16.msra.mxu1 %v2151_v58  ;;  %vm3093_vm14 = vcmask 80896  }
 0x5a2   :  { %v2124_v14 = vmul.f32 %v2116_v51, %v7059_v63  ;;  %v2114_v46 = vsel %vm2098_vm0, %v5960_v20, %v2106_v31  ;;  %5262 = vmatprep.subr.bf16.mxu1 %v6058_v13  ;;  %v2131_v50 = vadd.f32 %v2123_v16, %v6785_v39  ;;  %v5728_v63 = vld [vmem:[%s7758_s5] sm:$0xff]  }
 0x5a3   :  { %v2122_v1 = vmul.f32 %v2114_v46, %v7062_v8  ;;  %v2129_v12 = vadd.f32 %v2121_v7, %v6774_v6  ;;  %v5729_v6 = vld [vmem:[%s7758_s5 + $0x8] sm:$0xff]   ;;  %v5732_v39 = vld [vmem:[%s7758_s5 + $0x20] sm:$0xff]   ;;  %v2367_v46 = vrot.slane %v2332_v18, %v6466_v62 }
 0x5a4   :  { %v2132_v24 = vadd.f32 %v2124_v14, %v6780_v55  ;;  %v5731_v55 = vld [vmem:[%s7758_s5 + $0x18] sm:$0xff]   ;;  %v5733_v8 = vld [vmem:[%s7758_s5 + $0x28] sm:$0xff]  }
 0x5a5   :  { %v2130_v32 = vadd.f32 %v2122_v1, %v6777_v4  ;;  %5263 = vmatpush3.bf16.msra.mxu1 %v2152_v43  ;;  %v5730_v4 = vld [vmem:[%s7758_s5 + $0x10] sm:$0xff]  }
 0x5a6   :  { %5264 = vmatprep.subr.bf16.mxu1 %v6058_v13  ;;  %v2154_v60 = vpack.c.bf16 %v2132_v24, %v2131_v50 }
 0x5a7   :  { %v2153_v41 = vpack.c.bf16 %v2130_v32, %v2129_v12 }
 0x5a9   :  { %5265 = vmatpush3.bf16.msra.mxu1 %v2153_v41 }
 0x5aa   :  { %5266 = vmatprep.subr.bf16.mxu1 %v6058_v13 }
 0x5ad   :  { %5267 = vmatpush3.bf16.msra.mxu1 %v2154_v60 }
 0x5ae   :  { %5304 = vmatprep.subr.bf16.mxu1 %v6058_v13 }
 0x5b0   :  { %5269 = vmatmul.mubr.msk.bf16.vlgmr.msra.gmra.mrb[32].mxu1 %vm1489_vm10, %v5728_v63 }
 0x5b1   :  { %5272 = vmatprep.mubr.msk.bf16.mxu1 %vm6059_vm7, %v6058_v13  ;;  %5305 = vmatpush3.bf16.msra.mxu1 %v5737_v56 }
 0x5b2   :  { %5306 = vmatprep.subr.bf16.mxu1 %v6058_v13 }
 0x5b5   :  { %5307 = vmatpush3.bf16.msra.mxu1 %v2461_v28 }
 0x5b6   :  { %5312 = vmatprep.subr.bf16.mxu1 %v6058_v13 }
 0x5b8   :  { %5273 = vmatmul.mubr.msk.bf16.gmra.mrb[36].mxu1 %vm1489_vm10, %v5729_v6  ;;  %v2375_v6 = vrot.slane %v2332_v18, %v6492_v35 }
 0x5b9   :  { %5276 = vmatprep.mubr.msk.bf16.mxu1 %vm6059_vm7, %v6058_v13 }
 0x5c0   :  { %5277 = vmatmul.mubr.msk.bf16.gmra.mrb[40].mxu1 %vm1489_vm10, %v5730_v4 }
 0x5c1   :  { %5280 = vmatprep.mubr.msk.bf16.mxu1 %vm6059_vm7, %v6058_v13 }
 0x5c8   :  { %5281 = vmatmul.mubr.msk.bf16.gmra.mrb[44].mxu1 %vm1489_vm10, %v5731_v55 }
 0x5c9   :  { %5284 = vmatprep.mubr.msk.bf16.mxu1 %vm6059_vm7, %v6058_v13 }
 0x5d0   :  { %5285 = vmatmul.mubr.msk.bf16.gmra.mrb[48].mxu1 %vm1489_vm10, %v5732_v39 }
 0x5d1   :  { %5288 = vmatprep.mubr.msk.bf16.mxu1 %vm6059_vm7, %v6058_v13 }
 0x5d8   :  { %5289 = vmatmul.mubr.msk.bf16.gmra.mrb[52].mxu1 %vm1489_vm10, %v5733_v8 }
 0x5d9   :  { %5292 = vmatprep.mubr.msk.bf16.mxu1 %vm6059_vm7, %v6058_v13 }
 0x5e0   :  { %5293 = vmatmul.mubr.msk.bf16.gmra.mrb[56].mxu1 %vm1489_vm10, %v5734_v22 }
 0x5e1   :  { %5296 = vmatprep.mubr.msk.bf16.mxu1 %vm6059_vm7, %v6058_v13 }
 0x5e8   :  { %5297 = vmatmul.mubr.msk.bf16.gmra.mrb[60].mxu1 %vm1489_vm10, %v5735_v36 }
 0x5e9   :  { %5300 = vmatprep.mubr.msk.bf16.mxu1 %vm6059_vm7, %v6058_v13 }
 0x5f0   :  { %5301 = vmatmul.mubr.msk.bf16.gmra.mrb[64].mxu1 %vm1489_vm10, %v5736_v17 }
 0x5f1   :  { %5308 = vmatprep.mubr.msk.bf16.mxu1 %vm6059_vm7, %v6058_v13 }
 0x683   :  { %v2261_v47 = vpop.f32.mrb[32].mxu1 }
 0x684   :  { %v5270_v2 = vpop.f32.mrb[33].mxu1  ;;  %v2338_v5 = vmul.f32 %v2337_v33, %v2261_v47  ;;  %v2383_v47 = vrot.slane %v2332_v18, %v6540_v26 }
 0x685   :  { %v2264_v23 = vpop.f32.mrb[34].mxu1 }
 0x686   :  { %v5271_v57 = vpop.f32.mrb[35].mxu1  ;;  %v2339_v37 = vmul.f32 %v2337_v33, %v2264_v23 }
 0x68b   :  { %v2269_v21 = vpop.f32.mrb[36].mxu1 }
 0x68c   :  { %v2344_v3 = vmul.f32 %v2343_v9, %v2269_v21  ;;  %v5274_v27 = vpop.f32.mrb[37].mxu1 }
 0x68d   :  { %v2272_v10 = vpop.f32.mrb[38].mxu1  ;;  %v2391_v27 = vrot.slane %v2332_v18, %v6557_v52  ;;  %v4830_v18 = vld [vmem:[%s7755_s1 + $0x78] ss:$0 sm:$0xff] }
 0x68e   :  { %v2346_v38 = vadd.f32 %v2344_v3, %v2338_v5  ;;  %v2345_v11 = vmul.f32 %v2343_v9, %v2272_v10  ;;  %v5275_v34 = vpop.f32.mrb[39].mxu1 }
 0x690   :  { %v2347_v45 = vadd.f32 %v2345_v11, %v2339_v37 }
 0x693   :  { %v2277_v49 = vpop.f32.mrb[40].mxu1 }
 0x694   :  { %v2352_v15 = vmul.f32 %v2351_v30, %v2277_v49  ;;  %v5278_v19 = vpop.f32.mrb[41].mxu1 }
 0x695   :  { %v2280_v42 = vpop.f32.mrb[42].mxu1 }
 0x696   :  { %v2354_v40 = vadd.f32 %v2352_v15, %v2346_v38  ;;  %v2353_v53 = vmul.f32 %v2351_v30, %v2280_v42  ;;  %v5279_v43 = vpop.f32.mrb[43].mxu1  ;;  %v4829_v42 = vld [vmem:[%s7755_s1 + $0x70] ss:$0 sm:$0xff] }
 0x698   :  { %v2355_v20 = vadd.f32 %v2353_v53, %v2347_v45 }
 0x69b   :  { %v2285_v29 = vpop.f32.mrb[44].mxu1 }
 0x69c   :  { %v2360_v58 = vmul.f32 %v2359_v54, %v2285_v29  ;;  %v5282_v16 = vpop.f32.mrb[45].mxu1 }
 0x69d   :  { %v2288_v44 = vpop.f32.mrb[46].mxu1 }
 0x69e   :  { %v2362_v31 = vadd.f32 %v2360_v58, %v2354_v40  ;;  %v2361_v7 = vmul.f32 %v2359_v54, %v2288_v44  ;;  %v5283_v51 = vpop.f32.mrb[47].mxu1 }
 0x6a0   :  { %v2363_v14 = vadd.f32 %v2361_v7, %v2355_v20 }
 0x6a3   :  { %v2293_v1 = vpop.f32.mrb[48].mxu1 }
 0x6a4   :  { %v2368_v50 = vmul.f32 %v2367_v46, %v2293_v1  ;;  %v5286_v24 = vpop.f32.mrb[49].mxu1 }
 0x6a5   :  { %v2296_v12 = vpop.f32.mrb[50].mxu1 }
 0x6a6   :  { %v2370_v32 = vadd.f32 %v2368_v50, %v2362_v31  ;;  %v2369_v60 = vmul.f32 %v2367_v46, %v2296_v12  ;;  %v5287_v41 = vpop.f32.mrb[51].mxu1  ;;  %v4831_v31 = vld [vmem:[%s7755_s1 + $0x80] ss:$0 sm:$0xff] }
 0x6a8   :  { %v2371_v63 = vadd.f32 %v2369_v60, %v2363_v14 }
 0x6ab   :  { %v2301_v4 = vpop.f32.mrb[52].mxu1 }
 0x6ac   :  { %v2376_v55 = vmul.f32 %v2375_v6, %v2301_v4  ;;  %v2504_v39 = vmax.f32 %v2293_v1, %v2301_v4  ;;  %v5290_v8 = vpop.f32.mrb[53].mxu1 }
 0x6ad   :  { %v2304_v22 = vpop.f32.mrb[54].mxu1 }
 0x6ae   :  { %v2378_v36 = vadd.f32 %v2376_v55, %v2370_v32  ;;  %v2377_v17 = vmul.f32 %v2375_v6, %v2304_v22  ;;  %v2505_v56 = vmax.f32 %v2296_v12, %v2304_v22  ;;  %v5291_v59 = vpop.f32.mrb[55].mxu1 }
 0x6b0   :  { %v2379_v28 = vadd.f32 %v2377_v17, %v2371_v63 }
 0x6b3   :  { %v2309_v2 = vpop.f32.mrb[56].mxu1 }
 0x6b4   :  { %v2384_v23 = vmul.f32 %v2383_v47, %v2309_v2  ;;  %v5294_v57 = vpop.f32.mrb[57].mxu1  ;;  %v5739_v2 = vld [vmem:[%s7756_s2 + $0x80] sm:$0xff]  }
 0x6b5   :  { %v2312_v33 = vpop.f32.mrb[58].mxu1  ;;  %v5740_v57 = vld [vmem:[%s7756_s2 + $0x88] ss:$0 sps:$4 sm:$0x33]  }
 0x6b6   :  { %v2386_v9 = vadd.f32 %v2384_v23, %v2378_v36  ;;  %v2385_v21 = vmul.f32 %v2383_v47, %v2312_v33  ;;  %v5295_v5 = vpop.f32.mrb[59].mxu1  ;;  %v2528_v33 = vsel %vm1861_vm3, %v5740_v57, 0 }
 0x6b7   :  { %v4845_v5 = vld [vmem:[%s7755_s1 + $0x90] ss:$0 sm:$0xff] }
 0x6b8   :  { %v2387_v3 = vadd.f32 %v2385_v21, %v2379_v28 }
 0x6bb   :  { %v2317_v10 = vpop.f32.mrb[60].mxu1 }
 0x6bc   :  { %v2392_v37 = vmul.f32 %v2391_v27, %v2317_v10  ;;  %v2506_v38 = vmax.f32 %v2504_v39, %v2317_v10  ;;  %v5298_v11 = vpop.f32.mrb[61].mxu1  ;;  %v4846_v10 = vld [vmem:[%s7755_s1 + $0x98] ss:$0 sm:$0xff] }
 0x6bd   :  { %v2320_v34 = vpop.f32.mrb[62].mxu1 }
 0x6be   :  { %v2394_v45 = vadd.f32 %v2392_v37, %v2386_v9  ;;  %v2393_v30 = vmul.f32 %v2391_v27, %v2320_v34  ;;  %v2507_v49 = vmax.f32 %v2505_v56, %v2320_v34  ;;  %v5299_v15 = vpop.f32.mrb[63].mxu1  ;;  %v4835_v9 = vld [vmem:[%s7755_s1 + $0x88] ss:$0 sm:$0xff] }
 0x6c0   :  { %v2395_v19 = vadd.f32 %v2393_v30, %v2387_v3 }
 0x6c3   :  { %v2325_v40 = vpop.f32.mrb[64].mxu1 }
 0x6c4   :  { %v2400_v53 = vmul.f32 %v4829_v42, %v2325_v40  ;;  %v2508_v43 = vmax.f32 %v2506_v38, %v2325_v40  ;;  %v5302_v20 = vpop.f32.mrb[65].mxu1 }
 0x6c5   :  { %v2328_v54 = vpop.f32.mrb[66].mxu1 }
 0x6c6   :  { %v2402_v29 = vadd.f32 %v2400_v53, %v2394_v45  ;;  %v2401_v58 = vmul.f32 %v4829_v42, %v2328_v54  ;;  %v2509_v16 = vmax.f32 %v2507_v49, %v2328_v54  ;;  %v5303_v44 = vpop.f32.mrb[67].mxu1 }
 0x6c8   :  { %v2409_v7 = vmul.f32 %v4830_v18, %v2402_v29  ;;  %v2403_v51 = vadd.f32 %v2401_v58, %v2395_v19  ;;  %v2514_v14 = vpack.c.bf16 %v2509_v16, %v2508_v43 }
 0x6ca   :  { %v2416_v46 = vadd.f32 %v4831_v31, %v2409_v7  ;;  %v2410_v1 = vmul.f32 %v4830_v18, %v2403_v51 }
 0x6cc   :  { %v2418_v50 = vand.u32 2147483647, %v2416_v46  ;;  %v2417_v24 = vadd.f32 %v4831_v31, %v2410_v1  ;;  %vm2430_vm10 = vcmp.ge.f32.partialorder %v2416_v46, 0.0 }
 0x6ce   :  { %v2420_v12 = vsub.f32 0.0, %v2418_v50  ;;  %v2419_v32 = vand.u32 2147483647, %v2417_v24  ;;  %vm2431_vm1 = vcmp.ge.f32.partialorder %v2417_v24, 0.0  ;;  %v7210_v50 = vld [vmem:[%s7759_s6] sm:$0xff]  }
 0x6d0   :  { %v2422_v60 = vmul.f32 1.442695, %v2420_v12  ;;  %v2421_v41 = vsub.f32 0.0, %v2419_v32  ;;  %v7229_v12 = vld [vmem:[%s7759_s6 + $0x10] sm:$0xff]   ;;  %v7238_v32 = vld [vmem:[%s7759_s6 + $0x18] sm:$0xff]  }
 0x6d2   :  { %5961 = vpow2.f32 %v2422_v60  ;;  %v2424_v63 = vmul.f32 1.442695, %v2421_v41  ;;  %v7247_v60 = vld [vmem:[%s7759_s6 + $0x20] sm:$0xff]   ;;  %v7256_v41 = vld [vmem:[%s7759_s6 + $0x28] sm:$0xff]  }
 0x6d4   :  { %5963 = vpow2.f32 %v2424_v63  ;;  %v7265_v63 = vld [vmem:[%s7759_s6 + $0x30] sm:$0xff]  }
 0x6dc   :  { %v5962_v6 = vpop.eup %5961 }
 0x6dd   :  { %v2426_v4 = vadd.f32 1.0, %v5962_v6 }
 0x6de   :  { %v5964_v55 = vpop.eup %5963 }
 0x6df   :  { %5965 = vrcp.f32 %v2426_v4  ;;  %v2427_v39 = vadd.f32 1.0, %v5964_v55  ;;  %v7283_v4 = vld [vmem:[%s7759_s6 + $0x40] sm:$0xff]  }
 0x6e1   :  { %5967 = vrcp.f32 %v2427_v39  ;;  %v5751_v39 = vld [vmem:[%s7756_s2 + $0xc8] sm:$0xff]  }
 0x6e9   :  { %v5966_v8 = vpop.eup %5965 }
 0x6ea   :  { %v2432_v22 = vmul.f32 %v5966_v8, %v5962_v6  ;;  %v7274_v6 = vld [vmem:[%s7759_s6 + $0x38] sm:$0xff]  }
 0x6eb   :  { %v5968_v36 = vpop.eup %5967 }
 0x6ec   :  { %v2434_v17 = vsel %vm2430_vm10, %v5966_v8, %v2432_v22  ;;  %v2433_v56 = vmul.f32 %v5968_v36, %v5964_v55  ;;  %v5750_v55 = vld [vmem:[%s7756_s2 + $0xc0] sm:$0xff]   ;;  %v5752_v8 = vld [vmem:[%s7756_s2 + $0xd0] ss:$0 sps:$4 sm:$0xff]  }
 0x6ed   :  { %v2436_v28 = vmul.f32 %v2434_v17, %v2416_v46  ;;  %v2938_v22 = vsel %vm2936_vm6, %v5752_v8, 0 }
 0x6ee   :  { %v2435_v59 = vsel %vm2431_vm1, %v5968_v36, %v2433_v56  ;;  %v2804_v56 = vld [vmem:[%s7755_s1 + $0xa0] sm:$0xff] }
 0x6ef   :  { %v2437_v47 = vmul.f32 %v2435_v59, %v2417_v24  ;;  %v7220_v24 = vld [vmem:[%s7759_s6 + $0x8] sm:$0xff]  }
 0x6f1   :  { %v2442_v23 = vpack.c.bf16 %v2437_v47, %v2436_v28  ;;  %v2809_v47 = vrot.slane %v2804_v56, %v6408_v61 }
 0x6f3   :  { %5309 = vmatmul.mubr.msk.bf16.vlgmr.msra.gmra.mrb[68].mxu1 %vm1848_vm4, %v2442_v23 }
 0x6f4   :  { %5313 = vmatpush3.bf16.msra.mxu1 %v5739_v2  ;;  %5316 = vmatprep.mubr.msk.bf16.mxu1 %vm6059_vm7, %v6058_v13  ;;  %v2815_v2 = vrot.slane %v2804_v56, %v6414_v0 }
 0x6f5   :  { %5314 = vmatprep.subr.bf16.mxu1 %v6058_v13 }
 0x6f8   :  { %5315 = vmatpush3.bf16.msra.mxu1 %v2528_v33 }
 0x6f9   :  { %5320 = vmatprep.subr.bf16.mxu1 %v6058_v13 }
 0x6ff   :  { %5317 = vmatmul.mubr.msk.bf16.vlgmr.msra.gmra.mrb[68].mxu1 %vm1848_vm4, %v2514_v14 }
 0x700   :  { %5322 = vmatprep.mubr.msk.bf16.mxu1 %vm6059_vm7, %v6058_v13 }
 0x7d2   :  { %v2564_v21 = vpop.f32.mrb[68].mxu1 }
 0x7d3   :  { %v5574_v3 = vadd.f32 %v4835_v9, %v2564_v21  ;;  %v5318_v27 = vpop.f32.mrb[69].mxu1 }
 0x7d4   :  { %v2567_v37 = vpop.f32.mrb[70].mxu1 }
 0x7d5   :  { %v2578_v38 = vmul.f32 %v5574_v3, %v4845_v5  ;;  %v5575_v11 = vadd.f32 %v4835_v9, %v2567_v37  ;;  %v5319_v34 = vpop.f32.mrb[71].mxu1 }
 0x7d7   :  { %v2585_v45 = vadd.f32 %v4846_v10, %v2578_v38  ;;  %v2579_v30 = vmul.f32 %v5575_v11, %v4845_v5  ;;  %v2823_v38 = vrot.slane %v2804_v56, %v6450_v48 }
 0x7d9   :  { %v2587_v49 = vand.u32 2147483647, %v2585_v45  ;;  %v2586_v15 = vadd.f32 %v4846_v10, %v2579_v30  ;;  %vm2599_vm2 = vcmp.ge.f32.partialorder %v2585_v45, 0.0 }
 0x7db   :  { %v2589_v19 = vsub.f32 0.0, %v2587_v49  ;;  %v2588_v42 = vand.u32 2147483647, %v2586_v15  ;;  %vm2600_vm4 = vcmp.ge.f32.partialorder %v2586_v15, 0.0 }
 0x7dd   :  { %v2591_v40 = vmul.f32 1.442695, %v2589_v19  ;;  %v2590_v53 = vsub.f32 0.0, %v2588_v42 }
 0x7df   :  { %5969 = vpow2.f32 %v2591_v40  ;;  %v2593_v43 = vmul.f32 1.442695, %v2590_v53  ;;  %v2831_v40 = vrot.slane %v2804_v56, %v6461_v25 }
 0x7e1   :  { %5971 = vpow2.f32 %v2593_v43 }
 0x7e9   :  { %v5970_v20 = vpop.eup %5969 }
 0x7ea   :  { %v2595_v18 = vadd.f32 1.0, %v5970_v20 }
 0x7eb   :  { %v5972_v54 = vpop.eup %5971 }
 0x7ec   :  { %5973 = vrcp.f32 %v2595_v18  ;;  %v2596_v29 = vadd.f32 1.0, %v5972_v54 }
 0x7ee   :  { %5975 = vrcp.f32 %v2596_v29 }
 0x7f6   :  { %v5974_v58 = vpop.eup %5973 }
 0x7f7   :  { %v2601_v16 = vmul.f32 %v5974_v58, %v5970_v20 }
 0x7f8   :  { %v5976_v44 = vpop.eup %5975 }
 0x7f9   :  { %v2603_v31 = vsel %vm2599_vm2, %v5974_v58, %v2601_v16  ;;  %v2602_v7 = vmul.f32 %v5976_v44, %v5972_v54 }
 0x7fa   :  { %v7201_v14 = vmul.f32 %v2603_v31, %v2585_v45 }
 0x7fb   :  { %v2604_v51 = vsel %vm2600_vm4, %v5976_v44, %v2602_v7  ;;  %v2839_v44 = vrot.slane %v2804_v56, %v6466_v62 }
 0x7fc   :  { %v7203_v46 = vmul.f32 %v2604_v51, %v2586_v15 }
 0x7fe   :  { %v2625_v1 = vpack.c.bf16 %v7203_v46, %v7201_v14 }
 0x800   :  { %5321 = vmatpush3.bf16.msra.mxu1 %v2625_v1 }
 0x801   :  { %5358 = vmatprep.subr.bf16.mxu1 %v6058_v13 }
 0x803   :  { %5323 = vmatmul.mubr.msk.bf16.vlgmr.msra.gmra.mrb[72].mxu1 %vm2671_vm5, %v7210_v50 }
 0x804   :  { %5326 = vmatprep.mubr.msk.bf16.mxu1 %vm6059_vm7, %v6058_v13  ;;  %5359 = vmatpush3.bf16.msra.mxu1 %v5750_v55 }
 0x805   :  { %5360 = vmatprep.subr.bf16.mxu1 %v6058_v13 }
 0x808   :  { %5361 = vmatpush3.bf16.msra.mxu1 %v5751_v39 }
 0x809   :  { %5362 = vmatprep.subr.bf16.mxu1 %v6058_v13 }
 0x80b   :  { %5327 = vmatmul.mubr.msk.bf16.gmra.mrb[76].mxu1 %vm2671_vm5, %v7220_v24 }
 0x80c   :  { %5330 = vmatprep.mubr.msk.bf16.mxu1 %vm6059_vm7, %v6058_v13  ;;  %5363 = vmatpush3.bf16.msra.mxu1 %v2938_v22 }
 0x80d   :  { %5368 = vmatprep.subr.bf16.mxu1 %v6058_v13 }
 0x813   :  { %5331 = vmatmul.mubr.msk.bf16.gmra.mrb[80].mxu1 %vm2671_vm5, %v7229_v12 }
 0x814   :  { %5334 = vmatprep.mubr.msk.bf16.mxu1 %vm6059_vm7, %v6058_v13 }
 0x81b   :  { %5335 = vmatmul.mubr.msk.bf16.gmra.mrb[84].mxu1 %vm2671_vm5, %v7238_v32 }
 0x81c   :  { %5338 = vmatprep.mubr.msk.bf16.mxu1 %vm6059_vm7, %v6058_v13 }
 0x823   :  { %5339 = vmatmul.mubr.msk.bf16.gmra.mrb[88].mxu1 %vm2671_vm5, %v7247_v60 }
 0x824   :  { %5342 = vmatprep.mubr.msk.bf16.mxu1 %vm6059_vm7, %v6058_v13 }
 0x82b   :  { %5343 = vmatmul.mubr.msk.bf16.gmra.mrb[92].mxu1 %vm2671_vm5, %v7256_v41 }
 0x82c   :  { %5346 = vmatprep.mubr.msk.bf16.mxu1 %vm6059_vm7, %v6058_v13 }
 0x833   :  { %5347 = vmatmul.mubr.msk.bf16.gmra.mrb[96].mxu1 %vm2671_vm5, %v7265_v63 }
 0x834   :  { %5350 = vmatprep.mubr.msk.bf16.mxu1 %vm6059_vm7, %v6058_v13 }
 0x83b   :  { %5351 = vmatmul.mubr.msk.bf16.gmra.mrb[100].mxu1 %vm2671_vm5, %v7274_v6 }
 0x83c   :  { %5354 = vmatprep.mubr.msk.bf16.mxu1 %vm6059_vm7, %v6058_v13 }
 0x843   :  { %5355 = vmatmul.mubr.msk.bf16.gmra.mrb[104].mxu1 %vm2671_vm5, %v7283_v4 }
 0x844   :  { %5364 = vmatprep.mubr.msk.bf16.mxu1 %vm6059_vm7, %v6058_v13 }
 0x8d6   :  { %v2733_v36 = vpop.f32.mrb[72].mxu1 }
 0x8d7   :  { %v5324_v17 = vpop.f32.mrb[73].mxu1  ;;  %v2810_v57 = vmul.f32 %v2809_v47, %v2733_v36  ;;  %v2847_v36 = vrot.slane %v2804_v56, %v6492_v35 }
 0x8d8   :  { %v2736_v59 = vpop.f32.mrb[74].mxu1 }
 0x8d9   :  { %v5325_v28 = vpop.f32.mrb[75].mxu1  ;;  %v2811_v5 = vmul.f32 %v2809_v47, %v2736_v59 }
 0x8de   :  { %v2741_v23 = vpop.f32.mrb[76].mxu1 }
 0x8df   :  { %v2816_v33 = vmul.f32 %v2815_v2, %v2741_v23  ;;  %v5328_v9 = vpop.f32.mrb[77].mxu1 }
 0x8e0   :  { %v2744_v21 = vpop.f32.mrb[78].mxu1  ;;  %v2855_v9 = vrot.slane %v2804_v56, %v6540_v26 }
 0x8e1   :  { %v2818_v3 = vadd.f32 %v2816_v33, %v2810_v57  ;;  %v2817_v27 = vmul.f32 %v2815_v2, %v2744_v21  ;;  %v5329_v10 = vpop.f32.mrb[79].mxu1 }
 0x8e3   :  { %v2819_v37 = vadd.f32 %v2817_v27, %v2811_v5 }
 0x8e6   :  { %v2749_v11 = vpop.f32.mrb[80].mxu1 }
 0x8e7   :  { %v2824_v34 = vmul.f32 %v2823_v38, %v2749_v11  ;;  %v5332_v45 = vpop.f32.mrb[81].mxu1 }
 0x8e8   :  { %v2752_v30 = vpop.f32.mrb[82].mxu1 }
 0x8e9   :  { %v2826_v49 = vadd.f32 %v2824_v34, %v2818_v3  ;;  %v2825_v15 = vmul.f32 %v2823_v38, %v2752_v30  ;;  %v5333_v19 = vpop.f32.mrb[83].mxu1  ;;  %v2863_v34 = vrot.slane %v2804_v56, %v6557_v52 }
 0x8eb   :  { %v2827_v42 = vadd.f32 %v2825_v15, %v2819_v37 }
 0x8ee   :  { %v2757_v53 = vpop.f32.mrb[84].mxu1 }
 0x8ef   :  { %v2832_v43 = vmul.f32 %v2831_v40, %v2757_v53  ;;  %v5336_v20 = vpop.f32.mrb[85].mxu1 }
 0x8f0   :  { %v2760_v18 = vpop.f32.mrb[86].mxu1 }
 0x8f1   :  { %v2834_v54 = vadd.f32 %v2832_v43, %v2826_v49  ;;  %v2833_v29 = vmul.f32 %v2831_v40, %v2760_v18  ;;  %v5337_v58 = vpop.f32.mrb[87].mxu1  ;;  %v4865_v43 = vld [vmem:[%s7755_s1 + $0xa8] ss:$0 sm:$0xff] }
 0x8f3   :  { %v2835_v16 = vadd.f32 %v2833_v29, %v2827_v42  ;;  %v4866_v29 = vld [vmem:[%s7755_s1 + $0xb0] ss:$0 sm:$0xff] }
 0x8f6   :  { %v2765_v31 = vpop.f32.mrb[88].mxu1 }
 0x8f7   :  { %v2840_v7 = vmul.f32 %v2839_v44, %v2765_v31  ;;  %v5340_v51 = vpop.f32.mrb[89].mxu1  ;;  %v4867_v31 = vld [vmem:[%s7755_s1 + $0xb8] ss:$0 sm:$0xff] }
 0x8f8   :  { %v2768_v1 = vpop.f32.mrb[90].mxu1 }
 0x8f9   :  { %v2842_v55 = vadd.f32 %v2840_v7, %v2834_v54  ;;  %v2841_v39 = vmul.f32 %v2839_v44, %v2768_v1  ;;  %v5341_v8 = vpop.f32.mrb[91].mxu1 }
 0x8fb   :  { %v2843_v22 = vadd.f32 %v2841_v39, %v2835_v16 }
 0x8fe   :  { %v2773_v17 = vpop.f32.mrb[92].mxu1 }
 0x8ff   :  { %v2848_v59 = vmul.f32 %v2847_v36, %v2773_v17  ;;  %v5344_v28 = vpop.f32.mrb[93].mxu1 }
 0x900   :  { %v2776_v47 = vpop.f32.mrb[94].mxu1 }
 0x901   :  { %v2850_v2 = vadd.f32 %v2848_v59, %v2842_v55  ;;  %v2849_v23 = vmul.f32 %v2847_v36, %v2776_v47  ;;  %v5345_v57 = vpop.f32.mrb[95].mxu1 }
 0x903   :  { %v2851_v33 = vadd.f32 %v2849_v23, %v2843_v22 }
 0x906   :  { %v2781_v21 = vpop.f32.mrb[96].mxu1 }
 0x907   :  { %v2856_v5 = vmul.f32 %v2855_v9, %v2781_v21  ;;  %v5348_v3 = vpop.f32.mrb[97].mxu1 }
 0x908   :  { %v2784_v27 = vpop.f32.mrb[98].mxu1 }
 0x909   :  { %v2858_v10 = vadd.f32 %v2856_v5, %v2850_v2  ;;  %v2857_v37 = vmul.f32 %v2855_v9, %v2784_v27  ;;  %v5349_v38 = vpop.f32.mrb[99].mxu1 }
 0x90b   :  { %v2859_v11 = vadd.f32 %v2857_v37, %v2851_v33 }
 0x90e   :  { %v2789_v45 = vpop.f32.mrb[100].mxu1 }
 0x90f   :  { %v2864_v30 = vmul.f32 %v2863_v34, %v2789_v45  ;;  %v5352_v49 = vpop.f32.mrb[101].mxu1  ;;  %v5755_v45 = vld [vmem:[%s7756_s2 + $0xf0] ss:$0 sps:$4 sm:$0xff]  }
 0x910   :  { %v2792_v15 = vpop.f32.mrb[102].mxu1  ;;  %v4877_v49 = vld [vmem:[%s7755_s1 + $0xc0] ss:$0 sm:$0xff] }
 0x911   :  { %v2866_v19 = vadd.f32 %v2864_v30, %v2858_v10  ;;  %v2865_v42 = vmul.f32 %v2863_v34, %v2792_v15  ;;  %v5353_v40 = vpop.f32.mrb[103].mxu1  ;;  %v5754_v34 = vld [vmem:[%s7756_s2 + $0xe8] sm:$0xff]   ;;  %v3032_v30 = vsel %vm2936_vm6, %v5755_v45, 0 }
 0x913   :  { %v2867_v53 = vadd.f32 %v2865_v42, %v2859_v11  ;;  %v5753_v11 = vld [vmem:[%s7756_s2 + $0xe0] sm:$0xff]  }
 0x916   :  { %v2797_v20 = vpop.f32.mrb[104].mxu1 }
 0x917   :  { %v2872_v18 = vmul.f32 %v4865_v43, %v2797_v20  ;;  %v5356_v54 = vpop.f32.mrb[105].mxu1 }
 0x918   :  { %v2800_v56 = vpop.f32.mrb[106].mxu1 }
 0x919   :  { %v2874_v58 = vadd.f32 %v2872_v18, %v2866_v19  ;;  %v2873_v16 = vmul.f32 %v4865_v43, %v2800_v56  ;;  %v5357_v44 = vpop.f32.mrb[107].mxu1  ;;  %v4878_v19 = vld [vmem:[%s7755_s1 + $0xc8] ss:$0 sm:$0xff] }
 0x91b   :  { %v2881_v7 = vmul.f32 %v4866_v29, %v2874_v58  ;;  %v2875_v51 = vadd.f32 %v2873_v16, %v2867_v53 }
 0x91d   :  { %v2888_v1 = vadd.f32 %v4867_v31, %v2881_v7  ;;  %v2882_v55 = vmul.f32 %v4866_v29, %v2875_v51 }
 0x91f   :  { %v2890_v39 = vand.u32 2147483647, %v2888_v1  ;;  %v2889_v8 = vadd.f32 %v4867_v31, %v2882_v55  ;;  %vm2902_vm8 = vcmp.ge.f32.partialorder %v2888_v1, 0.0 }
 0x921   :  { %v2892_v22 = vsub.f32 0.0, %v2890_v39  ;;  %v2891_v36 = vand.u32 2147483647, %v2889_v8  ;;  %vm2903_vm9 = vcmp.ge.f32.partialorder %v2889_v8, 0.0 }
 0x923   :  { %v2894_v17 = vmul.f32 1.442695, %v2892_v22  ;;  %v2893_v59 = vsub.f32 0.0, %v2891_v36 }
 0x925   :  { %5977 = vpow2.f32 %v2894_v17  ;;  %v2896_v28 = vmul.f32 1.442695, %v2893_v59 }
 0x927   :  { %5979 = vpow2.f32 %v2896_v28 }
 0x92f   :  { %v5978_v47 = vpop.eup %5977 }
 0x930   :  { %v2898_v2 = vadd.f32 1.0, %v5978_v47 }
 0x931   :  { %v5980_v23 = vpop.eup %5979 }
 0x932   :  { %5981 = vrcp.f32 %v2898_v2  ;;  %v2899_v57 = vadd.f32 1.0, %v5980_v23 }
 0x934   :  { %5983 = vrcp.f32 %v2899_v57 }
 0x93c   :  { %v5982_v33 = vpop.eup %5981 }
 0x93d   :  { %v2904_v9 = vmul.f32 %v5982_v33, %v5978_v47 }
 0x93e   :  { %v5984_v21 = vpop.eup %5983 }
 0x93f   :  { %v2906_v5 = vsel %vm2902_vm8, %v5982_v33, %v2904_v9  ;;  %v2905_v3 = vmul.f32 %v5984_v21, %v5980_v23 }
 0x940   :  { %v2908_v10 = vmul.f32 %v2906_v5, %v2888_v1 }
 0x941   :  { %v2907_v27 = vsel %vm2903_vm9, %v5984_v21, %v2905_v3 }
 0x942   :  { %v2909_v37 = vmul.f32 %v2907_v27, %v2889_v8  ;;  %v5756_v8 = vld [vmem:[%s7756_s2 + $0x100] sm:$0x1f]  }
 0x943   :  { %v3099_v22 = vsel %vm3097_vm12, %v5756_v8, 0 }
 0x944   :  { %v2916_v38 = vpack.c.bf16 %v2909_v37, %v2908_v10  ;;  %v5757_v10 = vld [vmem:[%s7756_s2 + $0x120] sm:$0xff]  }
 0x945   :  { %5423 = vmatpush3.bf16.msra.mxu0 %v5757_v10 }
 0x946   :  { %5365 = vmatmul.mubr.msk.bf16.vlgmr.msra.gmra.mrb[108].mxu1 %vm2932_vm11, %v2916_v38  ;;  %5424 = vmatprep.subr.bf16.mxu0 %v6058_v13 }
 0x947   :  { %5374 = vmatprep.mubr.msk.bf16.mxu1 %vm6059_vm7, %v6058_v13  ;;  %5369 = vmatpush3.bf16.msra.mxu1 %v5753_v11 }
 0x948   :  { %5370 = vmatprep.subr.bf16.mxu1 %v6058_v13 }
 0x94b   :  { %5371 = vmatpush3.bf16.msra.mxu1 %v5754_v34 }
 0x94c   :  { %5372 = vmatprep.subr.bf16.mxu1 %v6058_v13 }
 0x94f   :  { %5373 = vmatpush3.bf16.msra.mxu1 %v3032_v30 }
 0x950   :  { %5378 = vmatprep.subr.bf16.mxu1 %v6058_v13 }
 0xa19   :  { %v2974_v15 = vpop.f32.mrb[108].mxu1 }
 0xa1a   :  { %v2986_v42 = vmul.f32 %v4877_v49, %v2974_v15  ;;  %v5366_v40 = vpop.f32.mrb[109].mxu1 }
 0xa1b   :  { %v2977_v53 = vpop.f32.mrb[110].mxu1 }
 0xa1c   :  { %v7344_v43 = vadd.f32 %v4878_v19, %v2986_v42  ;;  %v2987_v20 = vmul.f32 %v4877_v49, %v2977_v53  ;;  %v5367_v18 = vpop.f32.mrb[111].mxu1 }
 0xa1e   :  { %v2994_v54 = vadd.f32 %v4878_v19, %v2987_v20  ;;  %v2995_v29 = vsel %vm2932_vm11, %v7344_v43, 0.0  ;;  %v5758_v19 = vld [vmem:[%s7756_s2 + $0x128] sm:$0xff]  }
 0xa1f   :  { %5425 = vmatpush3.bf16.msra.mxu0 %v5758_v19 }
 0xa20   :  { %v2996_v56 = vsel %vm2932_vm11, %v2994_v54, 0.0  ;;  %5426 = vmatprep.subr.bf16.mxu0 %v6058_v13 }
 0xa21   :  { %v2997_v58 = vadd.f32 %v2996_v56, %v2995_v29 }
 0xa23   :  { %v2998_v16 = vrot.slane %v2997_v58, 4 }
 0xa25   :  { %v2999_v44 = vadd.f32 %v2998_v16, %v2997_v58 }
 0xa27   :  { %v3000_v31 = vrot.slane %v2999_v44, 2 }
 0xa29   :  { %v3001_v7 = vadd.f32 %v3000_v31, %v2999_v44 }
 0xa2b   :  { %v3002_v51 = vrot.slane %v3001_v7, 1 }
 0xa2d   :  { %v3003_v1 = vadd.f32 %v3002_v51, %v3001_v7 }
 0xa2f   :  { %v3005_v55 = vmul.f32 0.0625, %v3003_v1 }
 0xa31   :  { %v3012_v39 = vpack.c.bf16 %v3005_v55, %v3005_v55 }
 0xa33   :  { %5375 = vmatmul.mubr.msk.bf16.vlgmr.msra.gmra.mrb[112].mxu1 %vm2932_vm11, %v3012_v39 }
 0xa34   :  { %5380 = vmatprep.mubr.msk.bf16.mxu1 %vm6059_vm7, %v6058_v13  ;;  %5379 = vmatpush3.bf16.msra.mxu1 %v3099_v22 }
 0xa35   :  { %5384 = vmatprep.subr.bf16.mxu1 %v6058_v13 }
 0xb06   :  { %v3068_v36 = vpop.f32.mrb[112].mxu1 }
 0xb07   :  { %v3074_v17 = vand.u32 2147483647, %v3068_v36  ;;  %v5376_v59 = vpop.f32.mrb[113].mxu1  ;;  %vm3080_vm13 = vcmp.ge.f32.partialorder %v3068_v36, 0.0 }
 0xb08   :  { %v3071_v28 = vpop.f32.mrb[114].mxu1 }
 0xb09   :  { %v3075_v47 = vsub.f32 0.0, %v3074_v17  ;;  %v5377_v2 = vpop.f32.mrb[115].mxu1 }
 0xb0b   :  { %v3076_v23 = vmul.f32 1.442695, %v3075_v47 }
 0xb0d   :  { %5985 = vpow2.f32 %v3076_v23 }
 0xb17   :  { %v5986_v57 = vpop.eup %5985 }
 0xb18   :  { %v3078_v33 = vadd.f32 1.0, %v5986_v57 }
 0xb1a   :  { %5987 = vrcp.f32 %v3078_v33 }
 0xb24   :  { %v5988_v9 = vpop.eup %5987 }
 0xb25   :  { %v3081_v21 = vmul.f32 %v5988_v9, %v5986_v57 }
 0xb27   :  { %v3082_v5 = vsel %vm3080_vm13, %v5988_v9, %v3081_v21 }
 0xb28   :  { %v3083_v3 = vmul.f32 %v3082_v5, %v3068_v36 }
 0xb2a   :  { %v3087_v27 = vpack.c.bf16 %v3083_v3, %v3083_v3 }
 0xb2c   :  { %5381 = vmatmul.mubr.msk.bf16.vlgmr.msra.gmra.mrb[116].mxu1 %vm3093_vm14, %v3087_v27 }
 0xb2d   :  { %5386 = vmatprep.mubr.msk.bf16.mxu1 %vm6059_vm7, %v6058_v13 }
 0xbff   :  { %v3135_v37 = vpop.f32.mrb[116].mxu1 }
 0xc00   :  { %v3141_v38 = vand.u32 2147483647, %v3135_v37  ;;  %v5382_v11 = vpop.f32.mrb[117].mxu1  ;;  %vm3147_vm15 = vcmp.ge.f32.partialorder %v3135_v37, 0.0 }
 0xc01   :  { %v3138_v34 = vpop.f32.mrb[118].mxu1 }
 0xc02   :  { %v3142_v45 = vsub.f32 0.0, %v3141_v38  ;;  %v5383_v30 = vpop.f32.mrb[119].mxu1 }
 0xc04   :  { %v3143_v49 = vmul.f32 1.442695, %v3142_v45 }
 0xc06   :  { %5989 = vpow2.f32 %v3143_v49 }
 0xc10   :  { %v5990_v15 = vpop.eup %5989 }
 0xc11   :  { %v3145_v42 = vadd.f32 1.0, %v5990_v15 }
 0xc13   :  { %5991 = vrcp.f32 %v3145_v42 }
 0xc1d   :  { %v5992_v40 = vpop.eup %5991 }
 0xc1e   :  { %v3148_v53 = vmul.f32 %v5992_v40, %v5990_v15 }
 0xc20   :  { %v3149_v20 = vsel %vm3147_vm15, %v5992_v40, %v3148_v53 }
 0xc21   :  { %v3153_v18 = vrot.slane %v3149_v20, %v6408_v61 }
 0xc23   :  { %v3154_v29 = vmul.f32 %v3153_v18, %v7344_v43  ;;  %v3155_v56 = vmul.f32 %v3153_v18, %v2994_v54 }
 0xc25   :  { %v3156_v58 = vadd.f32 %v3154_v29, %v7201_v14  ;;  %v3157_v16 = vadd.f32 %v3155_v56, %v7203_v46 }
 0xc27   :  { %v3158_v44 = vand.u32 2147483647, %v3156_v58  ;;  %v3159_v31 = vand.u32 2147483647, %v3157_v16  ;;  %vm3170_vm0 = vcmp.ge.f32.partialorder %v3156_v58, 0.0  ;;  %vm3171_vm10 = vcmp.ge.f32.partialorder %v3157_v16, 0.0 }
 0xc29   :  { %v3160_v7 = vsub.f32 0.0, %v3158_v44  ;;  %v3161_v51 = vsub.f32 0.0, %v3159_v31 }
 0xc2b   :  { %v3162_v1 = vmul.f32 1.442695, %v3160_v7  ;;  %v3164_v55 = vmul.f32 1.442695, %v3161_v51 }
 0xc2d   :  { %5993 = vpow2.f32 %v3162_v1 }
 0xc2e   :  { %5995 = vpow2.f32 %v3164_v55 }
 0xc37   :  { %v5994_v39 = vpop.eup %5993 }
 0xc38   :  { %v5996_v8 = vpop.eup %5995  ;;  %v3166_v22 = vadd.f32 1.0, %v5994_v39 }
 0xc39   :  { %v3167_v36 = vadd.f32 1.0, %v5996_v8 }
 0xc3a   :  { %5997 = vrcp.f32 %v3166_v22 }
 0xc3b   :  { %5999 = vrcp.f32 %v3167_v36 }
 0xc44   :  { %v5998_v43 = vpop.eup %5997 }
 0xc45   :  { %v6000_v54 = vpop.eup %5999  ;;  %v3172_v17 = vmul.f32 %v5998_v43, %v5994_v39 }
 0xc46   :  { %v3173_v14 = vmul.f32 %v6000_v54, %v5996_v8 }
 0xc47   :  { %v3174_v46 = vsel %vm3170_vm0, %v5998_v43, %v3172_v17 }
 0xc48   :  { %v3175_v59 = vsel %vm3171_vm10, %v6000_v54, %v3173_v14  ;;  %v7372_v28 = vmul.f32 %v3174_v46, %v3156_v58 }
 0xc49   :  { %v7374_v47 = vmul.f32 %v3175_v59, %v3157_v16 }
 0xc4b   :  { %v3178_v2 = vpack.c.bf16 %v7374_v47, %v7372_v28 }
 0xc4d   :  { %5385 = vmatpush3.bf16.msra.mxu1 %v3178_v2 }
 0xc4e   :  { %5432 = vmatprep.subr.bf16.mxu1 %v6058_v13 }
 0xc50   :  { %5387 = vmatmul.mubr.msk.bf16.vlgmr.msra.gmra.mrb[120].mxu1 %vm2671_vm5, %v7210_v50  ;;  %v5759_v50 = vld [vmem:[%s7756_s2 + $0x130] ss:$0 sps:$4 sm:$0xff]  }
 0xc51   :  { %5390 = vmatprep.mubr.msk.bf16.mxu1 %vm6059_vm7, %v6058_v13 }
 0xc58   :  { %5391 = vmatmul.mubr.msk.bf16.gmra.mrb[124].mxu1 %vm2671_vm5, %v7220_v24  ;;  %v3416_v24 = vsel %vm2936_vm6, %v5759_v50, 0 }
 0xc59   :  { %5394 = vmatprep.mubr.msk.bf16.mxu1 %vm6059_vm7, %v6058_v13  ;;  %5427 = vmatpush3.bf16.msra.mxu0 %v3416_v24 }
 0xc5a   :  { %5442 = vmatprep.subr.bf16.mxu0 %v6058_v13 }
 0xc60   :  { %5395 = vmatmul.mubr.msk.bf16.gmra.mrb[128].mxu1 %vm2671_vm5, %v7229_v12  ;;  %v5760_v12 = vld [vmem:[%s7756_s2 + $0x140] sm:$0xff]  }
 0xc61   :  { %5398 = vmatprep.mubr.msk.bf16.mxu1 %vm6059_vm7, %v6058_v13  ;;  %5433 = vmatpush3.bf16.msra.mxu1 %v5760_v12 }
 0xc62   :  { %5434 = vmatprep.subr.bf16.mxu1 %v6058_v13 }
 0xc68   :  { %5399 = vmatmul.mubr.msk.bf16.gmra.mrb[132].mxu1 %vm2671_vm5, %v7238_v32  ;;  %v5761_v32 = vld [vmem:[%s7756_s2 + $0x148] sm:$0xff]  }
 0xc69   :  { %5402 = vmatprep.mubr.msk.bf16.mxu1 %vm6059_vm7, %v6058_v13  ;;  %5435 = vmatpush3.bf16.msra.mxu1 %v5761_v32 }
 0xc6a   :  { %5436 = vmatprep.subr.bf16.mxu1 %v6058_v13 }
 0xc70   :  { %5403 = vmatmul.mubr.msk.bf16.gmra.mrb[136].mxu1 %vm2671_vm5, %v7247_v60 }
 0xc71   :  { %5406 = vmatprep.mubr.msk.bf16.mxu1 %vm6059_vm7, %v6058_v13 }
 0xc78   :  { %5407 = vmatmul.mubr.msk.bf16.gmra.mrb[140].mxu1 %vm2671_vm5, %v7256_v41 }
 0xc79   :  { %5410 = vmatprep.mubr.msk.bf16.mxu1 %vm6059_vm7, %v6058_v13 }
 0xc80   :  { %5411 = vmatmul.mubr.msk.bf16.gmra.mrb[144].mxu1 %vm2671_vm5, %v7265_v63  ;;  %v3284_v63 = vld [vmem:[%s7755_s1 + $0xd0] sm:$0xff] }
 0xc81   :  { %5414 = vmatprep.mubr.msk.bf16.mxu1 %vm6059_vm7, %v6058_v13  ;;  %v3289_v23 = vrot.slane %v3284_v63, %v6408_v61  ;;  %v3295_v57 = vrot.slane %v3284_v63, %v6414_v0  ;;  %v3303_v34 = vrot.slane %v3284_v63, %v6450_v48  ;;  %v3311_v20 = vrot.slane %v3284_v63, %v6461_v25 }
 0xc82   :  { %v3319_v51 = vrot.slane %v3284_v63, %v6466_v62  ;;  %v3327_v17 = vrot.slane %v3284_v63, %v6492_v35 }
 0xc88   :  { %5415 = vmatmul.mubr.msk.bf16.gmra.mrb[148].mxu1 %vm2671_vm5, %v7274_v6 }
 0xc89   :  { %5418 = vmatprep.mubr.msk.bf16.mxu1 %vm6059_vm7, %v6058_v13 }
 0xc90   :  { %5419 = vmatmul.mubr.msk.bf16.gmra.mrb[152].mxu1 %vm2671_vm5, %v7283_v4 }
 0xc91   :  { %5438 = vmatprep.mubr.msk.bf16.mxu1 %vm6059_vm7, %v6058_v13 }
 0xd23   :  { %v3213_v60 = vpop.f32.mrb[120].mxu1 }
 0xd24   :  { %v5388_v41 = vpop.f32.mrb[121].mxu1  ;;  %v3290_v9 = vmul.f32 %v3289_v23, %v3213_v60  ;;  %v3335_v60 = vrot.slane %v3284_v63, %v6540_v26 }
 0xd25   :  { %v3216_v6 = vpop.f32.mrb[122].mxu1 }
 0xd26   :  { %v5389_v4 = vpop.f32.mrb[123].mxu1  ;;  %v3291_v27 = vmul.f32 %v3289_v23, %v3216_v6 }
 0xd2b   :  { %v3221_v33 = vpop.f32.mrb[124].mxu1 }
 0xd2c   :  { %v3296_v21 = vmul.f32 %v3295_v57, %v3221_v33  ;;  %v5392_v5 = vpop.f32.mrb[125].mxu1 }
 0xd2d   :  { %v3224_v3 = vpop.f32.mrb[126].mxu1  ;;  %v3343_v5 = vrot.slane %v3284_v63, %v6557_v52 }
 0xd2e   :  { %v3298_v10 = vadd.f32 %v3296_v21, %v3290_v9  ;;  %v3297_v37 = vmul.f32 %v3295_v57, %v3224_v3  ;;  %v5393_v38 = vpop.f32.mrb[127].mxu1 }
 0xd30   :  { %v3299_v11 = vadd.f32 %v3297_v37, %v3291_v27 }
 0xd33   :  { %v3229_v45 = vpop.f32.mrb[128].mxu1 }
 0xd34   :  { %v3304_v30 = vmul.f32 %v3303_v34, %v3229_v45  ;;  %v5396_v49 = vpop.f32.mrb[129].mxu1 }
 0xd35   :  { %v3232_v15 = vpop.f32.mrb[130].mxu1 }
 0xd36   :  { %v3306_v19 = vadd.f32 %v3304_v30, %v3298_v10  ;;  %v3305_v42 = vmul.f32 %v3303_v34, %v3232_v15  ;;  %v5397_v40 = vpop.f32.mrb[131].mxu1  ;;  %v4901_v30 = vld [vmem:[%s7755_s1 + $0xd8] ss:$0 sm:$0xff] }
 0xd38   :  { %v3307_v53 = vadd.f32 %v3305_v42, %v3299_v11  ;;  %v4902_v42 = vld [vmem:[%s7755_s1 + $0xe0] ss:$0 sm:$0xff] }
 0xd3b   :  { %v3237_v18 = vpop.f32.mrb[132].mxu1 }
 0xd3c   :  { %v3312_v29 = vmul.f32 %v3311_v20, %v3237_v18  ;;  %v5400_v56 = vpop.f32.mrb[133].mxu1  ;;  %v4903_v18 = vld [vmem:[%s7755_s1 + $0xe8] ss:$0 sm:$0xff] }
 0xd3d   :  { %v3240_v58 = vpop.f32.mrb[134].mxu1 }
 0xd3e   :  { %v3314_v16 = vadd.f32 %v3312_v29, %v3306_v19  ;;  %v3313_v44 = vmul.f32 %v3311_v20, %v3240_v58  ;;  %v5401_v31 = vpop.f32.mrb[135].mxu1 }
 0xd40   :  { %v3315_v7 = vadd.f32 %v3313_v44, %v3307_v53 }
 0xd43   :  { %v3245_v1 = vpop.f32.mrb[136].mxu1 }
 0xd44   :  { %v3320_v55 = vmul.f32 %v3319_v51, %v3245_v1  ;;  %v5404_v39 = vpop.f32.mrb[137].mxu1 }
 0xd45   :  { %v3248_v8 = vpop.f32.mrb[138].mxu1 }
 0xd46   :  { %v3322_v22 = vadd.f32 %v3320_v55, %v3314_v16  ;;  %v3321_v36 = vmul.f32 %v3319_v51, %v3248_v8  ;;  %v5405_v43 = vpop.f32.mrb[139].mxu1 }
 0xd48   :  { %v3323_v54 = vadd.f32 %v3321_v36, %v3315_v7 }
 0xd4b   :  { %v3253_v14 = vpop.f32.mrb[140].mxu1 }
 0xd4c   :  { %v3328_v46 = vmul.f32 %v3327_v17, %v3253_v14  ;;  %v5408_v59 = vpop.f32.mrb[141].mxu1 }
 0xd4d   :  { %v3256_v2 = vpop.f32.mrb[142].mxu1 }
 0xd4e   :  { %v3330_v50 = vadd.f32 %v3328_v46, %v3322_v22  ;;  %v3329_v24 = vmul.f32 %v3327_v17, %v3256_v2  ;;  %v5409_v12 = vpop.f32.mrb[143].mxu1 }
 0xd50   :  { %v3331_v32 = vadd.f32 %v3329_v24, %v3323_v54 }
 0xd53   :  { %v3261_v41 = vpop.f32.mrb[144].mxu1 }
 0xd54   :  { %v3336_v6 = vmul.f32 %v3335_v60, %v3261_v41  ;;  %v5412_v4 = vpop.f32.mrb[145].mxu1  ;;  %v4913_v41 = vld [vmem:[%s7755_s1 + $0xf0] ss:$0 sm:$0xff] }
 0xd55   :  { %v3264_v23 = vpop.f32.mrb[146].mxu1  ;;  %v4914_v4 = vld [vmem:[%s7755_s1 + $0xf8] ss:$0 sm:$0xff] }
 0xd56   :  { %v3338_v57 = vadd.f32 %v3336_v6, %v3330_v50  ;;  %v3337_v33 = vmul.f32 %v3335_v60, %v3264_v23  ;;  %v5413_v9 = vpop.f32.mrb[147].mxu1 }
 0xd58   :  { %v3339_v21 = vadd.f32 %v3337_v33, %v3331_v32  ;;  %v5762_v32 = vld [vmem:[%s7756_s2 + $0x150] ss:$0 sps:$4 sm:$0xff]  }
 0xd59   :  { %v3509_v60 = vsel %vm2936_vm6, %v5762_v32, 0 }
 0xd5a   :  { %5437 = vmatpush3.bf16.msra.mxu1 %v3509_v60 }
 0xd5b   :  { %v3269_v3 = vpop.f32.mrb[148].mxu1  ;;  %5462 = vmatprep.subr.bf16.mxu1 %v6058_v13 }
 0xd5c   :  { %v3344_v27 = vmul.f32 %v3343_v5, %v3269_v3  ;;  %v5416_v10 = vpop.f32.mrb[149].mxu1 }
 0xd5d   :  { %v3272_v37 = vpop.f32.mrb[150].mxu1 }
 0xd5e   :  { %v3346_v38 = vadd.f32 %v3344_v27, %v3338_v57  ;;  %v3345_v11 = vmul.f32 %v3343_v5, %v3272_v37  ;;  %v5417_v34 = vpop.f32.mrb[151].mxu1 }
 0xd60   :  { %v3347_v45 = vadd.f32 %v3345_v11, %v3339_v21 }
 0xd63   :  { %v3277_v49 = vpop.f32.mrb[152].mxu1 }
 0xd64   :  { %v3352_v15 = vmul.f32 %v4901_v30, %v3277_v49  ;;  %v5420_v19 = vpop.f32.mrb[153].mxu1 }
 0xd65   :  { %v3280_v63 = vpop.f32.mrb[154].mxu1 }
 0xd66   :  { %v3354_v40 = vadd.f32 %v3352_v15, %v3346_v38  ;;  %v3353_v53 = vmul.f32 %v4901_v30, %v3280_v63  ;;  %v5421_v20 = vpop.f32.mrb[155].mxu1 }
 0xd68   :  { %v3361_v29 = vmul.f32 %v4902_v42, %v3354_v40  ;;  %v3355_v56 = vadd.f32 %v3353_v53, %v3347_v45 }
 0xd6a   :  { %v3368_v58 = vadd.f32 %v4903_v18, %v3361_v29  ;;  %v3362_v16 = vmul.f32 %v4902_v42, %v3355_v56  ;;  %v5763_v42 = vld [vmem:[%s7756_s2 + $0x160] sm:$0x1f]  }
 0xd6b   :  { %v3574_v63 = vsel %vm3097_vm12, %v5763_v42, 0  ;;  %v5767_v42 = vld [vmem:[%s7756_s2 + $0x1a0] sm:$0xff]  }
 0xd6c   :  { %v3370_v44 = vand.u32 2147483647, %v3368_v58  ;;  %v3369_v31 = vadd.f32 %v4903_v18, %v3362_v16  ;;  %vm3382_vm1 = vcmp.ge.f32.partialorder %v3368_v58, 0.0 }
 0xd6e   :  { %v3372_v7 = vsub.f32 0.0, %v3370_v44  ;;  %v3371_v51 = vand.u32 2147483647, %v3369_v31  ;;  %vm3383_vm2 = vcmp.ge.f32.partialorder %v3369_v31, 0.0 }
 0xd70   :  { %v3374_v1 = vmul.f32 1.442695, %v3372_v7  ;;  %v3373_v55 = vsub.f32 0.0, %v3371_v51 }
 0xd72   :  { %6001 = vpow2.f32 %v3374_v1  ;;  %v3376_v39 = vmul.f32 1.442695, %v3373_v55 }
 0xd74   :  { %6003 = vpow2.f32 %v3376_v39 }
 0xd7c   :  { %v6002_v8 = vpop.eup %6001 }
 0xd7d   :  { %v3378_v22 = vadd.f32 1.0, %v6002_v8 }
 0xd7e   :  { %v6004_v36 = vpop.eup %6003 }
 0xd7f   :  { %6005 = vrcp.f32 %v3378_v22  ;;  %v3379_v43 = vadd.f32 1.0, %v6004_v36 }
 0xd81   :  { %6007 = vrcp.f32 %v3379_v43 }
 0xd89   :  { %v6006_v54 = vpop.eup %6005 }
 0xd8a   :  { %v3384_v17 = vmul.f32 %v6006_v54, %v6002_v8 }
 0xd8b   :  { %v6008_v14 = vpop.eup %6007 }
 0xd8c   :  { %v3386_v46 = vsel %vm3382_vm1, %v6006_v54, %v3384_v17  ;;  %v3385_v59 = vmul.f32 %v6008_v14, %v6004_v36 }
 0xd8d   :  { %v3388_v50 = vmul.f32 %v3386_v46, %v3368_v58 }
 0xd8e   :  { %v3387_v2 = vsel %vm3383_vm2, %v6008_v14, %v3385_v59 }
 0xd8f   :  { %v3389_v24 = vmul.f32 %v3387_v2, %v3369_v31 }
 0xd91   :  { %v3396_v12 = vpack.c.bf16 %v3389_v24, %v3388_v50 }
 0xd93   :  { %5429 = vmatmul.mubr.msk.bf16.vlgmr.msra.gmra.mrb[144].mxu0 %vm2932_vm11, %v3396_v12 }
 0xd94   :  { %5444 = vmatprep.mubr.msk.bf16.mxu0 %vm6059_vm7, %v6058_v13  ;;  %5443 = vmatpush3.bf16.msra.mxu0 %v3574_v63  ;;  %v5768_v63 = vld [vmem:[%s7756_s2 + $0x1a8] sm:$0xff]  }
 0xd95   :  { %5448 = vmatprep.subr.bf16.mxu0 %v6058_v13 }
 0xe66   :  { %v3452_v6 = vpop.f32.mrb[144].mxu0 }
 0xe67   :  { %v3464_v23 = vmul.f32 %v4913_v41, %v3452_v6  ;;  %v5430_v57 = vpop.f32.mrb[145].mxu0 }
 0xe68   :  { %v3455_v33 = vpop.f32.mrb[146].mxu0 }
 0xe69   :  { %v3471_v9 = vadd.f32 %v4914_v4, %v3464_v23  ;;  %v3465_v21 = vmul.f32 %v4913_v41, %v3455_v33  ;;  %v5431_v5 = vpop.f32.mrb[147].mxu0 }
 0xe6b   :  { %v3472_v3 = vadd.f32 %v4914_v4, %v3465_v21  ;;  %v3473_v27 = vsel %vm2932_vm11, %v3471_v9, 0.0 }
 0xe6d   :  { %v3474_v10 = vsel %vm2932_vm11, %v3472_v3, 0.0 }
 0xe6e   :  { %v3475_v37 = vadd.f32 %v3474_v10, %v3473_v27 }
 0xe70   :  { %v3476_v38 = vrot.slane %v3475_v37, 4 }
 0xe72   :  { %v3477_v11 = vadd.f32 %v3476_v38, %v3475_v37 }
 0xe74   :  { %v3478_v34 = vrot.slane %v3477_v11, 2 }
 0xe76   :  { %v3479_v45 = vadd.f32 %v3478_v34, %v3477_v11 }
 0xe78   :  { %v3480_v30 = vrot.slane %v3479_v45, 1 }
 0xe7a   :  { %v3481_v49 = vadd.f32 %v3480_v30, %v3479_v45 }
 0xe7c   :  { %v3482_v15 = vmul.f32 0.0625, %v3481_v49  ;;  %v5764_v49 = vld [vmem:[%s7760_s7] sm:$0xff]  }
 0xe7e   :  { %v3489_v19 = vpack.c.bf16 %v3482_v15, %v3482_v15  ;;  %v5765_v15 = vld [vmem:[%s7760_s7 + $0x8] sm:$0xff]  }
 0xe80   :  { %5439 = vmatmul.mubr.msk.bf16.vlgmr.msra.gmra.mrb[156].mxu1 %vm2932_vm11, %v3489_v19  ;;  %v5766_v19 = vld [vmem:[%s7760_s7 + $0x10] ss:$0 sps:$4 sm:$0x33]  }
 0xe81   :  { %5468 = vmatprep.mubr.msk.bf16.mxu1 %vm6059_vm7, %v6058_v13  ;;  %5463 = vmatpush3.bf16.msra.mxu1 %v5767_v42 }
 0xe82   :  { %5464 = vmatprep.subr.bf16.mxu1 %v6058_v13 }
 0xe85   :  { %5465 = vmatpush3.bf16.msra.mxu1 %v5768_v63 }
 0xe86   :  { %5466 = vmatprep.subr.bf16.mxu1 %v6058_v13 }
 0xf53   :  { %v3545_v40 = vpop.f32.mrb[156].mxu1 }
 0xf54   :  { %v3551_v53 = vand.u32 2147483647, %v3545_v40  ;;  %v5440_v20 = vpop.f32.mrb[157].mxu1  ;;  %vm3557_vm4 = vcmp.ge.f32.partialorder %v3545_v40, 0.0 }
 0xf55   :  { %v3548_v18 = vpop.f32.mrb[158].mxu1  ;;  %v3739_v20 = vld [vmem:[%s7755_s1 + $0x100] sm:$0xff] }
 0xf56   :  { %v3552_v29 = vsub.f32 0.0, %v3551_v53  ;;  %v5441_v56 = vpop.f32.mrb[159].mxu1  ;;  %v3749_v18 = vrot.slane %v3739_v20, %v6414_v0  ;;  %v3779_v0 = vrot.slane %v3739_v20, %v6492_v35 }
 0xf57   :  { %v3764_v56 = vrot.slane %v3739_v20, %v6461_v25  ;;  %v3794_v25 = vrot.slane %v3739_v20, %v6557_v52  ;;  %v4934_v52 = vld [vmem:[%s7755_s1 + $0x108] ss:$0 sm:$0xff] }
 0xf58   :  { %v3553_v58 = vmul.f32 1.442695, %v3552_v29  ;;  %v3744_v29 = vrot.slane %v3739_v20, %v6408_v61 }
 0xf5a   :  { %6009 = vpow2.f32 %v3553_v58 }
 0xf64   :  { %v6010_v16 = vpop.eup %6009 }
 0xf65   :  { %v3555_v44 = vadd.f32 1.0, %v6010_v16 }
 0xf67   :  { %6011 = vrcp.f32 %v3555_v44 }
 0xf71   :  { %v6012_v31 = vpop.eup %6011 }
 0xf72   :  { %v3558_v7 = vmul.f32 %v6012_v31, %v6010_v16 }
 0xf74   :  { %v3559_v51 = vsel %vm3557_vm4, %v6012_v31, %v3558_v7  ;;  %v3758_v31 = vrot.slane %v3739_v20, %v6450_v48 }
 0xf75   :  { %v3560_v1 = vmul.f32 %v3559_v51, %v3545_v40  ;;  %v5769_v40 = vld [vmem:[%s7756_s2 + $0x1b0] ss:$0 sps:$4 sm:$0xff]  }
 0xf76   :  { %v3859_v53 = vsel %vm2936_vm6, %v5769_v40, 0 }
 0xf77   :  { %v3564_v55 = vpack.c.bf16 %v3560_v1, %v3560_v1  ;;  %5467 = vmatpush3.bf16.msra.mxu1 %v3859_v53  ;;  %v5770_v53 = vld [vmem:[%s7756_s2 + $0x180] sm:$0xff]  }
 0xf78   :  { %5472 = vmatprep.subr.bf16.mxu1 %v6058_v13 }
 0xf79   :  { %5445 = vmatmul.mubr.msk.bf16.vlgmr.msra.gmra.mrb[148].mxu0 %vm3093_vm14, %v3564_v55  ;;  %vm4472_vm14 = vcmask 420864  }
 0xf7a   :  { %5450 = vmatprep.mubr.msk.bf16.mxu0 %vm6059_vm7, %v6058_v13 }
0x104c   :  { %v3610_v39 = vpop.f32.mrb[148].mxu0 }
0x104d   :  { %v3616_v8 = vand.u32 2147483647, %v3610_v39  ;;  %v5446_v22 = vpop.f32.mrb[149].mxu0  ;;  %vm3622_vm8 = vcmp.ge.f32.partialorder %v3610_v39, 0.0 }
0x104e   :  { %v3613_v36 = vpop.f32.mrb[150].mxu0 }
0x104f   :  { %v3617_v43 = vsub.f32 0.0, %v3616_v8  ;;  %v5447_v54 = vpop.f32.mrb[151].mxu0  ;;  %v3773_v36 = vrot.slane %v3739_v20, %v6466_v62 }
0x1051   :  { %v3618_v17 = vmul.f32 1.442695, %v3617_v43 }
0x1053   :  { %6013 = vpow2.f32 %v3618_v17 }
0x105d   :  { %v6014_v14 = vpop.eup %6013 }
0x105e   :  { %v3620_v46 = vadd.f32 1.0, %v6014_v14 }
0x1060   :  { %6015 = vrcp.f32 %v3620_v46 }
0x106a   :  { %v6016_v59 = vpop.eup %6015 }
0x106b   :  { %v3623_v2 = vmul.f32 %v6016_v59, %v6014_v14  ;;  %v3788_v14 = vrot.slane %v3739_v20, %v6540_v26 }
0x106d   :  { %v3624_v50 = vsel %vm3622_vm8, %v6016_v59, %v3623_v2 }
0x106e   :  { %v3628_v24 = vrot.slane %v3624_v50, %v6408_v61 }
0x1070   :  { %v3629_v12 = vmul.f32 %v3628_v24, %v3471_v9  ;;  %v3630_v32 = vmul.f32 %v3628_v24, %v3472_v3 }
0x1072   :  { %v3631_v60 = vadd.f32 %v3629_v12, %v7372_v28  ;;  %v3632_v41 = vadd.f32 %v3630_v32, %v7374_v47 }
0x1074   :  { %v3633_v6 = vand.u32 2147483647, %v3631_v60  ;;  %v3634_v4 = vand.u32 2147483647, %v3632_v41  ;;  %vm3645_vm9 = vcmp.ge.f32.partialorder %v3631_v60, 0.0  ;;  %vm3646_vm12 = vcmp.ge.f32.partialorder %v3632_v41, 0.0 }
0x1076   :  { %v3635_v23 = vsub.f32 0.0, %v3633_v6  ;;  %v3636_v57 = vsub.f32 0.0, %v3634_v4 }
0x1078   :  { %v3637_v33 = vmul.f32 1.442695, %v3635_v23  ;;  %v3639_v21 = vmul.f32 1.442695, %v3636_v57 }
0x107a   :  { %6017 = vpow2.f32 %v3637_v33 }
0x107b   :  { %6019 = vpow2.f32 %v3639_v21 }
0x1084   :  { %v6018_v5 = vpop.eup %6017 }
0x1085   :  { %v6020_v27 = vpop.eup %6019  ;;  %v3641_v10 = vadd.f32 1.0, %v6018_v5 }
0x1086   :  { %v3642_v37 = vadd.f32 1.0, %v6020_v27 }
0x1087   :  { %6021 = vrcp.f32 %v3641_v10 }
0x1088   :  { %6023 = vrcp.f32 %v3642_v37  ;;  %v4935_v37 = vld [vmem:[%s7755_s1 + $0x110] ss:$0 sm:$0xff] }
0x1091   :  { %v6022_v9 = vpop.eup %6021 }
0x1092   :  { %v6024_v3 = vpop.eup %6023  ;;  %v3647_v38 = vmul.f32 %v6022_v9, %v6018_v5 }
0x1093   :  { %v3648_v28 = vmul.f32 %v6024_v3, %v6020_v27 }
0x1094   :  { %v3649_v47 = vsel %vm3645_vm9, %v6022_v9, %v3647_v38 }
0x1095   :  { %v3650_v11 = vsel %vm3646_vm12, %v6024_v3, %v3648_v28  ;;  %v3651_v34 = vmul.f32 %v3649_v47, %v3631_v60  ;;  %v4936_v28 = vld [vmem:[%s7755_s1 + $0x118] ss:$0 sm:$0xff] }
0x1096   :  { %v3652_v45 = vmul.f32 %v3650_v11, %v3632_v41 }
0x1097   :  { %3653 = vst.msk [vmem:[%s7761_s9] sm:$0xff] %vm2932_vm11, %v3651_v34 }
0x1098   :  { %3654 = vst.msk [vmem:[%s7761_s9 + $0x8] sm:$0xff] %vm2932_vm11, %v3652_v45  ;;  %v3660_v30 = vpack.c.bf16 %v3652_v45, %v3651_v34 }
0x109a   :  { %5449 = vmatpush3.bf16.msra.mxu0 %v3660_v30 }
0x109b   :  { %5482 = vmatprep.subr.bf16.mxu0 %v6058_v13 }
0x109d   :  { %5451 = vmatmul.mubr.msk.bf16.vlgmr.msra.gmra.mrb[152].mxu0 %vm2671_vm5, %v5764_v49 }
0x109e   :  { %5454 = vmatprep.mubr.msk.bf16.mxu0 %vm6059_vm7, %v6058_v13 }
0x10a5   :  { %5455 = vmatmul.mubr.msk.bf16.gmra.mrb[156].mxu0 %vm2671_vm5, %v5765_v15 }
0x10a6   :  { %5458 = vmatprep.mubr.msk.bf16.mxu0 %vm6059_vm7, %v6058_v13 }
0x10ad   :  { %5459 = vmatmul.mubr.msk.bf16.gmra.mrb[160].mxu0 %vm2671_vm5, %v5766_v19 }
0x10ae   :  { %5490 = vmatprep.mubr.msk.bf16.mxu0 %vm6059_vm7, %v6058_v13 }
0x1170   :  { %v3717_v58 = vpop.f32.mrb[152].mxu0 }
0x1171   :  { %v3750_v16 = vmul.f32 %v3749_v18, %v3717_v58  ;;  %v5452_v44 = vpop.f32.mrb[153].mxu0  ;;  %v3745_v51 = vmul.f32 %v3744_v29, %v3717_v58  ;;  %v5771_v18 = vld [vmem:[%s7756_s2 + $0x188] sm:$0xff]   ;;  %v5772_v29 = vld [vmem:[%s7756_s2 + $0x190] ss:$0 sps:$4 sm:$0xff]  }
0x1172   :  { %v3720_v7 = vpop.f32.mrb[154].mxu0  ;;  %v5774_v44 = vld [vmem:[%s7756_s2 + $0x1c8] sm:$0xff]  }
0x1173   :  { %v3752_v1 = vrot.slane %v3750_v16, 4  ;;  %v3765_v55 = vmul.f32 %v3764_v56, %v3720_v7  ;;  %v5453_v39 = vpop.f32.mrb[155].mxu0  ;;  %v3759_v22 = vmul.f32 %v3758_v31, %v3720_v7  ;;  %v3936_v56 = vsel %vm2936_vm6, %v5772_v29, 0  ;;  %v5773_v16 = vld [vmem:[%s7756_s2 + $0x1c0] sm:$0xff]   ;;  %v5775_v31 = vld [vmem:[%s7756_s2 + $0x1d0] sm:$0xff]  }
0x1174   :  { %5483 = vmatpush3.bf16.msra.mxu0 %v5773_v16  ;;  %v5776_v7 = vld [vmem:[%s7756_s2 + $0x1d8] ss:$0 sps:$4 sm:$0x33]   ;;  %v5779_v39 = vld [vmem:[%s7756_s2 + $0x210] sm:$0xff]  }
0x1175   :  { %v3754_v8 = vadd.f32 %v3752_v1, %v3745_v51  ;;  %v3767_v54 = vrot.slane %v3765_v55, 4  ;;  %5484 = vmatprep.subr.bf16.mxu0 %v6058_v13  ;;  %v4036_v51 = vsel %vm1861_vm3, %v5776_v7, 0  ;;  %v5777_v1 = vld [vmem:[%s7756_s2 + $0x200] sm:$0xff]   ;;  %v5778_v55 = vld [vmem:[%s7756_s2 + $0x208] sm:$0xff]   ;;  %v5783_v29 = vld [vmem:[%s7756_s2 + $0x230] sm:$0xff]  }
0x1177   :  { %v3760_v43 = vadd.f32 %v3759_v22, %v3754_v8  ;;  %v5780_v8 = vld [vmem:[%s7756_s2 + $0x218] ss:$0 sps:$4 sm:$0x33]  }
0x1178   :  { %v3725_v17 = vpop.f32.mrb[156].mxu0  ;;  %5485 = vmatpush3.bf16.msra.mxu0 %v5774_v44  ;;  %v4165_v22 = vsel %vm1861_vm3, %v5780_v8, 0 }
0x1179   :  { %v3769_v46 = vadd.f32 %v3767_v54, %v3760_v43  ;;  %v3774_v48 = vmul.f32 %v3773_v36, %v3725_v17  ;;  %v3780_v59 = vmul.f32 %v3779_v0, %v3725_v17  ;;  %v3902_v2 = vrot.slane %v3725_v17, 4  ;;  %v5456_v50 = vpop.f32.mrb[157].mxu0  ;;  %5486 = vmatprep.subr.bf16.mxu0 %v6058_v13  ;;  %v4942_v36 = vld [vmem:[%s7755_s1 + $0x120] ss:$0 sm:$0xff]  ;;  %v4956_v43 = vld [vmem:[%s7755_s1 + $0x128] ss:$0 sm:$0xff] }
0x117a   :  { %v3728_v24 = vpop.f32.mrb[158].mxu0 }
0x117b   :  { %v3775_v12 = vadd.f32 %v3774_v48, %v3769_v46  ;;  %v3782_v32 = vrot.slane %v3780_v59, 4  ;;  %v3795_v60 = vmul.f32 %v3794_v25, %v3728_v24  ;;  %v5457_v41 = vpop.f32.mrb[159].mxu0  ;;  %v3906_v62 = vrot.slane %v3728_v24, 4 }
0x117c   :  { %v3904_v6 = vmax.f32 %v3725_v17, %v3902_v2  ;;  %v3789_v4 = vmul.f32 %v3788_v14, %v3728_v24  ;;  %5487 = vmatpush3.bf16.msra.mxu0 %v5775_v31  ;;  %v4957_v17 = vld [vmem:[%s7755_s1 + $0x130] ss:$0 sm:$0xff] }
0x117d   :  { %v3784_v35 = vadd.f32 %v3782_v32, %v3775_v12  ;;  %v3797_v57 = vrot.slane %v3795_v60, 4  ;;  %5488 = vmatprep.subr.bf16.mxu0 %v6058_v13 }
0x117e   :  { %v3908_v23 = vmax.f32 %v3904_v6, %v3906_v62  ;;  %v4979_v6 = vld [vmem:[%s7755_s1 + $0x148] ss:$0 sm:$0xff] }
0x117f   :  { %v3790_v26 = vadd.f32 %v3789_v4, %v3784_v35  ;;  %v4998_v35 = vld [vmem:[%s7755_s1 + $0x158] ss:$0 sm:$0xff] }
0x1180   :  { %v3733_v33 = vpop.f32.mrb[160].mxu0  ;;  %5489 = vmatpush3.bf16.msra.mxu0 %v4036_v51  ;;  %v5785_v51 = vld [vmem:[%s7756_s2 + $0x260] sm:$0xff]  }
0x1181   :  { %v3799_v21 = vadd.f32 %v3797_v57, %v3790_v26  ;;  %v3804_v5 = vmul.f32 %v4934_v52, %v3733_v33  ;;  %v3909_v27 = vmax.f32 %v3908_v23, %v3733_v33  ;;  %v5460_v10 = vpop.f32.mrb[161].mxu0  ;;  %5506 = vmatprep.subr.bf16.mxu0 %v6058_v13  ;;  %v4980_v52 = vld [vmem:[%s7755_s1 + $0x150] ss:$0 sm:$0xff]  ;;  %v4999_v23 = vld [vmem:[%s7755_s1 + $0x160] ss:$0 sm:$0xff] }
0x1182   :  { %v3736_v9 = vpop.f32.mrb[162].mxu0 }
0x1183   :  { %v3805_v3 = vadd.f32 %v3804_v5, %v3799_v21  ;;  %v5461_v38 = vpop.f32.mrb[163].mxu0  ;;  %v3916_v58 = vpack.c.bf16 %v3909_v27, %v3909_v27 }
0x1185   :  { %v3811_v47 = vmul.f32 %v4935_v37, %v3805_v3 }
0x1187   :  { %v3817_v11 = vadd.f32 %v4936_v28, %v3811_v47 }
0x1189   :  { %v3818_v34 = vand.u32 2147483647, %v3817_v11  ;;  %vm3824_vm5 = vcmp.ge.f32.partialorder %v3817_v11, 0.0 }
0x118b   :  { %v3819_v45 = vsub.f32 0.0, %v3818_v34 }
0x118d   :  { %v3820_v30 = vmul.f32 1.442695, %v3819_v45 }
0x118f   :  { %6025 = vpow2.f32 %v3820_v30 }
0x1199   :  { %v6026_v49 = vpop.eup %6025 }
0x119a   :  { %v3822_v15 = vadd.f32 1.0, %v6026_v49 }
0x119c   :  { %6027 = vrcp.f32 %v3822_v15 }
0x11a6   :  { %v6028_v19 = vpop.eup %6027 }
0x11a7   :  { %v3825_v42 = vmul.f32 %v6028_v19, %v6026_v49 }
0x11a9   :  { %v3826_v63 = vsel %vm3824_vm5, %v6028_v19, %v3825_v42  ;;  %v5781_v19 = vld [vmem:[%s7756_s2 + $0x220] sm:$0xff]  }
0x11aa   :  { %v3827_v40 = vmul.f32 %v3826_v63, %v3817_v11 }
0x11ac   :  { %v3834_v20 = vpack.c.bf16 %v3827_v40, %v3827_v40 }
0x11ae   :  { %5469 = vmatmul.mubr.msk.bf16.vlgmr.msra.gmra.mrb[160].mxu1 %vm2932_vm11, %v3834_v20 }
0x11af   :  { %5473 = vmatpush3.bf16.msra.mxu1 %v5770_v53  ;;  %5478 = vmatprep.mubr.msk.bf16.mxu1 %vm6059_vm7, %v6058_v13  ;;  %v5782_v53 = vld [vmem:[%s7756_s2 + $0x228] sm:$0xff]  }
0x11b0   :  { %5474 = vmatprep.subr.bf16.mxu1 %v6058_v13 }
0x11b3   :  { %5475 = vmatpush3.bf16.msra.mxu1 %v5771_v18 }
0x11b4   :  { %5476 = vmatprep.subr.bf16.mxu1 %v6058_v13 }
0x11b7   :  { %5477 = vmatpush3.bf16.msra.mxu1 %v3936_v56  ;;  %v5784_v56 = vld [vmem:[%s7756_s2 + $0x238] ss:$0 sps:$4 sm:$0x33]  }
0x11b8   :  { %5494 = vmatprep.subr.bf16.mxu1 %v6058_v13  ;;  %v4330_v44 = vsel %vm1861_vm3, %v5784_v56, 0 }
0x11ba   :  { %5479 = vmatmul.mubr.msk.bf16.vlgmr.msra.gmra.mrb[160].mxu1 %vm2932_vm11, %v3916_v58  ;;  %vm4031_vm11 = vcmask 424960  }
0x11bb   :  { %5502 = vmatprep.mubr.msk.bf16.mxu1 %vm6059_vm7, %v6058_v13  ;;  %5495 = vmatpush3.bf16.msra.mxu1 %v5777_v1 }
0x11bc   :  { %5496 = vmatprep.subr.bf16.mxu1 %v6058_v13 }
0x11bf   :  { %5497 = vmatpush3.bf16.msra.mxu1 %v5778_v55 }
0x11c0   :  { %5498 = vmatprep.subr.bf16.mxu1 %v6058_v13 }
0x11c3   :  { %5499 = vmatpush3.bf16.msra.mxu1 %v5779_v39  ;;  %v5786_v39 = vld [vmem:[%s7756_s2 + $0x268] sm:$0xff]  }
0x11c4   :  { %5500 = vmatprep.subr.bf16.mxu1 %v6058_v13 }
0x11c7   :  { %5501 = vmatpush3.bf16.msra.mxu1 %v4165_v22  ;;  %v5787_v22 = vld [vmem:[%s7756_s2 + $0x270] sm:$0xff]  }
0x11c8   :  { %5518 = vmatprep.subr.bf16.mxu1 %v6058_v13 }
0x128d   :  { %v3972_v0 = vpop.f32.mrb[160].mxu1 }
0x128e   :  { %v5576_v54 = vadd.f32 %v4942_v36, %v3972_v0  ;;  %v5480_v25 = vpop.f32.mrb[161].mxu1  ;;  %v5788_v36 = vld [vmem:[%s7756_s2 + $0x278] ss:$0 sps:$4 sm:$0x33]  }
0x128f   :  { %v3975_v14 = vpop.f32.mrb[162].mxu1 }
0x1290   :  { %v3984_v46 = vmul.f32 %v5576_v54, %v4956_v43  ;;  %v5481_v48 = vpop.f32.mrb[163].mxu1  ;;  %v4516_v43 = vsel %vm1861_vm3, %v5788_v36, 0  ;;  %v5790_v14 = vld [vmem:[%s7756_s2 + $0x1e8] sm:$0xff]  }
0x1291   :  { %v5792_v48 = vld [vmem:[%s7756_s2 + $0x1f8] ss:$0 sps:$4 sm:$0x33]  }
0x1292   :  { %v3990_v59 = vadd.f32 %v4957_v17, %v3984_v46  ;;  %v5789_v17 = vld [vmem:[%s7756_s2 + $0x1e0] sm:$0xff]   ;;  %v5791_v46 = vld [vmem:[%s7756_s2 + $0x1f0] sm:$0xff]  }
0x1294   :  { %v3991_v2 = vand.u32 2147483647, %v3990_v59  ;;  %vm3997_vm6 = vcmp.ge.f32.partialorder %v3990_v59, 0.0 }
0x1296   :  { %v3992_v50 = vsub.f32 0.0, %v3991_v2  ;;  %v5012_v2 = vld [vmem:[%s7755_s1 + $0x168] ss:$0 sm:$0xff] }
0x1298   :  { %v3993_v24 = vmul.f32 1.442695, %v3992_v50 }
0x129a   :  { %6029 = vpow2.f32 %v3993_v24  ;;  %v5013_v24 = vld [vmem:[%s7755_s1 + $0x170] ss:$0 sm:$0xff] }
0x12a4   :  { %v6030_v12 = vpop.eup %6029 }
0x12a5   :  { %v3995_v32 = vadd.f32 1.0, %v6030_v12 }
0x12a7   :  { %6031 = vrcp.f32 %v3995_v32 }
0x12b1   :  { %v6032_v60 = vpop.eup %6031 }
0x12b2   :  { %v3998_v41 = vmul.f32 %v6032_v60, %v6030_v12  ;;  %v4970_v12 = vld [vmem:[%s7755_s1 + $0x138] ss:$0 sm:$0xff] }
0x12b4   :  { %v3999_v62 = vsel %vm3997_vm6, %v6032_v60, %v3998_v41  ;;  %v4971_v41 = vld [vmem:[%s7755_s1 + $0x140] ss:$0 sm:$0xff] }
0x12b5   :  { %v7606_v4 = vmul.f32 %v3999_v62, %v3990_v59  ;;  %v4232_v59 = vsel %vm1861_vm3, %v5792_v48, 0 }
0x12b7   :  { %v4009_v26 = vpack.c.bf16 %v7606_v4, %v7606_v4  ;;  %v4114_v57 = vmul.f32 %v4979_v6, %v7606_v4  ;;  %v4279_v33 = vmul.f32 %v4998_v35, %v7606_v4  ;;  %v4473_v63 = vsel %vm4472_vm14, %v7606_v4, 0.0 }
0x12b8   :  { %v4474_v20 = vrot.slane %v4473_v63, 4  ;;  %v4378_v50 = vmul.f32 %v5012_v2, %v7606_v4 }
0x12b9   :  { %5491 = vmatmul.mubr.msk.bf16.vlgmr.msra.gmra.mrb[164].mxu0 %vm4031_vm11, %v4009_v26  ;;  %v4120_v21 = vadd.f32 %v4980_v52, %v4114_v57  ;;  %v4285_v5 = vadd.f32 %v4999_v23, %v4279_v33 }
0x12ba   :  { %5514 = vmatprep.mubr.msk.bf16.mxu0 %vm6059_vm7, %v6058_v13  ;;  %v4475_v58 = vadd.f32 %v4474_v20, %v4473_v63  ;;  %5507 = vmatpush3.bf16.msra.mxu0 %v5789_v17  ;;  %v4384_v32 = vadd.f32 %v5013_v24, %v4378_v50  ;;  %v4570_v50 = vld [vmem:[%s7755_s1 + $0x180] sm:$0x1] }
0x12bb   :  { %v4121_v27 = vand.u32 2147483647, %v4120_v21  ;;  %v4286_v10 = vand.u32 2147483647, %v4285_v5  ;;  %vm4127_vm13 = vcmp.ge.f32.partialorder %v4120_v21, 0.0  ;;  %vm4292_vm15 = vcmp.ge.f32.partialorder %v4285_v5, 0.0  ;;  %5508 = vmatprep.subr.bf16.mxu0 %v6058_v13 }
0x12bc   :  { %v4476_v7 = vrot.slane %v4475_v58, 2  ;;  %v4385_v4 = vand.u32 2147483647, %v4384_v32  ;;  %vm4391_vm10 = vcmp.ge.f32.partialorder %v4384_v32, 0.0 }
0x12bd   :  { %v4122_v37 = vsub.f32 0.0, %v4121_v27  ;;  %v4287_v9 = vsub.f32 0.0, %v4286_v10 }
0x12be   :  { %v4477_v55 = vadd.f32 %v4476_v7, %v4475_v58  ;;  %5509 = vmatpush3.bf16.msra.mxu0 %v5790_v14  ;;  %v4386_v33 = vsub.f32 0.0, %v4385_v4  ;;  %v5797_v58 = vld [vmem:[%s7756_s2 + $0x280] sm:$0xff]  }
0x12bf   :  { %v4123_v3 = vmul.f32 1.442695, %v4122_v37  ;;  %v4288_v38 = vmul.f32 1.442695, %v4287_v9  ;;  %5510 = vmatprep.subr.bf16.mxu0 %v6058_v13 }
0x12c0   :  { %v4478_v8 = vrot.slane %v4477_v55, 1 }
0x12c1   :  { %6033 = vpow2.f32 %v4123_v3 }
0x12c2   :  { %6035 = vpow2.f32 %v4288_v38  ;;  %v4479_v0 = vadd.f32 %v4478_v8, %v4477_v55  ;;  %5511 = vmatpush3.bf16.msra.mxu0 %v5791_v46  ;;  %v5800_v55 = vld [vmem:[%s7756_s2 + $0x298] ss:$0 sps:$4 sm:$0x33]  }
0x12c3   :  { %5512 = vmatprep.subr.bf16.mxu0 %v6058_v13 }
0x12c4   :  { %v4481_v54 = vmul.f32 0.25, %v4479_v0 }
0x12c6   :  { %v4490_v25 = vpack.c.bf16 %v4481_v54, %v4481_v54  ;;  %5513 = vmatpush3.bf16.msra.mxu0 %v4232_v59 }
0x12c7   :  { %5530 = vmatprep.subr.bf16.mxu0 %v6058_v13 }
0x12cb   :  { %v6034_v28 = vpop.eup %6033 }
0x12cc   :  { %v4125_v47 = vadd.f32 1.0, %v6034_v28  ;;  %v6036_v11 = vpop.eup %6035 }
0x12cd   :  { %v4290_v34 = vadd.f32 1.0, %v6036_v11 }
0x12ce   :  { %6037 = vrcp.f32 %v4125_v47 }
0x12cf   :  { %6039 = vrcp.f32 %v4290_v34  ;;  %v5793_v34 = vld [vmem:[%s7756_s2 + $0x240] sm:$0xff]  }
0x12d8   :  { %v6038_v45 = vpop.eup %6037 }
0x12d9   :  { %v4128_v30 = vmul.f32 %v6038_v45, %v6034_v28  ;;  %v6040_v40 = vpop.eup %6039 }
0x12da   :  { %v4293_v18 = vmul.f32 %v6040_v40, %v6036_v11 }
0x12db   :  { %v4129_v49 = vsel %vm4127_vm13, %v6038_v45, %v4128_v30 }
0x12dc   :  { %v4130_v15 = vmul.f32 %v4129_v49, %v4120_v21  ;;  %v4294_v16 = vsel %vm4292_vm15, %v6040_v40, %v4293_v18  ;;  %v5795_v40 = vld [vmem:[%s7756_s2 + $0x250] sm:$0xff]  }
0x12dd   :  { %v4295_v31 = vmul.f32 %v4294_v16, %v4285_v5  ;;  %v4387_v5 = vmul.f32 1.442695, %v4386_v33 }
0x12de   :  { %v4139_v42 = vpack.c.bf16 %v4130_v15, %v4130_v15 }
0x12df   :  { %v4304_v1 = vpack.c.bf16 %v4295_v31, %v4295_v31 }
0x12e0   :  { %5503 = vmatmul.mubr.msk.bf16.vlgmr.msra.gmra.mrb[164].mxu1 %vm4031_vm11, %v4139_v42  ;;  %v5794_v42 = vld [vmem:[%s7756_s2 + $0x248] sm:$0xff]  }
0x12e1   :  { %5519 = vmatpush3.bf16.msra.mxu1 %v5781_v19  ;;  %5526 = vmatprep.mubr.msk.bf16.mxu1 %vm6059_vm7, %v6058_v13 }
0x12e2   :  { %5520 = vmatprep.subr.bf16.mxu1 %v6058_v13 }
0x12e5   :  { %5521 = vmatpush3.bf16.msra.mxu1 %v5782_v53  ;;  %v5796_v53 = vld [vmem:[%s7756_s2 + $0x258] ss:$0 sps:$4 sm:$0x33]  }
0x12e6   :  { %5522 = vmatprep.subr.bf16.mxu1 %v6058_v13  ;;  %v4429_v18 = vsel %vm1861_vm3, %v5796_v53, 0 }
0x12e9   :  { %5523 = vmatpush3.bf16.msra.mxu1 %v5783_v29 }
0x12ea   :  { %5524 = vmatprep.subr.bf16.mxu1 %v6058_v13 }
0x12ed   :  { %5525 = vmatpush3.bf16.msra.mxu1 %v4330_v44 }
0x12ee   :  { %5542 = vmatprep.subr.bf16.mxu1 %v6058_v13 }
0x12f0   :  { %5527 = vmatmul.mubr.msk.bf16.vlgmr.msra.gmra.mrb[168].mxu1 %vm4031_vm11, %v4304_v1  ;;  %v5799_v1 = vld [vmem:[%s7756_s2 + $0x290] sm:$0xff]  }
0x12f1   :  { %5543 = vmatpush3.bf16.msra.mxu1 %v5785_v51  ;;  %5550 = vmatprep.mubr.msk.bf16.mxu1 %vm6059_vm7, %v6058_v13  ;;  %v5798_v51 = vld [vmem:[%s7756_s2 + $0x288] sm:$0xff]  }
0x12f2   :  { %5544 = vmatprep.subr.bf16.mxu1 %v6058_v13 }
0x12f5   :  { %5545 = vmatpush3.bf16.msra.mxu1 %v5786_v39  ;;  %v4606_v39 = vsel %vm1861_vm3, %v5800_v55, 0 }
0x12f6   :  { %5546 = vmatprep.subr.bf16.mxu1 %v6058_v13 }
0x12f9   :  { %5547 = vmatpush3.bf16.msra.mxu1 %v5787_v22 }
0x12fa   :  { %5548 = vmatprep.subr.bf16.mxu1 %v6058_v13 }
0x12fd   :  { %5549 = vmatpush3.bf16.msra.mxu1 %v4516_v43 }
0x1300   :  { %5551 = vmatmul.mubr.msk.bf16.vlgmr.msra.gmra.mrb[172].mxu1 %vm4031_vm11, %v4490_v25 }
0x138c   :  { %v4072_v60 = vpop.f32.mrb[164].mxu0 }
0x138d   :  { %v4083_v62 = vmul.f32 %v4970_v12, %v4072_v60  ;;  %v5492_v6 = vpop.f32.mrb[165].mxu0 }
0x138e   :  { %v4075_v35 = vpop.f32.mrb[166].mxu0 }
0x138f   :  { %v4089_v52 = vadd.f32 %v4971_v41, %v4083_v62  ;;  %v5493_v23 = vpop.f32.mrb[167].mxu0 }
0x1391   :  { %v4090_v26 = vand.u32 2147483647, %v4089_v52  ;;  %vm4096_vm0 = vcmp.ge.f32.partialorder %v4089_v52, 0.0 }
0x1393   :  { %v4091_v57 = vsub.f32 0.0, %v4090_v26 }
0x1395   :  { %v4092_v21 = vmul.f32 1.442695, %v4091_v57 }
0x1397   :  { %6041 = vpow2.f32 %v4092_v21 }
0x1398   :  { %6043 = vpow2.f32 %v4387_v5 }
0x13a1   :  { %v6042_v27 = vpop.eup %6041 }
0x13a2   :  { %v4094_v10 = vadd.f32 1.0, %v6042_v27  ;;  %v6044_v37 = vpop.eup %6043 }
0x13a3   :  { %v4389_v9 = vadd.f32 1.0, %v6044_v37 }
0x13a4   :  { %6045 = vrcp.f32 %v4094_v10  ;;  %v5050_v10 = vld [vmem:[%s7755_s1 + $0x188] ss:$0 sm:$0xff] }
0x13a5   :  { %6047 = vrcp.f32 %v4389_v9 }
0x13ae   :  { %v6046_v3 = vpop.eup %6045 }
0x13af   :  { %v4097_v38 = vmul.f32 %v6046_v3, %v6042_v27  ;;  %v6048_v15 = vpop.eup %6047 }
0x13b0   :  { %v4392_v63 = vmul.f32 %v6048_v15, %v6044_v37 }
0x13b1   :  { %v4098_v28 = vsel %vm4096_vm0, %v6046_v3, %v4097_v38  ;;  %v5051_v38 = vld [vmem:[%s7755_s1 + $0x190] ss:$0 sm:$0xff] }
0x13b2   :  { %v4099_v47 = vmul.f32 %v4098_v28, %v4089_v52  ;;  %v4393_v20 = vsel %vm4391_vm10, %v6048_v15, %v4392_v63 }
0x13b3   :  { %v7693_v11 = vpop.f32.mrb[164].mxu1  ;;  %v4394_v29 = vmul.f32 %v4393_v20, %v4384_v32 }
0x13b4   :  { %v4108_v45 = vpack.c.bf16 %v4099_v47, %v4099_v47  ;;  %v5504_v30 = vpop.f32.mrb[165].mxu1 }
0x13b5   :  { %v4204_v49 = vpop.f32.mrb[166].mxu1  ;;  %v4403_v44 = vpack.c.bf16 %v4394_v29, %v4394_v29 }
0x13b6   :  { %v5505_v19 = vpop.f32.mrb[167].mxu1  ;;  %5515 = vmatmul.mubr.msk.bf16.vlgmr.msra.gmra.mrb[168].mxu0 %vm4031_vm11, %v4108_v45 }
0x13b7   :  { %5531 = vmatpush3.bf16.msra.mxu0 %v5793_v34  ;;  %5538 = vmatprep.mubr.msk.bf16.mxu0 %vm6059_vm7, %v6058_v13 }
0x13b8   :  { %5532 = vmatprep.subr.bf16.mxu0 %v6058_v13 }
0x13bb   :  { %5533 = vmatpush3.bf16.msra.mxu0 %v5794_v42 }
0x13bc   :  { %5534 = vmatprep.subr.bf16.mxu0 %v6058_v13 }
0x13bf   :  { %5535 = vmatpush3.bf16.msra.mxu0 %v5795_v40 }
0x13c0   :  { %5536 = vmatprep.subr.bf16.mxu0 %v6058_v13 }
0x13c3   :  { %v4366_v56 = vpop.f32.mrb[168].mxu1  ;;  %5537 = vmatpush3.bf16.msra.mxu0 %v4429_v18 }
0x13c4   :  { %v5528_v16 = vpop.f32.mrb[169].mxu1  ;;  %5554 = vmatprep.subr.bf16.mxu0 %v6058_v13 }
0x13c5   :  { %v4369_v31 = vpop.f32.mrb[170].mxu1 }
0x13c6   :  { %v5529_v7 = vpop.f32.mrb[171].mxu1  ;;  %5539 = vmatmul.mubr.msk.bf16.vlgmr.msra.gmra.mrb[172].mxu0 %vm4031_vm11, %v4403_v44 }
0x13c7   :  { %5555 = vmatpush3.bf16.msra.mxu0 %v5797_v58  ;;  %5562 = vmatprep.mubr.msk.bf16.mxu0 %vm6059_vm7, %v6058_v13 }
0x13c8   :  { %5556 = vmatprep.subr.bf16.mxu0 %v6058_v13 }
0x13cb   :  { %5557 = vmatpush3.bf16.msra.mxu0 %v5798_v51 }
0x13cc   :  { %5558 = vmatprep.subr.bf16.mxu0 %v6058_v13 }
0x13cf   :  { %5559 = vmatpush3.bf16.msra.mxu0 %v5799_v1 }
0x13d0   :  { %5560 = vmatprep.subr.bf16.mxu0 %v6058_v13  ;;  %v4568_v13 = vld [vmem:[%s7755_s1 + $0x178] sm:$0x1] }
0x13d3   :  { %v4552_v8 = vpop.f32.mrb[172].mxu1  ;;  %5561 = vmatpush3.bf16.msra.mxu0 %v4606_v39 }
0x13d4   :  { %v4558_v22 = vand.u32 2147483647, %v4552_v8  ;;  %v5552_v36 = vpop.f32.mrb[173].mxu1  ;;  %vm4564_vm7 = vcmp.ge.f32.partialorder %v4552_v8, 0.0 }
0x13d5   :  { %v4555_v0 = vpop.f32.mrb[174].mxu1 }
0x13d6   :  { %v4559_v43 = vsub.f32 0.0, %v4558_v22  ;;  %v5553_v54 = vpop.f32.mrb[175].mxu1 }
0x13d8   :  { %v4560_v25 = vmul.f32 1.442695, %v4559_v43 }
0x13da   :  { %6049 = vpow2.f32 %v4560_v25 }
0x13e4   :  { %v6050_v17 = vpop.eup %6049 }
0x13e5   :  { %v4562_v14 = vadd.f32 1.0, %v6050_v17 }
0x13e7   :  { %6051 = vrcp.f32 %v4562_v14 }
0x13f1   :  { %v6052_v46 = vpop.eup %6051 }
0x13f2   :  { %v4565_v48 = vmul.f32 %v6052_v46, %v6050_v17 }
0x13f4   :  { %v4566_v59 = vsel %vm4564_vm7, %v6052_v46, %v4565_v48 }
0x13f5   :  { %v4567_v2 = vmul.f32 %v4566_v59, %v4552_v8 }
0x13f7   :  { %v4569_v24 = vmul.f32 %v4568_v13, %v4567_v2 }
0x13f9   :  { %v4571_v12 = vadd.f32 %v4570_v50, %v4569_v24 }
0x13fb   :  { %v4580_v32 = vpack.c.bf16 %v4571_v12, %v4571_v12 }
0x13fd   :  { %5563 = vmatmul.mubr.msk.bf16.vlgmr.msra.gmra.mrb[176].mxu0 %vm4031_vm11, %v4580_v32 }
0x1489   :  { %v4268_v60 = vpop.f32.mrb[168].mxu0 }
0x148a   :  { %v4269_v41 = vadd.f32 %v4268_v60, %v7693_v11  ;;  %v5516_v62 = vpop.f32.mrb[169].mxu0 }
0x148b   :  { %v4271_v6 = vpop.f32.mrb[170].mxu0 }
0x148c   :  { %v5517_v35 = vpop.f32.mrb[171].mxu0  ;;  %v4372_v52 = vadd.f32 %v4366_v56, %v4269_v41 }
0x1499   :  { %v4465_v23 = vpop.f32.mrb[172].mxu0 }
0x149a   :  { %v4471_v4 = vadd.f32 %v4465_v23, %v4372_v52  ;;  %v5540_v26 = vpop.f32.mrb[173].mxu0 }
0x149b   :  { %v4468_v57 = vpop.f32.mrb[174].mxu0 }
0x149c   :  { %v5541_v33 = vpop.f32.mrb[175].mxu0 }
0x14d0   :  { %v4642_v21 = vpop.f32.mrb[176].mxu0 }
0x14d1   :  { %v4651_v5 = vrot.slane %v4642_v21, %v6408_v61  ;;  %v5564_v27 = vpop.f32.mrb[177].mxu0 }
0x14d2   :  { %v4645_v37 = vpop.f32.mrb[178].mxu0 }
0x14d3   :  { %v4652_v9 = vadd.f32 %v4651_v5, %v4471_v4  ;;  %v5565_v3 = vpop.f32.mrb[179].mxu0 }
0x14d5   :  { %v4658_v28 = vmul.f32 %v5050_v10, %v4652_v9 }
0x14d7   :  { %v4664_v47 = vadd.f32 %v5051_v38, %v4658_v28 }
0x14d9   :  { %v4665_v11 = vand.u32 2147483647, %v4664_v47  ;;  %vm4671_vm3 = vcmp.ge.f32.partialorder %v4664_v47, 0.0 }
0x14db   :  { %v4666_v34 = vsub.f32 0.0, %v4665_v11 }
0x14dd   :  { %v4667_v45 = vmul.f32 1.442695, %v4666_v34 }
0x14df   :  { %6053 = vpow2.f32 %v4667_v45 }
0x14e9   :  { %v6054_v30 = vpop.eup %6053 }
0x14ea   :  { %v4669_v61 = vadd.f32 1.0, %v6054_v30 }
0x14ec   :  { %6055 = vrcp.f32 %v4669_v61 }
0x14f6   :  { %v6056_v49 = vpop.eup %6055 }
0x14f7   :  { %v4672_v15 = vmul.f32 %v6056_v49, %v6054_v30 }
0x14f9   :  { %v4673_v19 = vsel %vm4671_vm3, %v6056_v49, %v4672_v15 }
0x14fa   :  { %v4674_v42 = vmul.f32 %v4673_v19, %v4664_v47 }
0x14fc   :  { %4675 = vst.msk [vmem:[%s7762_s8] sm:$0xf] %vm4472_vm14, %v4674_v42 }

</bundles_post_ra>
